<compile_context>
chip_gen: v6e
topology: v6e:2x2x1
jax: 0.10.0
libtpu: 0.0.40
codegen_flags: <defaults>
</compile_context>

<pallas_src>
import functools
import math

import jax
import jax.numpy as jnp
from jax.experimental import pallas as pl
from jax.experimental.pallas import tpu as pltpu

LEAKY_SLOPE = 0.1   # WRN BasicBlock uses LeakyReLU(negative_slope=0.1)
BN_EPS = 1e-5


# ----------------------------------------------------------------------------
# In-kernel helpers (operate on VMEM-resident values)
# ----------------------------------------------------------------------------
def _lrelu(y):
    return jnp.where(y > 0, y, LEAKY_SLOPE * y)


def _col_index(m, w):
    """(m, 1) int32 column index j for flattened row-major positions i*w + j."""
    q = jax.lax.broadcasted_iota(jnp.int32, (m, 1), 0)
    if (w & (w - 1)) == 0:                      # power of two -> cheap AND
        return jnp.bitwise_and(q, w - 1)
    return jax.lax.rem(q, w)


def _conv3x3_s1(a, w_ref, h, w):
    """3x3 conv, stride 1, pad 1, on a flattened (h*w, cin) activation value.

    Taps are built fully in VMEM: zero-extend the flattened activation by
    (w+1) rows on each side (out-of-image rows then read real zeros), take a
    static row-shifted slice per tap, kill the column wrap-around of the
    flattened layout with an iota mask, and accumulate 9 small bf16 MXU
    matmuls in f32.
    """
    m = h * w
    cin = a.shape[1]
    cout = w_ref.shape[2]
    a_bf = a.astype(jnp.bfloat16)
    zpad = jnp.zeros((w + 1, cin), jnp.bfloat16)
    abig = jnp.concatenate([zpad, a_bf, zpad], axis=0)       # (m + 2w + 2, cin)
    col = _col_index(m, w)
    acc = jnp.zeros((m, cout), jnp.float32)
    for kh in range(3):
        for kw in range(3):
            s = (kh - 1) * w + (kw - 1)
            t = abig[w + 1 + s: w + 1 + s + m, :]
            if kw == 0:                 # reads input col j-1 -> needs j >= 1
                t = jnp.where(col >= 1, t, jnp.zeros_like(t))
            elif kw == 2:               # reads input col j+1 -> needs j <= w-2
                t = jnp.where(col <= w - 2, t, jnp.zeros_like(t))
            acc = acc + jnp.dot(t, w_ref[kh * 3 + kw],
                                preferred_element_type=jnp.float32)
    return acc


def _conv3x3_s2_polyphase(a_pp, w_ref, h2, w2):
    """3x3 conv, stride 2, pad 1, input given as its 4 polyphase components
    a_pp[2*pa+pb][m*w2 + n] = a[2m+pa, 2n+pb], each (h2*w2, cin).

    Each tap reads exactly one polyphase component at a static row offset in
    {0, -1, -w2, -(w2+1)}; the image zero-border maps onto either a front
    zero-extension of the component or the column mask.  Output is flattened
    row-major over the (h2, w2) output grid.
    """
    m = h2 * w2
    cin = a_pp[0].shape[1]
    cout = w_ref.shape[2]
    comps = [c.astype(jnp.bfloat16) for c in a_pp]
    col = _col_index(m, w2)
    acc = jnp.zeros((m, cout), jnp.float32)

    def decomp(k):                      # tap index -> (parity, output offset)
        if k == 0:
            return 1, -1
        if k == 1:
            return 0, 0
        return 1, 0

    for kh in range(3):
        pa, dh = decomp(kh)
        for kw in range(3):
            pb, dw = decomp(kw)
            comp = comps[2 * pa + pb]
            s = dh * w2 + dw
            if s == 0:
                t = comp
            else:
                zpad = jnp.zeros((-s, cin), jnp.bfloat16)
                t = jnp.concatenate([zpad, comp], axis=0)[:m, :]
            if dw == -1:                # reads output col-1 -> needs ow >= 1
                t = jnp.where(col >= 1, t, jnp.zeros_like(t))
            acc = acc + jnp.dot(t, w_ref[kh * 3 + kw],
                                preferred_element_type=jnp.float32)
    return acc


# ----------------------------------------------------------------------------
# Fused NetworkBlock kernel (one grid step == one image, all blocks)
# ----------------------------------------------------------------------------
def _make_network_block_kernel(block_cfgs, stride, h, w):
    def kernel(*refs):
        it = iter(refs)
        x_ref = next(it)
        brefs = []
        for cfg in block_cfgs:
            r = {k: next(it) for k in ("w1", "w2", "s1", "b1", "s2", "b2")}
            if cfg["has_sc"]:
                r["sc"] = next(it)
            brefs.append(r)
        o_ref = next(it)

        # ---------------- first block (may be strided / projected) ----------
        cfg0, r0 = block_cfgs[0], brefs[0]
        if stride == 1:
            oh, ow = h, w
            x2 = x_ref[0]                                          # (h*w, cin)
            a1 = _lrelu(x2 * r0["s1"][...] + r0["b1"][...])
            pre = _conv3x3_s1(a1, r0["w1"], oh, ow)
            res = (jnp.dot(a1.astype(jnp.bfloat16), r0["sc"][...],
                           preferred_element_type=jnp.float32)
                   if cfg0["has_sc"] else x2)
        else:                                                      # stride == 2
            oh, ow = h // 2, w // 2
            a1_pp = [_lrelu(x_ref[0, c] * r0["s1"][...] + r0["b1"][...])
                     for c in range(4)]
            pre = _conv3x3_s2_polyphase(a1_pp, r0["w1"], oh, ow)
            # 1x1 stride-2 shortcut conv reads only the (even, even) phase.
            res = jnp.dot(a1_pp[0].astype(jnp.bfloat16), r0["sc"][...],
                          preferred_element_type=jnp.float32)
        a2 = _lrelu(pre * r0["s2"][...] + r0["b2"][...])
        out = res + _conv3x3_s1(a2, r0["w2"], oh, ow)
        # TODO(synk): training-mode dropout (drop_rate > 0) not implemented;
        #             eval / drop_rate == 0 semantics (identity).

        # ---------------- remaining (stride-1, identity) blocks -------------
        for cfg, r in zip(block_cfgs[1:], brefs[1:]):
            a1 = _lrelu(out * r["s1"][...] + r["b1"][...])
            pre = _conv3x3_s1(a1, r["w1"], oh, ow)
            a2 = _lrelu(pre * r["s2"][...] + r["b2"][...])
            res = (jnp.dot(a1.astype(jnp.bfloat16), r["sc"][...],
                           preferred_element_type=jnp.float32)
                   if cfg["has_sc"] else out)
            out = res + _conv3x3_s1(a2, r["w2"], oh, ow)

        o_ref[0] = out
    return kernel


# ----------------------------------------------------------------------------
# Parameter prep (hoisted once per forward) + pallas_call wrapper
# ----------------------------------------------------------------------------
def prepare_block_params(p):
    """BN folding (inference semantics), per-tap weight layout, bf16 casts."""
    cout, cin = p["conv1_w"].shape[0], p["conv1_w"].shape[1]
    s1 = p["bn1_gamma"] * jax.lax.rsqrt(p["bn1_var"] + BN_EPS)
    b1 = p["bn1_beta"] - p["bn1_mean"] * s1
    s2 = p["bn2_gamma"] * jax.lax.rsqrt(p["bn2_var"] + BN_EPS)
    b2 = p["bn2_beta"] - p["bn2_mean"] * s2

    def taps(w_oikk):
        co, ci, kh, kw = w_oikk.shape
        return (jnp.transpose(w_oikk, (2, 3, 1, 0))
                .reshape(kh * kw, ci, co).astype(jnp.bfloat16))

    pp = {
        "cin": cin, "cout": cout,
        "s1": s1.reshape(1, cin).astype(jnp.float32),
        "b1": b1.reshape(1, cin).astype(jnp.float32),
        "s2": s2.reshape(1, cout).astype(jnp.float32),
        "b2": b2.reshape(1, cout).astype(jnp.float32),
        "w1": taps(p["conv1_w"]),
        "w2": taps(p["conv2_w"]),
        "sc": None,
    }
    if p.get("sc_w") is not None:
        pp["sc"] = jnp.transpose(p["sc_w"][:, :, 0, 0]).astype(jnp.bfloat16)
    return pp


def network_block_forward(x_nchw, blocks, stride):
    if stride not in (1, 2):
        raise NotImplementedError("stride must be 1 or 2")
    n, cin0, h, w = x_nchw.shape
    x = jnp.transpose(x_nchw, (0, 2, 3, 1)).astype(jnp.float32)    # NCHW -> NHWC
    pps = [prepare_block_params(p) for p in blocks]
    cout = pps[-1]["cout"]

    if stride == 1:
        oh, ow = h, w
        x_in = x.reshape(n, h * w, cin0)
        x_spec = pl.BlockSpec((1, h * w, cin0), lambda i: (i, 0, 0))
    else:
        assert h % 2 == 0 and w % 2 == 0, "stride-2 path assumes even H, W"
        if pps[0]["sc"] is None:
            raise NotImplementedError("stride 2 requires a projection shortcut")
        oh, ow = h // 2, w // 2
        # Polyphase (even/odd row & col) relayout of x; 1x bytes, done once in
        # XLA so the kernel needs no strided loads for the stride-2 conv.
        x_in = (x.reshape(n, oh, 2, ow, 2, cin0)
                  .transpose(0, 2, 4, 1, 3, 5)
                  .reshape(n, 4, oh * ow, cin0))
        x_spec = pl.BlockSpec((1, 4, oh * ow, cin0), lambda i: (i, 0, 0, 0))

    def resident(a):        # whole array resident; same block every grid step
        nd = a.ndim
        return pl.BlockSpec(a.shape, lambda i, _nd=nd: (0,) * _nd)

    args, in_specs, block_cfgs = [x_in], [x_spec], []
    for pp in pps:
        block_cfgs.append({"cin": pp["cin"], "cout": pp["cout"],
                           "has_sc": pp["sc"] is not None})
        for key in ("w1", "w2", "s1", "b1", "s2", "b2"):
            args.append(pp[key])
            in_specs.append(resident(pp[key]))
        if pp["sc"] is not None:
            args.append(pp["sc"])
            in_specs.append(resident(pp["sc"]))

    out = pl.pallas_call(
        _make_network_block_kernel(block_cfgs, stride, h, w),
        out_shape=jax.ShapeDtypeStruct((n, oh * ow, cout), jnp.float32),
        grid=(n,),
        in_specs=in_specs,
        out_specs=pl.BlockSpec((1, oh * ow, cout), lambda i: (i, 0, 0)),
        compiler_params=pltpu.CompilerParams(
            dimension_semantics=("parallel",)),
    )(*args)
    out = out.reshape(n, oh, ow, cout)
    return jnp.transpose(out, (0, 3, 1, 2))                        # NHWC -> NCHW


# ----------------------------------------------------------------------------
# Deterministic parameter init (matching nn.Conv2d / nn.BatchNorm2d shapes)
# ----------------------------------------------------------------------------
def init_block_params(key, cin, cout):
    ks = jax.random.split(key, 12)

    def conv_init(k, co, ci, ksz):
        fan = ksz * ksz * co
        return jax.random.normal(k, (co, ci, ksz, ksz), jnp.float32) * math.sqrt(2.0 / fan)

    return {
        "conv1_w": conv_init(ks[0], cout, cin, 3),
        "conv2_w": conv_init(ks[1], cout, cout, 3),
        "bn1_gamma": 1.0 + 0.1 * jax.random.normal(ks[2], (cin,), jnp.float32),
        "bn1_beta": 0.1 * jax.random.normal(ks[3], (cin,), jnp.float32),
        "bn1_mean": 0.1 * jax.random.normal(ks[4], (cin,), jnp.float32),
        "bn1_var": 1.0 + 0.1 * jnp.abs(jax.random.normal(ks[5], (cin,), jnp.float32)),
        "bn2_gamma": 1.0 + 0.1 * jax.random.normal(ks[6], (cout,), jnp.float32),
        "bn2_beta": 0.1 * jax.random.normal(ks[7], (cout,), jnp.float32),
        "bn2_mean": 0.1 * jax.random.normal(ks[8], (cout,), jnp.float32),
        "bn2_var": 1.0 + 0.1 * jnp.abs(jax.random.normal(ks[9], (cout,), jnp.float32)),
        "sc_w": conv_init(ks[10], cout, cin, 1) if cin != cout else None,
    }


# ----------------------------------------------------------------------------
# Reference: same module structure, at the same precision the kernel uses
# (f32 BN/activations/accumulation, bf16 conv operands).
# ----------------------------------------------------------------------------
def _ref_conv(x_nhwc, w_oikk, stride, pad):
    w_hwio = jnp.transpose(w_oikk, (2, 3, 1, 0)).astype(x_nhwc.dtype)
    return jax.lax.conv_general_dilated(
        x_nhwc, w_hwio, (stride, stride), ((pad, pad), (pad, pad)),
        dimension_numbers=("NHWC", "HWIO", "NHWC"),
        preferred_element_type=jnp.float32)


def _ref_bn_lrelu(x, gamma, beta, mean, var):
    scale = gamma * jax.lax.rsqrt(var + BN_EPS)
    shift = beta - mean * scale
    y = x.astype(jnp.float32) * scale + shift
    return jnp.where(y > 0, y, LEAKY_SLOPE * y)


def ref_network_block(x_nchw, blocks, stride):
    x = jnp.transpose(x_nchw, (0, 2, 3, 1)).astype(jnp.float32)
    for i, p in enumerate(blocks):
        s = stride if i == 0 else 1
        a1 = _ref_bn_lrelu(x, p["bn1_gamma"], p["bn1_beta"],
                           p["bn1_mean"], p["bn1_var"]).astype(jnp.bfloat16)
        h = _ref_conv(a1, p["conv1_w"], s, 1)
        a2 = _ref_bn_lrelu(h, p["bn2_gamma"], p["bn2_beta"],
                           p["bn2_mean"], p["bn2_var"]).astype(jnp.bfloat16)
        out = _ref_conv(a2, p["conv2_w"], 1, 1)
        res = x if p["sc_w"] is None else _ref_conv(a1, p["sc_w"], s, 0)
        x = res + out
    return jnp.transpose(x, (0, 3, 1, 2))


# ----------------------------------------------------------------------------
if __name__ == "__main__":
    key = jax.random.PRNGKey(0)
    kx, kp = jax.random.split(key)

    # NetworkBlock(nb_layers=2, in_planes=16, out_planes=32, block=BasicBlock,
    #              stride=2, drop_rate=0.0), inference semantics.
    nb_layers, in_planes, out_planes, stride = 2, 16, 32, 2

    x = jax.random.normal(kx, (2, in_planes, 16, 16), jnp.float32)   # NCHW

    bkeys = jax.random.split(kp, nb_layers)
    blocks = [
        init_block_params(bkeys[i], in_planes if i == 0 else out_planes, out_planes)
        for i in range(nb_layers)
    ]

    fwd = jax.jit(functools.partial(network_block_forward, stride=stride))
    out = jax.block_until_ready(fwd(x, blocks))

    ref = ref_network_block(x, blocks, stride)
    assert out.shape == ref.shape == (2, out_planes, 8, 8), (out.shape, ref.shape)
    err = float(jnp.max(jnp.abs(out - ref)))
    assert jnp.allclose(out, ref, atol=5e-3, rtol=5e-3), f"max abs err {err}"

    print("KERNEL_OK")
</pallas_src>

<mosaic_0001>
module attributes {stable_mosaic.version = 11 : i64} {
  func.func @kernel(%arg0: i32, %arg1: memref<1x4x64x16xf32, #tpu.memory_space<vmem>>, %arg2: memref<9x16x32xbf16, #tpu.memory_space<vmem>>, %arg3: memref<9x32x32xbf16, #tpu.memory_space<vmem>>, %arg4: memref<1x16xf32, #tpu.memory_space<vmem>>, %arg5: memref<1x16xf32, #tpu.memory_space<vmem>>, %arg6: memref<1x32xf32, #tpu.memory_space<vmem>>, %arg7: memref<1x32xf32, #tpu.memory_space<vmem>>, %arg8: memref<16x32xbf16, #tpu.memory_space<vmem>>, %arg9: memref<9x32x32xbf16, #tpu.memory_space<vmem>>, %arg10: memref<9x32x32xbf16, #tpu.memory_space<vmem>>, %arg11: memref<1x32xf32, #tpu.memory_space<vmem>>, %arg12: memref<1x32xf32, #tpu.memory_space<vmem>>, %arg13: memref<1x32xf32, #tpu.memory_space<vmem>>, %arg14: memref<1x32xf32, #tpu.memory_space<vmem>>, %arg15: memref<1x64x32xf32, #tpu.memory_space<vmem>>) attributes {dimension_semantics = [#tpu.dimension_semantics<parallel>], iteration_bounds = array<i64: 2>, scalar_prefetch = 0 : i64, scratch_operands = 0 : i64, tpu.core_type = #tpu.core_type<tc>, window_params = [{transform_indices = @transform_0, window_bounds = array<i64: 1, 4, 64, 16>}, {pipeline_mode = #tpu.pipeline_mode<synchronous>, transform_indices = @transform_1, window_bounds = array<i64: 9, 16, 32>}, {pipeline_mode = #tpu.pipeline_mode<synchronous>, transform_indices = @transform_2, window_bounds = array<i64: 9, 32, 32>}, {pipeline_mode = #tpu.pipeline_mode<synchronous>, transform_indices = @transform_3, window_bounds = array<i64: 1, 16>}, {pipeline_mode = #tpu.pipeline_mode<synchronous>, transform_indices = @transform_4, window_bounds = array<i64: 1, 16>}, {pipeline_mode = #tpu.pipeline_mode<synchronous>, transform_indices = @transform_5, window_bounds = array<i64: 1, 32>}, {pipeline_mode = #tpu.pipeline_mode<synchronous>, transform_indices = @transform_6, window_bounds = array<i64: 1, 32>}, {pipeline_mode = #tpu.pipeline_mode<synchronous>, transform_indices = @transform_7, window_bounds = array<i64: 16, 32>}, {pipeline_mode = #tpu.pipeline_mode<synchronous>, transform_indices = @transform_8, window_bounds = array<i64: 9, 32, 32>}, {pipeline_mode = #tpu.pipeline_mode<synchronous>, transform_indices = @transform_9, window_bounds = array<i64: 9, 32, 32>}, {pipeline_mode = #tpu.pipeline_mode<synchronous>, transform_indices = @transform_10, window_bounds = array<i64: 1, 32>}, {pipeline_mode = #tpu.pipeline_mode<synchronous>, transform_indices = @transform_11, window_bounds = array<i64: 1, 32>}, {pipeline_mode = #tpu.pipeline_mode<synchronous>, transform_indices = @transform_12, window_bounds = array<i64: 1, 32>}, {pipeline_mode = #tpu.pipeline_mode<synchronous>, transform_indices = @transform_13, window_bounds = array<i64: 1, 32>}, {transform_indices = @transform_14, window_bounds = array<i64: 1, 64, 32>}]} {
    %c0 = arith.constant 0 : index
    %c0_0 = arith.constant 0 : index
    %c0_1 = arith.constant 0 : index
    %c0_2 = arith.constant 0 : index
    %0 = vector.load %arg1[%c0, %c0_0, %c0_1, %c0_2] : memref<1x4x64x16xf32, #tpu.memory_space<vmem>>, vector<1x1x64x16xf32>
    %1 = vector.shape_cast %0 : vector<1x1x64x16xf32> to vector<64x16xf32>
    %c0_3 = arith.constant 0 : index
    %c0_4 = arith.constant 0 : index
    %2 = vector.load %arg4[%c0_3, %c0_4] : memref<1x16xf32, #tpu.memory_space<vmem>>, vector<1x16xf32>
    %3 = vector.broadcast %2 : vector<1x16xf32> to vector<64x16xf32>
    %4 = arith.mulf %1, %3 : vector<64x16xf32>
    %c0_5 = arith.constant 0 : index
    %c0_6 = arith.constant 0 : index
    %5 = vector.load %arg5[%c0_5, %c0_6] : memref<1x16xf32, #tpu.memory_space<vmem>>, vector<1x16xf32>
    %6 = vector.broadcast %5 : vector<1x16xf32> to vector<64x16xf32>
    %7 = arith.addf %4, %6 : vector<64x16xf32>
    %cst = arith.constant 0.000000e+00 : f32
    %8 = vector.broadcast %cst : f32 to vector<64x16xf32>
    %9 = arith.cmpf ogt, %7, %8 : vector<64x16xf32>
    %cst_7 = arith.constant 1.000000e-01 : f32
    %10 = vector.broadcast %cst_7 : f32 to vector<64x16xf32>
    %11 = arith.mulf %10, %7 : vector<64x16xf32>
    %12 = arith.select %9, %7, %11 : vector<64x16xi1>, vector<64x16xf32>
    %c0_8 = arith.constant 0 : index
    %c1 = arith.constant 1 : index
    %c0_9 = arith.constant 0 : index
    %c0_10 = arith.constant 0 : index
    %13 = vector.load %arg1[%c0_8, %c1, %c0_9, %c0_10] : memref<1x4x64x16xf32, #tpu.memory_space<vmem>>, vector<1x1x64x16xf32>
    %14 = vector.shape_cast %13 : vector<1x1x64x16xf32> to vector<64x16xf32>
    %c0_11 = arith.constant 0 : index
    %c0_12 = arith.constant 0 : index
    %15 = vector.load %arg4[%c0_11, %c0_12] : memref<1x16xf32, #tpu.memory_space<vmem>>, vector<1x16xf32>
    %16 = vector.broadcast %15 : vector<1x16xf32> to vector<64x16xf32>
    %17 = arith.mulf %14, %16 : vector<64x16xf32>
    %c0_13 = arith.constant 0 : index
    %c0_14 = arith.constant 0 : index
    %18 = vector.load %arg5[%c0_13, %c0_14] : memref<1x16xf32, #tpu.memory_space<vmem>>, vector<1x16xf32>
    %19 = vector.broadcast %18 : vector<1x16xf32> to vector<64x16xf32>
    %20 = arith.addf %17, %19 : vector<64x16xf32>
    %cst_15 = arith.constant 0.000000e+00 : f32
    %21 = vector.broadcast %cst_15 : f32 to vector<64x16xf32>
    %22 = arith.cmpf ogt, %20, %21 : vector<64x16xf32>
    %cst_16 = arith.constant 1.000000e-01 : f32
    %23 = vector.broadcast %cst_16 : f32 to vector<64x16xf32>
    %24 = arith.mulf %23, %20 : vector<64x16xf32>
    %25 = arith.select %22, %20, %24 : vector<64x16xi1>, vector<64x16xf32>
    %c0_17 = arith.constant 0 : index
    %c2 = arith.constant 2 : index
    %c0_18 = arith.constant 0 : index
    %c0_19 = arith.constant 0 : index
    %26 = vector.load %arg1[%c0_17, %c2, %c0_18, %c0_19] : memref<1x4x64x16xf32, #tpu.memory_space<vmem>>, vector<1x1x64x16xf32>
    %27 = vector.shape_cast %26 : vector<1x1x64x16xf32> to vector<64x16xf32>
    %c0_20 = arith.constant 0 : index
    %c0_21 = arith.constant 0 : index
    %28 = vector.load %arg4[%c0_20, %c0_21] : memref<1x16xf32, #tpu.memory_space<vmem>>, vector<1x16xf32>
    %29 = vector.broadcast %28 : vector<1x16xf32> to vector<64x16xf32>
    %30 = arith.mulf %27, %29 : vector<64x16xf32>
    %c0_22 = arith.constant 0 : index
    %c0_23 = arith.constant 0 : index
    %31 = vector.load %arg5[%c0_22, %c0_23] : memref<1x16xf32, #tpu.memory_space<vmem>>, vector<1x16xf32>
    %32 = vector.broadcast %31 : vector<1x16xf32> to vector<64x16xf32>
    %33 = arith.addf %30, %32 : vector<64x16xf32>
    %cst_24 = arith.constant 0.000000e+00 : f32
    %34 = vector.broadcast %cst_24 : f32 to vector<64x16xf32>
    %35 = arith.cmpf ogt, %33, %34 : vector<64x16xf32>
    %cst_25 = arith.constant 1.000000e-01 : f32
    %36 = vector.broadcast %cst_25 : f32 to vector<64x16xf32>
    %37 = arith.mulf %36, %33 : vector<64x16xf32>
    %38 = arith.select %35, %33, %37 : vector<64x16xi1>, vector<64x16xf32>
    %c0_26 = arith.constant 0 : index
    %c3 = arith.constant 3 : index
    %c0_27 = arith.constant 0 : index
    %c0_28 = arith.constant 0 : index
    %39 = vector.load %arg1[%c0_26, %c3, %c0_27, %c0_28] : memref<1x4x64x16xf32, #tpu.memory_space<vmem>>, vector<1x1x64x16xf32>
    %40 = vector.shape_cast %39 : vector<1x1x64x16xf32> to vector<64x16xf32>
    %c0_29 = arith.constant 0 : index
    %c0_30 = arith.constant 0 : index
    %41 = vector.load %arg4[%c0_29, %c0_30] : memref<1x16xf32, #tpu.memory_space<vmem>>, vector<1x16xf32>
    %42 = vector.broadcast %41 : vector<1x16xf32> to vector<64x16xf32>
    %43 = arith.mulf %40, %42 : vector<64x16xf32>
    %c0_31 = arith.constant 0 : index
    %c0_32 = arith.constant 0 : index
    %44 = vector.load %arg5[%c0_31, %c0_32] : memref<1x16xf32, #tpu.memory_space<vmem>>, vector<1x16xf32>
    %45 = vector.broadcast %44 : vector<1x16xf32> to vector<64x16xf32>
    %46 = arith.addf %43, %45 : vector<64x16xf32>
    %cst_33 = arith.constant 0.000000e+00 : f32
    %47 = vector.broadcast %cst_33 : f32 to vector<64x16xf32>
    %48 = arith.cmpf ogt, %46, %47 : vector<64x16xf32>
    %cst_34 = arith.constant 1.000000e-01 : f32
    %49 = vector.broadcast %cst_34 : f32 to vector<64x16xf32>
    %50 = arith.mulf %49, %46 : vector<64x16xf32>
    %51 = arith.select %48, %46, %50 : vector<64x16xi1>, vector<64x16xf32>
    %52 = arith.truncf %12 : vector<64x16xf32> to vector<64x16xbf16>
    %53 = arith.truncf %25 : vector<64x16xf32> to vector<64x16xbf16>
    %54 = arith.truncf %38 : vector<64x16xf32> to vector<64x16xbf16>
    %55 = arith.truncf %51 : vector<64x16xf32> to vector<64x16xbf16>
    %56 = tpu.iota {dimensions = array<i32: 0>} : vector<64x1xi32>
    %c7_i32 = arith.constant 7 : i32
    %57 = vector.broadcast %c7_i32 : i32 to vector<64x1xi32>
    %58 = arith.andi %56, %57 : vector<64x1xi32>
    %cst_35 = arith.constant 0.000000e+00 : f32
    %59 = vector.broadcast %cst_35 : f32 to vector<64x32xf32>
    %cst_36 = arith.constant 0.000000e+00 : bf16
    %60 = vector.broadcast %cst_36 : bf16 to vector<9x16xbf16>
    %61 = tpu.concatenate %60, %55 in 0 : vector<9x16xbf16>, vector<64x16xbf16> -> vector<73x16xbf16>
    %62 = vector.extract_strided_slice %61 {offsets = [0, 0], sizes = [64, 16], strides = [1, 1]} : vector<73x16xbf16> to vector<64x16xbf16>
    %c1_i32 = arith.constant 1 : i32
    %63 = vector.broadcast %c1_i32 : i32 to vector<64x1xi32>
    %64 = arith.cmpi sge, %58, %63 : vector<64x1xi32>
    %cst_37 = arith.constant 0.000000e+00 : bf16
    %65 = vector.broadcast %cst_37 : bf16 to vector<64x16xbf16>
    %66 = vector.shape_cast %64 : vector<64x1xi1> to vector<64x1xi1>
    %67 = vector.broadcast %66 : vector<64x1xi1> to vector<64x16xi1>
    %68 = arith.select %67, %62, %65 : vector<64x16xi1>, vector<64x16xbf16>
    %c0_38 = arith.constant 0 : index
    %c0_39 = arith.constant 0 : index
    %c0_40 = arith.constant 0 : index
    %69 = vector.load %arg2[%c0_38, %c0_39, %c0_40] : memref<9x16x32xbf16, #tpu.memory_space<vmem>>, vector<1x16x32xbf16>
    %70 = vector.shape_cast %69 : vector<1x16x32xbf16> to vector<16x32xbf16>
    %cst_41 = arith.constant dense<0.000000e+00> : vector<64x32xf32>
    %71 = tpu.matmul %68, %70, %cst_41 {dimension_numbers = #tpu.dot_dimension_numbers<[1], [0], [0], [1], [0, 0, 1, 1], [], []>} : vector<64x16xbf16>, vector<16x32xbf16>, vector<64x32xf32> -> vector<64x32xf32>
    %72 = arith.addf %59, %71 : vector<64x32xf32>
    %cst_42 = arith.constant 0.000000e+00 : bf16
    %73 = vector.broadcast %cst_42 : bf16 to vector<8x16xbf16>
    %74 = tpu.concatenate %73, %54 in 0 : vector<8x16xbf16>, vector<64x16xbf16> -> vector<72x16xbf16>
    %75 = vector.extract_strided_slice %74 {offsets = [0, 0], sizes = [64, 16], strides = [1, 1]} : vector<72x16xbf16> to vector<64x16xbf16>
    %c1_43 = arith.constant 1 : index
    %c0_44 = arith.constant 0 : index
    %c0_45 = arith.constant 0 : index
    %76 = vector.load %arg2[%c1_43, %c0_44, %c0_45] : memref<9x16x32xbf16, #tpu.memory_space<vmem>>, vector<1x16x32xbf16>
    %77 = vector.shape_cast %76 : vector<1x16x32xbf16> to vector<16x32xbf16>
    %cst_46 = arith.constant dense<0.000000e+00> : vector<64x32xf32>
    %78 = tpu.matmul %75, %77, %cst_46 {dimension_numbers = #tpu.dot_dimension_numbers<[1], [0], [0], [1], [0, 0, 1, 1], [], []>} : vector<64x16xbf16>, vector<16x32xbf16>, vector<64x32xf32> -> vector<64x32xf32>
    %79 = arith.addf %72, %78 : vector<64x32xf32>
    %cst_47 = arith.constant 0.000000e+00 : bf16
    %80 = vector.broadcast %cst_47 : bf16 to vector<8x16xbf16>
    %81 = tpu.concatenate %80, %55 in 0 : vector<8x16xbf16>, vector<64x16xbf16> -> vector<72x16xbf16>
    %82 = vector.extract_strided_slice %81 {offsets = [0, 0], sizes = [64, 16], strides = [1, 1]} : vector<72x16xbf16> to vector<64x16xbf16>
    %c2_48 = arith.constant 2 : index
    %c0_49 = arith.constant 0 : index
    %c0_50 = arith.constant 0 : index
    %83 = vector.load %arg2[%c2_48, %c0_49, %c0_50] : memref<9x16x32xbf16, #tpu.memory_space<vmem>>, vector<1x16x32xbf16>
    %84 = vector.shape_cast %83 : vector<1x16x32xbf16> to vector<16x32xbf16>
    %cst_51 = arith.constant dense<0.000000e+00> : vector<64x32xf32>
    %85 = tpu.matmul %82, %84, %cst_51 {dimension_numbers = #tpu.dot_dimension_numbers<[1], [0], [0], [1], [0, 0, 1, 1], [], []>} : vector<64x16xbf16>, vector<16x32xbf16>, vector<64x32xf32> -> vector<64x32xf32>
    %86 = arith.addf %79, %85 : vector<64x32xf32>
    %cst_52 = arith.constant 0.000000e+00 : bf16
    %87 = vector.broadcast %cst_52 : bf16 to vector<1x16xbf16>
    %88 = tpu.concatenate %87, %53 in 0 : vector<1x16xbf16>, vector<64x16xbf16> -> vector<65x16xbf16>
    %89 = vector.extract_strided_slice %88 {offsets = [0, 0], sizes = [64, 16], strides = [1, 1]} : vector<65x16xbf16> to vector<64x16xbf16>
    %c1_i32_53 = arith.constant 1 : i32
    %90 = vector.broadcast %c1_i32_53 : i32 to vector<64x1xi32>
    %91 = arith.cmpi sge, %58, %90 : vector<64x1xi32>
    %cst_54 = arith.constant 0.000000e+00 : bf16
    %92 = vector.broadcast %cst_54 : bf16 to vector<64x16xbf16>
    %93 = vector.shape_cast %91 : vector<64x1xi1> to vector<64x1xi1>
    %94 = vector.broadcast %93 : vector<64x1xi1> to vector<64x16xi1>
    %95 = arith.select %94, %89, %92 : vector<64x16xi1>, vector<64x16xbf16>
    %c3_55 = arith.constant 3 : index
    %c0_56 = arith.constant 0 : index
    %c0_57 = arith.constant 0 : index
    %96 = vector.load %arg2[%c3_55, %c0_56, %c0_57] : memref<9x16x32xbf16, #tpu.memory_space<vmem>>, vector<1x16x32xbf16>
    %97 = vector.shape_cast %96 : vector<1x16x32xbf16> to vector<16x32xbf16>
    %cst_58 = arith.constant dense<0.000000e+00> : vector<64x32xf32>
    %98 = tpu.matmul %95, %97, %cst_58 {dimension_numbers = #tpu.dot_dimension_numbers<[1], [0], [0], [1], [0, 0, 1, 1], [], []>} : vector<64x16xbf16>, vector<16x32xbf16>, vector<64x32xf32> -> vector<64x32xf32>
    %99 = arith.addf %86, %98 : vector<64x32xf32>
    %c4 = arith.constant 4 : index
    %c0_59 = arith.constant 0 : index
    %c0_60 = arith.constant 0 : index
    %100 = vector.load %arg2[%c4, %c0_59, %c0_60] : memref<9x16x32xbf16, #tpu.memory_space<vmem>>, vector<1x16x32xbf16>
    %101 = vector.shape_cast %100 : vector<1x16x32xbf16> to vector<16x32xbf16>
    %cst_61 = arith.constant dense<0.000000e+00> : vector<64x32xf32>
    %102 = tpu.matmul %52, %101, %cst_61 {dimension_numbers = #tpu.dot_dimension_numbers<[1], [0], [0], [1], [0, 0, 1, 1], [], []>} : vector<64x16xbf16>, vector<16x32xbf16>, vector<64x32xf32> -> vector<64x32xf32>
    %103 = arith.addf %99, %102 : vector<64x32xf32>
    %c5 = arith.constant 5 : index
    %c0_62 = arith.constant 0 : index
    %c0_63 = arith.constant 0 : index
    %104 = vector.load %arg2[%c5, %c0_62, %c0_63] : memref<9x16x32xbf16, #tpu.memory_space<vmem>>, vector<1x16x32xbf16>
    %105 = vector.shape_cast %104 : vector<1x16x32xbf16> to vector<16x32xbf16>
    %cst_64 = arith.constant dense<0.000000e+00> : vector<64x32xf32>
    %106 = tpu.matmul %53, %105, %cst_64 {dimension_numbers = #tpu.dot_dimension_numbers<[1], [0], [0], [1], [0, 0, 1, 1], [], []>} : vector<64x16xbf16>, vector<16x32xbf16>, vector<64x32xf32> -> vector<64x32xf32>
    %107 = arith.addf %103, %106 : vector<64x32xf32>
    %cst_65 = arith.constant 0.000000e+00 : bf16
    %108 = vector.broadcast %cst_65 : bf16 to vector<1x16xbf16>
    %109 = tpu.concatenate %108, %55 in 0 : vector<1x16xbf16>, vector<64x16xbf16> -> vector<65x16xbf16>
    %110 = vector.extract_strided_slice %109 {offsets = [0, 0], sizes = [64, 16], strides = [1, 1]} : vector<65x16xbf16> to vector<64x16xbf16>
    %c1_i32_66 = arith.constant 1 : i32
    %111 = vector.broadcast %c1_i32_66 : i32 to vector<64x1xi32>
    %112 = arith.cmpi sge, %58, %111 : vector<64x1xi32>
    %cst_67 = arith.constant 0.000000e+00 : bf16
    %113 = vector.broadcast %cst_67 : bf16 to vector<64x16xbf16>
    %114 = vector.shape_cast %112 : vector<64x1xi1> to vector<64x1xi1>
    %115 = vector.broadcast %114 : vector<64x1xi1> to vector<64x16xi1>
    %116 = arith.select %115, %110, %113 : vector<64x16xi1>, vector<64x16xbf16>
    %c6 = arith.constant 6 : index
    %c0_68 = arith.constant 0 : index
    %c0_69 = arith.constant 0 : index
    %117 = vector.load %arg2[%c6, %c0_68, %c0_69] : memref<9x16x32xbf16, #tpu.memory_space<vmem>>, vector<1x16x32xbf16>
    %118 = vector.shape_cast %117 : vector<1x16x32xbf16> to vector<16x32xbf16>
    %cst_70 = arith.constant dense<0.000000e+00> : vector<64x32xf32>
    %119 = tpu.matmul %116, %118, %cst_70 {dimension_numbers = #tpu.dot_dimension_numbers<[1], [0], [0], [1], [0, 0, 1, 1], [], []>} : vector<64x16xbf16>, vector<16x32xbf16>, vector<64x32xf32> -> vector<64x32xf32>
    %120 = arith.addf %107, %119 : vector<64x32xf32>
    %c7 = arith.constant 7 : index
    %c0_71 = arith.constant 0 : index
    %c0_72 = arith.constant 0 : index
    %121 = vector.load %arg2[%c7, %c0_71, %c0_72] : memref<9x16x32xbf16, #tpu.memory_space<vmem>>, vector<1x16x32xbf16>
    %122 = vector.shape_cast %121 : vector<1x16x32xbf16> to vector<16x32xbf16>
    %cst_73 = arith.constant dense<0.000000e+00> : vector<64x32xf32>
    %123 = tpu.matmul %54, %122, %cst_73 {dimension_numbers = #tpu.dot_dimension_numbers<[1], [0], [0], [1], [0, 0, 1, 1], [], []>} : vector<64x16xbf16>, vector<16x32xbf16>, vector<64x32xf32> -> vector<64x32xf32>
    %124 = arith.addf %120, %123 : vector<64x32xf32>
    %c8 = arith.constant 8 : index
    %c0_74 = arith.constant 0 : index
    %c0_75 = arith.constant 0 : index
    %125 = vector.load %arg2[%c8, %c0_74, %c0_75] : memref<9x16x32xbf16, #tpu.memory_space<vmem>>, vector<1x16x32xbf16>
    %126 = vector.shape_cast %125 : vector<1x16x32xbf16> to vector<16x32xbf16>
    %cst_76 = arith.constant dense<0.000000e+00> : vector<64x32xf32>
    %127 = tpu.matmul %55, %126, %cst_76 {dimension_numbers = #tpu.dot_dimension_numbers<[1], [0], [0], [1], [0, 0, 1, 1], [], []>} : vector<64x16xbf16>, vector<16x32xbf16>, vector<64x32xf32> -> vector<64x32xf32>
    %128 = arith.addf %124, %127 : vector<64x32xf32>
    %129 = arith.truncf %12 : vector<64x16xf32> to vector<64x16xbf16>
    %c0_77 = arith.constant 0 : index
    %c0_78 = arith.constant 0 : index
    %130 = vector.load %arg8[%c0_77, %c0_78] : memref<16x32xbf16, #tpu.memory_space<vmem>>, vector<16x32xbf16>
    %cst_79 = arith.constant dense<0.000000e+00> : vector<64x32xf32>
    %131 = tpu.matmul %129, %130, %cst_79 {dimension_numbers = #tpu.dot_dimension_numbers<[1], [0], [0], [1], [0, 0, 1, 1], [], []>} : vector<64x16xbf16>, vector<16x32xbf16>, vector<64x32xf32> -> vector<64x32xf32>
    %c0_80 = arith.constant 0 : index
    %c0_81 = arith.constant 0 : index
    %132 = vector.load %arg6[%c0_80, %c0_81] : memref<1x32xf32, #tpu.memory_space<vmem>>, vector<1x32xf32>
    %133 = vector.broadcast %132 : vector<1x32xf32> to vector<64x32xf32>
    %134 = arith.mulf %128, %133 : vector<64x32xf32>
    %c0_82 = arith.constant 0 : index
    %c0_83 = arith.constant 0 : index
    %135 = vector.load %arg7[%c0_82, %c0_83] : memref<1x32xf32, #tpu.memory_space<vmem>>, vector<1x32xf32>
    %136 = vector.broadcast %135 : vector<1x32xf32> to vector<64x32xf32>
    %137 = arith.addf %134, %136 : vector<64x32xf32>
    %cst_84 = arith.constant 0.000000e+00 : f32
    %138 = vector.broadcast %cst_84 : f32 to vector<64x32xf32>
    %139 = arith.cmpf ogt, %137, %138 : vector<64x32xf32>
    %cst_85 = arith.constant 1.000000e-01 : f32
    %140 = vector.broadcast %cst_85 : f32 to vector<64x32xf32>
    %141 = arith.mulf %140, %137 : vector<64x32xf32>
    %142 = arith.select %139, %137, %141 : vector<64x32xi1>, vector<64x32xf32>
    %143 = arith.truncf %142 : vector<64x32xf32> to vector<64x32xbf16>
    %cst_86 = arith.constant 0.000000e+00 : bf16
    %144 = vector.broadcast %cst_86 : bf16 to vector<9x32xbf16>
    %145 = tpu.concatenate %144, %143, %144 in 0 : vector<9x32xbf16>, vector<64x32xbf16>, vector<9x32xbf16> -> vector<82x32xbf16>
    %146 = tpu.iota {dimensions = array<i32: 0>} : vector<64x1xi32>
    %c7_i32_87 = arith.constant 7 : i32
    %147 = vector.broadcast %c7_i32_87 : i32 to vector<64x1xi32>
    %148 = arith.andi %146, %147 : vector<64x1xi32>
    %cst_88 = arith.constant 0.000000e+00 : f32
    %149 = vector.broadcast %cst_88 : f32 to vector<64x32xf32>
    %150 = vector.extract_strided_slice %145 {offsets = [0, 0], sizes = [64, 32], strides = [1, 1]} : vector<82x32xbf16> to vector<64x32xbf16>
    %c1_i32_89 = arith.constant 1 : i32
    %151 = vector.broadcast %c1_i32_89 : i32 to vector<64x1xi32>
    %152 = arith.cmpi sge, %148, %151 : vector<64x1xi32>
    %cst_90 = arith.constant 0.000000e+00 : bf16
    %153 = vector.broadcast %cst_90 : bf16 to vector<64x32xbf16>
    %154 = vector.shape_cast %152 : vector<64x1xi1> to vector<64x1xi1>
    %155 = vector.broadcast %154 : vector<64x1xi1> to vector<64x32xi1>
    %156 = arith.select %155, %150, %153 : vector<64x32xi1>, vector<64x32xbf16>
    %c0_91 = arith.constant 0 : index
    %c0_92 = arith.constant 0 : index
    %c0_93 = arith.constant 0 : index
    %157 = vector.load %arg3[%c0_91, %c0_92, %c0_93] : memref<9x32x32xbf16, #tpu.memory_space<vmem>>, vector<1x32x32xbf16>
    %158 = vector.shape_cast %157 : vector<1x32x32xbf16> to vector<32x32xbf16>
    %cst_94 = arith.constant dense<0.000000e+00> : vector<64x32xf32>
    %159 = tpu.matmul %156, %158, %cst_94 {dimension_numbers = #tpu.dot_dimension_numbers<[1], [0], [0], [1], [0, 0, 1, 1], [], []>} : vector<64x32xbf16>, vector<32x32xbf16>, vector<64x32xf32> -> vector<64x32xf32>
    %160 = arith.addf %149, %159 : vector<64x32xf32>
    %161 = vector.extract_strided_slice %145 {offsets = [1, 0], sizes = [64, 32], strides = [1, 1]} : vector<82x32xbf16> to vector<64x32xbf16>
    %c1_95 = arith.constant 1 : index
    %c0_96 = arith.constant 0 : index
    %c0_97 = arith.constant 0 : index
    %162 = vector.load %arg3[%c1_95, %c0_96, %c0_97] : memref<9x32x32xbf16, #tpu.memory_space<vmem>>, vector<1x32x32xbf16>
    %163 = vector.shape_cast %162 : vector<1x32x32xbf16> to vector<32x32xbf16>
    %cst_98 = arith.constant dense<0.000000e+00> : vector<64x32xf32>
    %164 = tpu.matmul %161, %163, %cst_98 {dimension_numbers = #tpu.dot_dimension_numbers<[1], [0], [0], [1], [0, 0, 1, 1], [], []>} : vector<64x32xbf16>, vector<32x32xbf16>, vector<64x32xf32> -> vector<64x32xf32>
    %165 = arith.addf %160, %164 : vector<64x32xf32>
    %166 = vector.extract_strided_slice %145 {offsets = [2, 0], sizes = [64, 32], strides = [1, 1]} : vector<82x32xbf16> to vector<64x32xbf16>
    %c6_i32 = arith.constant 6 : i32
    %167 = vector.broadcast %c6_i32 : i32 to vector<64x1xi32>
    %168 = arith.cmpi sle, %148, %167 : vector<64x1xi32>
    %cst_99 = arith.constant 0.000000e+00 : bf16
    %169 = vector.broadcast %cst_99 : bf16 to vector<64x32xbf16>
    %170 = vector.shape_cast %168 : vector<64x1xi1> to vector<64x1xi1>
    %171 = vector.broadcast %170 : vector<64x1xi1> to vector<64x32xi1>
    %172 = arith.select %171, %166, %169 : vector<64x32xi1>, vector<64x32xbf16>
    %c2_100 = arith.constant 2 : index
    %c0_101 = arith.constant 0 : index
    %c0_102 = arith.constant 0 : index
    %173 = vector.load %arg3[%c2_100, %c0_101, %c0_102] : memref<9x32x32xbf16, #tpu.memory_space<vmem>>, vector<1x32x32xbf16>
    %174 = vector.shape_cast %173 : vector<1x32x32xbf16> to vector<32x32xbf16>
    %cst_103 = arith.constant dense<0.000000e+00> : vector<64x32xf32>
    %175 = tpu.matmul %172, %174, %cst_103 {dimension_numbers = #tpu.dot_dimension_numbers<[1], [0], [0], [1], [0, 0, 1, 1], [], []>} : vector<64x32xbf16>, vector<32x32xbf16>, vector<64x32xf32> -> vector<64x32xf32>
    %176 = arith.addf %165, %175 : vector<64x32xf32>
    %177 = vector.extract_strided_slice %145 {offsets = [8, 0], sizes = [64, 32], strides = [1, 1]} : vector<82x32xbf16> to vector<64x32xbf16>
    %c1_i32_104 = arith.constant 1 : i32
    %178 = vector.broadcast %c1_i32_104 : i32 to vector<64x1xi32>
    %179 = arith.cmpi sge, %148, %178 : vector<64x1xi32>
    %cst_105 = arith.constant 0.000000e+00 : bf16
    %180 = vector.broadcast %cst_105 : bf16 to vector<64x32xbf16>
    %181 = vector.shape_cast %179 : vector<64x1xi1> to vector<64x1xi1>
    %182 = vector.broadcast %181 : vector<64x1xi1> to vector<64x32xi1>
    %183 = arith.select %182, %177, %180 : vector<64x32xi1>, vector<64x32xbf16>
    %c3_106 = arith.constant 3 : index
    %c0_107 = arith.constant 0 : index
    %c0_108 = arith.constant 0 : index
    %184 = vector.load %arg3[%c3_106, %c0_107, %c0_108] : memref<9x32x32xbf16, #tpu.memory_space<vmem>>, vector<1x32x32xbf16>
    %185 = vector.shape_cast %184 : vector<1x32x32xbf16> to vector<32x32xbf16>
    %cst_109 = arith.constant dense<0.000000e+00> : vector<64x32xf32>
    %186 = tpu.matmul %183, %185, %cst_109 {dimension_numbers = #tpu.dot_dimension_numbers<[1], [0], [0], [1], [0, 0, 1, 1], [], []>} : vector<64x32xbf16>, vector<32x32xbf16>, vector<64x32xf32> -> vector<64x32xf32>
    %187 = arith.addf %176, %186 : vector<64x32xf32>
    %188 = vector.extract_strided_slice %145 {offsets = [9, 0], sizes = [64, 32], strides = [1, 1]} : vector<82x32xbf16> to vector<64x32xbf16>
    %c4_110 = arith.constant 4 : index
    %c0_111 = arith.constant 0 : index
    %c0_112 = arith.constant 0 : index
    %189 = vector.load %arg3[%c4_110, %c0_111, %c0_112] : memref<9x32x32xbf16, #tpu.memory_space<vmem>>, vector<1x32x32xbf16>
    %190 = vector.shape_cast %189 : vector<1x32x32xbf16> to vector<32x32xbf16>
    %cst_113 = arith.constant dense<0.000000e+00> : vector<64x32xf32>
    %191 = tpu.matmul %188, %190, %cst_113 {dimension_numbers = #tpu.dot_dimension_numbers<[1], [0], [0], [1], [0, 0, 1, 1], [], []>} : vector<64x32xbf16>, vector<32x32xbf16>, vector<64x32xf32> -> vector<64x32xf32>
    %192 = arith.addf %187, %191 : vector<64x32xf32>
    %193 = vector.extract_strided_slice %145 {offsets = [10, 0], sizes = [64, 32], strides = [1, 1]} : vector<82x32xbf16> to vector<64x32xbf16>
    %c6_i32_114 = arith.constant 6 : i32
    %194 = vector.broadcast %c6_i32_114 : i32 to vector<64x1xi32>
    %195 = arith.cmpi sle, %148, %194 : vector<64x1xi32>
    %cst_115 = arith.constant 0.000000e+00 : bf16
    %196 = vector.broadcast %cst_115 : bf16 to vector<64x32xbf16>
    %197 = vector.shape_cast %195 : vector<64x1xi1> to vector<64x1xi1>
    %198 = vector.broadcast %197 : vector<64x1xi1> to vector<64x32xi1>
    %199 = arith.select %198, %193, %196 : vector<64x32xi1>, vector<64x32xbf16>
    %c5_116 = arith.constant 5 : index
    %c0_117 = arith.constant 0 : index
    %c0_118 = arith.constant 0 : index
    %200 = vector.load %arg3[%c5_116, %c0_117, %c0_118] : memref<9x32x32xbf16, #tpu.memory_space<vmem>>, vector<1x32x32xbf16>
    %201 = vector.shape_cast %200 : vector<1x32x32xbf16> to vector<32x32xbf16>
    %cst_119 = arith.constant dense<0.000000e+00> : vector<64x32xf32>
    %202 = tpu.matmul %199, %201, %cst_119 {dimension_numbers = #tpu.dot_dimension_numbers<[1], [0], [0], [1], [0, 0, 1, 1], [], []>} : vector<64x32xbf16>, vector<32x32xbf16>, vector<64x32xf32> -> vector<64x32xf32>
    %203 = arith.addf %192, %202 : vector<64x32xf32>
    %204 = vector.extract_strided_slice %145 {offsets = [16, 0], sizes = [64, 32], strides = [1, 1]} : vector<82x32xbf16> to vector<64x32xbf16>
    %c1_i32_120 = arith.constant 1 : i32
    %205 = vector.broadcast %c1_i32_120 : i32 to vector<64x1xi32>
    %206 = arith.cmpi sge, %148, %205 : vector<64x1xi32>
    %cst_121 = arith.constant 0.000000e+00 : bf16
    %207 = vector.broadcast %cst_121 : bf16 to vector<64x32xbf16>
    %208 = vector.shape_cast %206 : vector<64x1xi1> to vector<64x1xi1>
    %209 = vector.broadcast %208 : vector<64x1xi1> to vector<64x32xi1>
    %210 = arith.select %209, %204, %207 : vector<64x32xi1>, vector<64x32xbf16>
    %c6_122 = arith.constant 6 : index
    %c0_123 = arith.constant 0 : index
    %c0_124 = arith.constant 0 : index
    %211 = vector.load %arg3[%c6_122, %c0_123, %c0_124] : memref<9x32x32xbf16, #tpu.memory_space<vmem>>, vector<1x32x32xbf16>
    %212 = vector.shape_cast %211 : vector<1x32x32xbf16> to vector<32x32xbf16>
    %cst_125 = arith.constant dense<0.000000e+00> : vector<64x32xf32>
    %213 = tpu.matmul %210, %212, %cst_125 {dimension_numbers = #tpu.dot_dimension_numbers<[1], [0], [0], [1], [0, 0, 1, 1], [], []>} : vector<64x32xbf16>, vector<32x32xbf16>, vector<64x32xf32> -> vector<64x32xf32>
    %214 = arith.addf %203, %213 : vector<64x32xf32>
    %215 = vector.extract_strided_slice %145 {offsets = [17, 0], sizes = [64, 32], strides = [1, 1]} : vector<82x32xbf16> to vector<64x32xbf16>
    %c7_126 = arith.constant 7 : index
    %c0_127 = arith.constant 0 : index
    %c0_128 = arith.constant 0 : index
    %216 = vector.load %arg3[%c7_126, %c0_127, %c0_128] : memref<9x32x32xbf16, #tpu.memory_space<vmem>>, vector<1x32x32xbf16>
    %217 = vector.shape_cast %216 : vector<1x32x32xbf16> to vector<32x32xbf16>
    %cst_129 = arith.constant dense<0.000000e+00> : vector<64x32xf32>
    %218 = tpu.matmul %215, %217, %cst_129 {dimension_numbers = #tpu.dot_dimension_numbers<[1], [0], [0], [1], [0, 0, 1, 1], [], []>} : vector<64x32xbf16>, vector<32x32xbf16>, vector<64x32xf32> -> vector<64x32xf32>
    %219 = arith.addf %214, %218 : vector<64x32xf32>
    %220 = vector.extract_strided_slice %145 {offsets = [18, 0], sizes = [64, 32], strides = [1, 1]} : vector<82x32xbf16> to vector<64x32xbf16>
    %c6_i32_130 = arith.constant 6 : i32
    %221 = vector.broadcast %c6_i32_130 : i32 to vector<64x1xi32>
    %222 = arith.cmpi sle, %148, %221 : vector<64x1xi32>
    %cst_131 = arith.constant 0.000000e+00 : bf16
    %223 = vector.broadcast %cst_131 : bf16 to vector<64x32xbf16>
    %224 = vector.shape_cast %222 : vector<64x1xi1> to vector<64x1xi1>
    %225 = vector.broadcast %224 : vector<64x1xi1> to vector<64x32xi1>
    %226 = arith.select %225, %220, %223 : vector<64x32xi1>, vector<64x32xbf16>
    %c8_132 = arith.constant 8 : index
    %c0_133 = arith.constant 0 : index
    %c0_134 = arith.constant 0 : index
    %227 = vector.load %arg3[%c8_132, %c0_133, %c0_134] : memref<9x32x32xbf16, #tpu.memory_space<vmem>>, vector<1x32x32xbf16>
    %228 = vector.shape_cast %227 : vector<1x32x32xbf16> to vector<32x32xbf16>
    %cst_135 = arith.constant dense<0.000000e+00> : vector<64x32xf32>
    %229 = tpu.matmul %226, %228, %cst_135 {dimension_numbers = #tpu.dot_dimension_numbers<[1], [0], [0], [1], [0, 0, 1, 1], [], []>} : vector<64x32xbf16>, vector<32x32xbf16>, vector<64x32xf32> -> vector<64x32xf32>
    %230 = arith.addf %219, %229 : vector<64x32xf32>
    %231 = arith.addf %131, %230 : vector<64x32xf32>
    %c0_136 = arith.constant 0 : index
    %c0_137 = arith.constant 0 : index
    %232 = vector.load %arg11[%c0_136, %c0_137] : memref<1x32xf32, #tpu.memory_space<vmem>>, vector<1x32xf32>
    %233 = vector.broadcast %232 : vector<1x32xf32> to vector<64x32xf32>
    %234 = arith.mulf %231, %233 : vector<64x32xf32>
    %c0_138 = arith.constant 0 : index
    %c0_139 = arith.constant 0 : index
    %235 = vector.load %arg12[%c0_138, %c0_139] : memref<1x32xf32, #tpu.memory_space<vmem>>, vector<1x32xf32>
    %236 = vector.broadcast %235 : vector<1x32xf32> to vector<64x32xf32>
    %237 = arith.addf %234, %236 : vector<64x32xf32>
    %cst_140 = arith.constant 0.000000e+00 : f32
    %238 = vector.broadcast %cst_140 : f32 to vector<64x32xf32>
    %239 = arith.cmpf ogt, %237, %238 : vector<64x32xf32>
    %cst_141 = arith.constant 1.000000e-01 : f32
    %240 = vector.broadcast %cst_141 : f32 to vector<64x32xf32>
    %241 = arith.mulf %240, %237 : vector<64x32xf32>
    %242 = arith.select %239, %237, %241 : vector<64x32xi1>, vector<64x32xf32>
    %243 = arith.truncf %242 : vector<64x32xf32> to vector<64x32xbf16>
    %cst_142 = arith.constant 0.000000e+00 : bf16
    %244 = vector.broadcast %cst_142 : bf16 to vector<9x32xbf16>
    %245 = tpu.concatenate %244, %243, %244 in 0 : vector<9x32xbf16>, vector<64x32xbf16>, vector<9x32xbf16> -> vector<82x32xbf16>
    %246 = tpu.iota {dimensions = array<i32: 0>} : vector<64x1xi32>
    %c7_i32_143 = arith.constant 7 : i32
    %247 = vector.broadcast %c7_i32_143 : i32 to vector<64x1xi32>
    %248 = arith.andi %246, %247 : vector<64x1xi32>
    %cst_144 = arith.constant 0.000000e+00 : f32
    %249 = vector.broadcast %cst_144 : f32 to vector<64x32xf32>
    %250 = vector.extract_strided_slice %245 {offsets = [0, 0], sizes = [64, 32], strides = [1, 1]} : vector<82x32xbf16> to vector<64x32xbf16>
    %c1_i32_145 = arith.constant 1 : i32
    %251 = vector.broadcast %c1_i32_145 : i32 to vector<64x1xi32>
    %252 = arith.cmpi sge, %248, %251 : vector<64x1xi32>
    %cst_146 = arith.constant 0.000000e+00 : bf16
    %253 = vector.broadcast %cst_146 : bf16 to vector<64x32xbf16>
    %254 = vector.shape_cast %252 : vector<64x1xi1> to vector<64x1xi1>
    %255 = vector.broadcast %254 : vector<64x1xi1> to vector<64x32xi1>
    %256 = arith.select %255, %250, %253 : vector<64x32xi1>, vector<64x32xbf16>
    %c0_147 = arith.constant 0 : index
    %c0_148 = arith.constant 0 : index
    %c0_149 = arith.constant 0 : index
    %257 = vector.load %arg9[%c0_147, %c0_148, %c0_149] : memref<9x32x32xbf16, #tpu.memory_space<vmem>>, vector<1x32x32xbf16>
    %258 = vector.shape_cast %257 : vector<1x32x32xbf16> to vector<32x32xbf16>
    %cst_150 = arith.constant dense<0.000000e+00> : vector<64x32xf32>
    %259 = tpu.matmul %256, %258, %cst_150 {dimension_numbers = #tpu.dot_dimension_numbers<[1], [0], [0], [1], [0, 0, 1, 1], [], []>} : vector<64x32xbf16>, vector<32x32xbf16>, vector<64x32xf32> -> vector<64x32xf32>
    %260 = arith.addf %249, %259 : vector<64x32xf32>
    %261 = vector.extract_strided_slice %245 {offsets = [1, 0], sizes = [64, 32], strides = [1, 1]} : vector<82x32xbf16> to vector<64x32xbf16>
    %c1_151 = arith.constant 1 : index
    %c0_152 = arith.constant 0 : index
    %c0_153 = arith.constant 0 : index
    %262 = vector.load %arg9[%c1_151, %c0_152, %c0_153] : memref<9x32x32xbf16, #tpu.memory_space<vmem>>, vector<1x32x32xbf16>
    %263 = vector.shape_cast %262 : vector<1x32x32xbf16> to vector<32x32xbf16>
    %cst_154 = arith.constant dense<0.000000e+00> : vector<64x32xf32>
    %264 = tpu.matmul %261, %263, %cst_154 {dimension_numbers = #tpu.dot_dimension_numbers<[1], [0], [0], [1], [0, 0, 1, 1], [], []>} : vector<64x32xbf16>, vector<32x32xbf16>, vector<64x32xf32> -> vector<64x32xf32>
    %265 = arith.addf %260, %264 : vector<64x32xf32>
    %266 = vector.extract_strided_slice %245 {offsets = [2, 0], sizes = [64, 32], strides = [1, 1]} : vector<82x32xbf16> to vector<64x32xbf16>
    %c6_i32_155 = arith.constant 6 : i32
    %267 = vector.broadcast %c6_i32_155 : i32 to vector<64x1xi32>
    %268 = arith.cmpi sle, %248, %267 : vector<64x1xi32>
    %cst_156 = arith.constant 0.000000e+00 : bf16
    %269 = vector.broadcast %cst_156 : bf16 to vector<64x32xbf16>
    %270 = vector.shape_cast %268 : vector<64x1xi1> to vector<64x1xi1>
    %271 = vector.broadcast %270 : vector<64x1xi1> to vector<64x32xi1>
    %272 = arith.select %271, %266, %269 : vector<64x32xi1>, vector<64x32xbf16>
    %c2_157 = arith.constant 2 : index
    %c0_158 = arith.constant 0 : index
    %c0_159 = arith.constant 0 : index
    %273 = vector.load %arg9[%c2_157, %c0_158, %c0_159] : memref<9x32x32xbf16, #tpu.memory_space<vmem>>, vector<1x32x32xbf16>
    %274 = vector.shape_cast %273 : vector<1x32x32xbf16> to vector<32x32xbf16>
    %cst_160 = arith.constant dense<0.000000e+00> : vector<64x32xf32>
    %275 = tpu.matmul %272, %274, %cst_160 {dimension_numbers = #tpu.dot_dimension_numbers<[1], [0], [0], [1], [0, 0, 1, 1], [], []>} : vector<64x32xbf16>, vector<32x32xbf16>, vector<64x32xf32> -> vector<64x32xf32>
    %276 = arith.addf %265, %275 : vector<64x32xf32>
    %277 = vector.extract_strided_slice %245 {offsets = [8, 0], sizes = [64, 32], strides = [1, 1]} : vector<82x32xbf16> to vector<64x32xbf16>
    %c1_i32_161 = arith.constant 1 : i32
    %278 = vector.broadcast %c1_i32_161 : i32 to vector<64x1xi32>
    %279 = arith.cmpi sge, %248, %278 : vector<64x1xi32>
    %cst_162 = arith.constant 0.000000e+00 : bf16
    %280 = vector.broadcast %cst_162 : bf16 to vector<64x32xbf16>
    %281 = vector.shape_cast %279 : vector<64x1xi1> to vector<64x1xi1>
    %282 = vector.broadcast %281 : vector<64x1xi1> to vector<64x32xi1>
    %283 = arith.select %282, %277, %280 : vector<64x32xi1>, vector<64x32xbf16>
    %c3_163 = arith.constant 3 : index
    %c0_164 = arith.constant 0 : index
    %c0_165 = arith.constant 0 : index
    %284 = vector.load %arg9[%c3_163, %c0_164, %c0_165] : memref<9x32x32xbf16, #tpu.memory_space<vmem>>, vector<1x32x32xbf16>
    %285 = vector.shape_cast %284 : vector<1x32x32xbf16> to vector<32x32xbf16>
    %cst_166 = arith.constant dense<0.000000e+00> : vector<64x32xf32>
    %286 = tpu.matmul %283, %285, %cst_166 {dimension_numbers = #tpu.dot_dimension_numbers<[1], [0], [0], [1], [0, 0, 1, 1], [], []>} : vector<64x32xbf16>, vector<32x32xbf16>, vector<64x32xf32> -> vector<64x32xf32>
    %287 = arith.addf %276, %286 : vector<64x32xf32>
    %288 = vector.extract_strided_slice %245 {offsets = [9, 0], sizes = [64, 32], strides = [1, 1]} : vector<82x32xbf16> to vector<64x32xbf16>
    %c4_167 = arith.constant 4 : index
    %c0_168 = arith.constant 0 : index
    %c0_169 = arith.constant 0 : index
    %289 = vector.load %arg9[%c4_167, %c0_168, %c0_169] : memref<9x32x32xbf16, #tpu.memory_space<vmem>>, vector<1x32x32xbf16>
    %290 = vector.shape_cast %289 : vector<1x32x32xbf16> to vector<32x32xbf16>
    %cst_170 = arith.constant dense<0.000000e+00> : vector<64x32xf32>
    %291 = tpu.matmul %288, %290, %cst_170 {dimension_numbers = #tpu.dot_dimension_numbers<[1], [0], [0], [1], [0, 0, 1, 1], [], []>} : vector<64x32xbf16>, vector<32x32xbf16>, vector<64x32xf32> -> vector<64x32xf32>
    %292 = arith.addf %287, %291 : vector<64x32xf32>
    %293 = vector.extract_strided_slice %245 {offsets = [10, 0], sizes = [64, 32], strides = [1, 1]} : vector<82x32xbf16> to vector<64x32xbf16>
    %c6_i32_171 = arith.constant 6 : i32
    %294 = vector.broadcast %c6_i32_171 : i32 to vector<64x1xi32>
    %295 = arith.cmpi sle, %248, %294 : vector<64x1xi32>
    %cst_172 = arith.constant 0.000000e+00 : bf16
    %296 = vector.broadcast %cst_172 : bf16 to vector<64x32xbf16>
    %297 = vector.shape_cast %295 : vector<64x1xi1> to vector<64x1xi1>
    %298 = vector.broadcast %297 : vector<64x1xi1> to vector<64x32xi1>
    %299 = arith.select %298, %293, %296 : vector<64x32xi1>, vector<64x32xbf16>
    %c5_173 = arith.constant 5 : index
    %c0_174 = arith.constant 0 : index
    %c0_175 = arith.constant 0 : index
    %300 = vector.load %arg9[%c5_173, %c0_174, %c0_175] : memref<9x32x32xbf16, #tpu.memory_space<vmem>>, vector<1x32x32xbf16>
    %301 = vector.shape_cast %300 : vector<1x32x32xbf16> to vector<32x32xbf16>
    %cst_176 = arith.constant dense<0.000000e+00> : vector<64x32xf32>
    %302 = tpu.matmul %299, %301, %cst_176 {dimension_numbers = #tpu.dot_dimension_numbers<[1], [0], [0], [1], [0, 0, 1, 1], [], []>} : vector<64x32xbf16>, vector<32x32xbf16>, vector<64x32xf32> -> vector<64x32xf32>
    %303 = arith.addf %292, %302 : vector<64x32xf32>
    %304 = vector.extract_strided_slice %245 {offsets = [16, 0], sizes = [64, 32], strides = [1, 1]} : vector<82x32xbf16> to vector<64x32xbf16>
    %c1_i32_177 = arith.constant 1 : i32
    %305 = vector.broadcast %c1_i32_177 : i32 to vector<64x1xi32>
    %306 = arith.cmpi sge, %248, %305 : vector<64x1xi32>
    %cst_178 = arith.constant 0.000000e+00 : bf16
    %307 = vector.broadcast %cst_178 : bf16 to vector<64x32xbf16>
    %308 = vector.shape_cast %306 : vector<64x1xi1> to vector<64x1xi1>
    %309 = vector.broadcast %308 : vector<64x1xi1> to vector<64x32xi1>
    %310 = arith.select %309, %304, %307 : vector<64x32xi1>, vector<64x32xbf16>
    %c6_179 = arith.constant 6 : index
    %c0_180 = arith.constant 0 : index
    %c0_181 = arith.constant 0 : index
    %311 = vector.load %arg9[%c6_179, %c0_180, %c0_181] : memref<9x32x32xbf16, #tpu.memory_space<vmem>>, vector<1x32x32xbf16>
    %312 = vector.shape_cast %311 : vector<1x32x32xbf16> to vector<32x32xbf16>
    %cst_182 = arith.constant dense<0.000000e+00> : vector<64x32xf32>
    %313 = tpu.matmul %310, %312, %cst_182 {dimension_numbers = #tpu.dot_dimension_numbers<[1], [0], [0], [1], [0, 0, 1, 1], [], []>} : vector<64x32xbf16>, vector<32x32xbf16>, vector<64x32xf32> -> vector<64x32xf32>
    %314 = arith.addf %303, %313 : vector<64x32xf32>
    %315 = vector.extract_strided_slice %245 {offsets = [17, 0], sizes = [64, 32], strides = [1, 1]} : vector<82x32xbf16> to vector<64x32xbf16>
    %c7_183 = arith.constant 7 : index
    %c0_184 = arith.constant 0 : index
    %c0_185 = arith.constant 0 : index
    %316 = vector.load %arg9[%c7_183, %c0_184, %c0_185] : memref<9x32x32xbf16, #tpu.memory_space<vmem>>, vector<1x32x32xbf16>
    %317 = vector.shape_cast %316 : vector<1x32x32xbf16> to vector<32x32xbf16>
    %cst_186 = arith.constant dense<0.000000e+00> : vector<64x32xf32>
    %318 = tpu.matmul %315, %317, %cst_186 {dimension_numbers = #tpu.dot_dimension_numbers<[1], [0], [0], [1], [0, 0, 1, 1], [], []>} : vector<64x32xbf16>, vector<32x32xbf16>, vector<64x32xf32> -> vector<64x32xf32>
    %319 = arith.addf %314, %318 : vector<64x32xf32>
    %320 = vector.extract_strided_slice %245 {offsets = [18, 0], sizes = [64, 32], strides = [1, 1]} : vector<82x32xbf16> to vector<64x32xbf16>
    %c6_i32_187 = arith.constant 6 : i32
    %321 = vector.broadcast %c6_i32_187 : i32 to vector<64x1xi32>
    %322 = arith.cmpi sle, %248, %321 : vector<64x1xi32>
    %cst_188 = arith.constant 0.000000e+00 : bf16
    %323 = vector.broadcast %cst_188 : bf16 to vector<64x32xbf16>
    %324 = vector.shape_cast %322 : vector<64x1xi1> to vector<64x1xi1>
    %325 = vector.broadcast %324 : vector<64x1xi1> to vector<64x32xi1>
    %326 = arith.select %325, %320, %323 : vector<64x32xi1>, vector<64x32xbf16>
    %c8_189 = arith.constant 8 : index
    %c0_190 = arith.constant 0 : index
    %c0_191 = arith.constant 0 : index
    %327 = vector.load %arg9[%c8_189, %c0_190, %c0_191] : memref<9x32x32xbf16, #tpu.memory_space<vmem>>, vector<1x32x32xbf16>
    %328 = vector.shape_cast %327 : vector<1x32x32xbf16> to vector<32x32xbf16>
    %cst_192 = arith.constant dense<0.000000e+00> : vector<64x32xf32>
    %329 = tpu.matmul %326, %328, %cst_192 {dimension_numbers = #tpu.dot_dimension_numbers<[1], [0], [0], [1], [0, 0, 1, 1], [], []>} : vector<64x32xbf16>, vector<32x32xbf16>, vector<64x32xf32> -> vector<64x32xf32>
    %330 = arith.addf %319, %329 : vector<64x32xf32>
    %c0_193 = arith.constant 0 : index
    %c0_194 = arith.constant 0 : index
    %331 = vector.load %arg13[%c0_193, %c0_194] : memref<1x32xf32, #tpu.memory_space<vmem>>, vector<1x32xf32>
    %332 = vector.broadcast %331 : vector<1x32xf32> to vector<64x32xf32>
    %333 = arith.mulf %330, %332 : vector<64x32xf32>
    %c0_195 = arith.constant 0 : index
    %c0_196 = arith.constant 0 : index
    %334 = vector.load %arg14[%c0_195, %c0_196] : memref<1x32xf32, #tpu.memory_space<vmem>>, vector<1x32xf32>
    %335 = vector.broadcast %334 : vector<1x32xf32> to vector<64x32xf32>
    %336 = arith.addf %333, %335 : vector<64x32xf32>
    %cst_197 = arith.constant 0.000000e+00 : f32
    %337 = vector.broadcast %cst_197 : f32 to vector<64x32xf32>
    %338 = arith.cmpf ogt, %336, %337 : vector<64x32xf32>
    %cst_198 = arith.constant 1.000000e-01 : f32
    %339 = vector.broadcast %cst_198 : f32 to vector<64x32xf32>
    %340 = arith.mulf %339, %336 : vector<64x32xf32>
    %341 = arith.select %338, %336, %340 : vector<64x32xi1>, vector<64x32xf32>
    %342 = arith.truncf %341 : vector<64x32xf32> to vector<64x32xbf16>
    %cst_199 = arith.constant 0.000000e+00 : bf16
    %343 = vector.broadcast %cst_199 : bf16 to vector<9x32xbf16>
    %344 = tpu.concatenate %343, %342, %343 in 0 : vector<9x32xbf16>, vector<64x32xbf16>, vector<9x32xbf16> -> vector<82x32xbf16>
    %345 = tpu.iota {dimensions = array<i32: 0>} : vector<64x1xi32>
    %c7_i32_200 = arith.constant 7 : i32
    %346 = vector.broadcast %c7_i32_200 : i32 to vector<64x1xi32>
    %347 = arith.andi %345, %346 : vector<64x1xi32>
    %cst_201 = arith.constant 0.000000e+00 : f32
    %348 = vector.broadcast %cst_201 : f32 to vector<64x32xf32>
    %349 = vector.extract_strided_slice %344 {offsets = [0, 0], sizes = [64, 32], strides = [1, 1]} : vector<82x32xbf16> to vector<64x32xbf16>
    %c1_i32_202 = arith.constant 1 : i32
    %350 = vector.broadcast %c1_i32_202 : i32 to vector<64x1xi32>
    %351 = arith.cmpi sge, %347, %350 : vector<64x1xi32>
    %cst_203 = arith.constant 0.000000e+00 : bf16
    %352 = vector.broadcast %cst_203 : bf16 to vector<64x32xbf16>
    %353 = vector.shape_cast %351 : vector<64x1xi1> to vector<64x1xi1>
    %354 = vector.broadcast %353 : vector<64x1xi1> to vector<64x32xi1>
    %355 = arith.select %354, %349, %352 : vector<64x32xi1>, vector<64x32xbf16>
    %c0_204 = arith.constant 0 : index
    %c0_205 = arith.constant 0 : index
    %c0_206 = arith.constant 0 : index
    %356 = vector.load %arg10[%c0_204, %c0_205, %c0_206] : memref<9x32x32xbf16, #tpu.memory_space<vmem>>, vector<1x32x32xbf16>
    %357 = vector.shape_cast %356 : vector<1x32x32xbf16> to vector<32x32xbf16>
    %cst_207 = arith.constant dense<0.000000e+00> : vector<64x32xf32>
    %358 = tpu.matmul %355, %357, %cst_207 {dimension_numbers = #tpu.dot_dimension_numbers<[1], [0], [0], [1], [0, 0, 1, 1], [], []>} : vector<64x32xbf16>, vector<32x32xbf16>, vector<64x32xf32> -> vector<64x32xf32>
    %359 = arith.addf %348, %358 : vector<64x32xf32>
    %360 = vector.extract_strided_slice %344 {offsets = [1, 0], sizes = [64, 32], strides = [1, 1]} : vector<82x32xbf16> to vector<64x32xbf16>
    %c1_208 = arith.constant 1 : index
    %c0_209 = arith.constant 0 : index
    %c0_210 = arith.constant 0 : index
    %361 = vector.load %arg10[%c1_208, %c0_209, %c0_210] : memref<9x32x32xbf16, #tpu.memory_space<vmem>>, vector<1x32x32xbf16>
    %362 = vector.shape_cast %361 : vector<1x32x32xbf16> to vector<32x32xbf16>
    %cst_211 = arith.constant dense<0.000000e+00> : vector<64x32xf32>
    %363 = tpu.matmul %360, %362, %cst_211 {dimension_numbers = #tpu.dot_dimension_numbers<[1], [0], [0], [1], [0, 0, 1, 1], [], []>} : vector<64x32xbf16>, vector<32x32xbf16>, vector<64x32xf32> -> vector<64x32xf32>
    %364 = arith.addf %359, %363 : vector<64x32xf32>
    %365 = vector.extract_strided_slice %344 {offsets = [2, 0], sizes = [64, 32], strides = [1, 1]} : vector<82x32xbf16> to vector<64x32xbf16>
    %c6_i32_212 = arith.constant 6 : i32
    %366 = vector.broadcast %c6_i32_212 : i32 to vector<64x1xi32>
    %367 = arith.cmpi sle, %347, %366 : vector<64x1xi32>
    %cst_213 = arith.constant 0.000000e+00 : bf16
    %368 = vector.broadcast %cst_213 : bf16 to vector<64x32xbf16>
    %369 = vector.shape_cast %367 : vector<64x1xi1> to vector<64x1xi1>
    %370 = vector.broadcast %369 : vector<64x1xi1> to vector<64x32xi1>
    %371 = arith.select %370, %365, %368 : vector<64x32xi1>, vector<64x32xbf16>
    %c2_214 = arith.constant 2 : index
    %c0_215 = arith.constant 0 : index
    %c0_216 = arith.constant 0 : index
    %372 = vector.load %arg10[%c2_214, %c0_215, %c0_216] : memref<9x32x32xbf16, #tpu.memory_space<vmem>>, vector<1x32x32xbf16>
    %373 = vector.shape_cast %372 : vector<1x32x32xbf16> to vector<32x32xbf16>
    %cst_217 = arith.constant dense<0.000000e+00> : vector<64x32xf32>
    %374 = tpu.matmul %371, %373, %cst_217 {dimension_numbers = #tpu.dot_dimension_numbers<[1], [0], [0], [1], [0, 0, 1, 1], [], []>} : vector<64x32xbf16>, vector<32x32xbf16>, vector<64x32xf32> -> vector<64x32xf32>
    %375 = arith.addf %364, %374 : vector<64x32xf32>
    %376 = vector.extract_strided_slice %344 {offsets = [8, 0], sizes = [64, 32], strides = [1, 1]} : vector<82x32xbf16> to vector<64x32xbf16>
    %c1_i32_218 = arith.constant 1 : i32
    %377 = vector.broadcast %c1_i32_218 : i32 to vector<64x1xi32>
    %378 = arith.cmpi sge, %347, %377 : vector<64x1xi32>
    %cst_219 = arith.constant 0.000000e+00 : bf16
    %379 = vector.broadcast %cst_219 : bf16 to vector<64x32xbf16>
    %380 = vector.shape_cast %378 : vector<64x1xi1> to vector<64x1xi1>
    %381 = vector.broadcast %380 : vector<64x1xi1> to vector<64x32xi1>
    %382 = arith.select %381, %376, %379 : vector<64x32xi1>, vector<64x32xbf16>
    %c3_220 = arith.constant 3 : index
    %c0_221 = arith.constant 0 : index
    %c0_222 = arith.constant 0 : index
    %383 = vector.load %arg10[%c3_220, %c0_221, %c0_222] : memref<9x32x32xbf16, #tpu.memory_space<vmem>>, vector<1x32x32xbf16>
    %384 = vector.shape_cast %383 : vector<1x32x32xbf16> to vector<32x32xbf16>
    %cst_223 = arith.constant dense<0.000000e+00> : vector<64x32xf32>
    %385 = tpu.matmul %382, %384, %cst_223 {dimension_numbers = #tpu.dot_dimension_numbers<[1], [0], [0], [1], [0, 0, 1, 1], [], []>} : vector<64x32xbf16>, vector<32x32xbf16>, vector<64x32xf32> -> vector<64x32xf32>
    %386 = arith.addf %375, %385 : vector<64x32xf32>
    %387 = vector.extract_strided_slice %344 {offsets = [9, 0], sizes = [64, 32], strides = [1, 1]} : vector<82x32xbf16> to vector<64x32xbf16>
    %c4_224 = arith.constant 4 : index
    %c0_225 = arith.constant 0 : index
    %c0_226 = arith.constant 0 : index
    %388 = vector.load %arg10[%c4_224, %c0_225, %c0_226] : memref<9x32x32xbf16, #tpu.memory_space<vmem>>, vector<1x32x32xbf16>
    %389 = vector.shape_cast %388 : vector<1x32x32xbf16> to vector<32x32xbf16>
    %cst_227 = arith.constant dense<0.000000e+00> : vector<64x32xf32>
    %390 = tpu.matmul %387, %389, %cst_227 {dimension_numbers = #tpu.dot_dimension_numbers<[1], [0], [0], [1], [0, 0, 1, 1], [], []>} : vector<64x32xbf16>, vector<32x32xbf16>, vector<64x32xf32> -> vector<64x32xf32>
    %391 = arith.addf %386, %390 : vector<64x32xf32>
    %392 = vector.extract_strided_slice %344 {offsets = [10, 0], sizes = [64, 32], strides = [1, 1]} : vector<82x32xbf16> to vector<64x32xbf16>
    %c6_i32_228 = arith.constant 6 : i32
    %393 = vector.broadcast %c6_i32_228 : i32 to vector<64x1xi32>
    %394 = arith.cmpi sle, %347, %393 : vector<64x1xi32>
    %cst_229 = arith.constant 0.000000e+00 : bf16
    %395 = vector.broadcast %cst_229 : bf16 to vector<64x32xbf16>
    %396 = vector.shape_cast %394 : vector<64x1xi1> to vector<64x1xi1>
    %397 = vector.broadcast %396 : vector<64x1xi1> to vector<64x32xi1>
    %398 = arith.select %397, %392, %395 : vector<64x32xi1>, vector<64x32xbf16>
    %c5_230 = arith.constant 5 : index
    %c0_231 = arith.constant 0 : index
    %c0_232 = arith.constant 0 : index
    %399 = vector.load %arg10[%c5_230, %c0_231, %c0_232] : memref<9x32x32xbf16, #tpu.memory_space<vmem>>, vector<1x32x32xbf16>
    %400 = vector.shape_cast %399 : vector<1x32x32xbf16> to vector<32x32xbf16>
    %cst_233 = arith.constant dense<0.000000e+00> : vector<64x32xf32>
    %401 = tpu.matmul %398, %400, %cst_233 {dimension_numbers = #tpu.dot_dimension_numbers<[1], [0], [0], [1], [0, 0, 1, 1], [], []>} : vector<64x32xbf16>, vector<32x32xbf16>, vector<64x32xf32> -> vector<64x32xf32>
    %402 = arith.addf %391, %401 : vector<64x32xf32>
    %403 = vector.extract_strided_slice %344 {offsets = [16, 0], sizes = [64, 32], strides = [1, 1]} : vector<82x32xbf16> to vector<64x32xbf16>
    %c1_i32_234 = arith.constant 1 : i32
    %404 = vector.broadcast %c1_i32_234 : i32 to vector<64x1xi32>
    %405 = arith.cmpi sge, %347, %404 : vector<64x1xi32>
    %cst_235 = arith.constant 0.000000e+00 : bf16
    %406 = vector.broadcast %cst_235 : bf16 to vector<64x32xbf16>
    %407 = vector.shape_cast %405 : vector<64x1xi1> to vector<64x1xi1>
    %408 = vector.broadcast %407 : vector<64x1xi1> to vector<64x32xi1>
    %409 = arith.select %408, %403, %406 : vector<64x32xi1>, vector<64x32xbf16>
    %c6_236 = arith.constant 6 : index
    %c0_237 = arith.constant 0 : index
    %c0_238 = arith.constant 0 : index
    %410 = vector.load %arg10[%c6_236, %c0_237, %c0_238] : memref<9x32x32xbf16, #tpu.memory_space<vmem>>, vector<1x32x32xbf16>
    %411 = vector.shape_cast %410 : vector<1x32x32xbf16> to vector<32x32xbf16>
    %cst_239 = arith.constant dense<0.000000e+00> : vector<64x32xf32>
    %412 = tpu.matmul %409, %411, %cst_239 {dimension_numbers = #tpu.dot_dimension_numbers<[1], [0], [0], [1], [0, 0, 1, 1], [], []>} : vector<64x32xbf16>, vector<32x32xbf16>, vector<64x32xf32> -> vector<64x32xf32>
    %413 = arith.addf %402, %412 : vector<64x32xf32>
    %414 = vector.extract_strided_slice %344 {offsets = [17, 0], sizes = [64, 32], strides = [1, 1]} : vector<82x32xbf16> to vector<64x32xbf16>
    %c7_240 = arith.constant 7 : index
    %c0_241 = arith.constant 0 : index
    %c0_242 = arith.constant 0 : index
    %415 = vector.load %arg10[%c7_240, %c0_241, %c0_242] : memref<9x32x32xbf16, #tpu.memory_space<vmem>>, vector<1x32x32xbf16>
    %416 = vector.shape_cast %415 : vector<1x32x32xbf16> to vector<32x32xbf16>
    %cst_243 = arith.constant dense<0.000000e+00> : vector<64x32xf32>
    %417 = tpu.matmul %414, %416, %cst_243 {dimension_numbers = #tpu.dot_dimension_numbers<[1], [0], [0], [1], [0, 0, 1, 1], [], []>} : vector<64x32xbf16>, vector<32x32xbf16>, vector<64x32xf32> -> vector<64x32xf32>
    %418 = arith.addf %413, %417 : vector<64x32xf32>
    %419 = vector.extract_strided_slice %344 {offsets = [18, 0], sizes = [64, 32], strides = [1, 1]} : vector<82x32xbf16> to vector<64x32xbf16>
    %c6_i32_244 = arith.constant 6 : i32
    %420 = vector.broadcast %c6_i32_244 : i32 to vector<64x1xi32>
    %421 = arith.cmpi sle, %347, %420 : vector<64x1xi32>
    %cst_245 = arith.constant 0.000000e+00 : bf16
    %422 = vector.broadcast %cst_245 : bf16 to vector<64x32xbf16>
    %423 = vector.shape_cast %421 : vector<64x1xi1> to vector<64x1xi1>
    %424 = vector.broadcast %423 : vector<64x1xi1> to vector<64x32xi1>
    %425 = arith.select %424, %419, %422 : vector<64x32xi1>, vector<64x32xbf16>
    %c8_246 = arith.constant 8 : index
    %c0_247 = arith.constant 0 : index
    %c0_248 = arith.constant 0 : index
    %426 = vector.load %arg10[%c8_246, %c0_247, %c0_248] : memref<9x32x32xbf16, #tpu.memory_space<vmem>>, vector<1x32x32xbf16>
    %427 = vector.shape_cast %426 : vector<1x32x32xbf16> to vector<32x32xbf16>
    %cst_249 = arith.constant dense<0.000000e+00> : vector<64x32xf32>
    %428 = tpu.matmul %425, %427, %cst_249 {dimension_numbers = #tpu.dot_dimension_numbers<[1], [0], [0], [1], [0, 0, 1, 1], [], []>} : vector<64x32xbf16>, vector<32x32xbf16>, vector<64x32xf32> -> vector<64x32xf32>
    %429 = arith.addf %418, %428 : vector<64x32xf32>
    %430 = arith.addf %231, %429 : vector<64x32xf32>
    %c0_250 = arith.constant 0 : index
    %c0_251 = arith.constant 0 : index
    %c0_252 = arith.constant 0 : index
    %431 = vector.load %arg15[%c0_250, %c0_251, %c0_252] : memref<1x64x32xf32, #tpu.memory_space<vmem>>, vector<1x64x32xf32>
    %432 = vector.shape_cast %431 : vector<1x64x32xf32> to vector<64x32xf32>
    %433 = vector.shape_cast %430 : vector<64x32xf32> to vector<1x64x32xf32>
    tpu.vector_store %arg15[%c0_250, %c0_251, %c0_252], %433 {strides = array<i32>} : memref<1x64x32xf32, #tpu.memory_space<vmem>>, vector<1x64x32xf32>,
    return
  }
  func.func @transform_0(%arg0: i32) -> (i32, i32, i32, i32) {
    %c0_i32 = arith.constant 0 : i32
    %c0_i32_0 = arith.constant 0 : i32
    %c0_i32_1 = arith.constant 0 : i32
    %c0_i32_2 = arith.constant 0 : i32
    return %arg0, %c0_i32, %c0_i32_0, %c0_i32_1 : i32, i32, i32, i32
  }
  func.func @transform_1(%arg0: i32) -> (i32, i32, i32) {
    %c0_i32 = arith.constant 0 : i32
    %c0_i32_0 = arith.constant 0 : i32
    %c0_i32_1 = arith.constant 0 : i32
    %c0_i32_2 = arith.constant 0 : i32
    return %c0_i32, %c0_i32_0, %c0_i32_1 : i32, i32, i32
  }
  func.func @transform_2(%arg0: i32) -> (i32, i32, i32) {
    %c0_i32 = arith.constant 0 : i32
    %c0_i32_0 = arith.constant 0 : i32
    %c0_i32_1 = arith.constant 0 : i32
    %c0_i32_2 = arith.constant 0 : i32
    return %c0_i32, %c0_i32_0, %c0_i32_1 : i32, i32, i32
  }
  func.func @transform_3(%arg0: i32) -> (i32, i32) {
    %c0_i32 = arith.constant 0 : i32
    %c0_i32_0 = arith.constant 0 : i32
    %c0_i32_1 = arith.constant 0 : i32
    return %c0_i32, %c0_i32_0 : i32, i32
  }
  func.func @transform_4(%arg0: i32) -> (i32, i32) {
    %c0_i32 = arith.constant 0 : i32
    %c0_i32_0 = arith.constant 0 : i32
    %c0_i32_1 = arith.constant 0 : i32
    return %c0_i32, %c0_i32_0 : i32, i32
  }
  func.func @transform_5(%arg0: i32) -> (i32, i32) {
    %c0_i32 = arith.constant 0 : i32
    %c0_i32_0 = arith.constant 0 : i32
    %c0_i32_1 = arith.constant 0 : i32
    return %c0_i32, %c0_i32_0 : i32, i32
  }
  func.func @transform_6(%arg0: i32) -> (i32, i32) {
    %c0_i32 = arith.constant 0 : i32
    %c0_i32_0 = arith.constant 0 : i32
    %c0_i32_1 = arith.constant 0 : i32
    return %c0_i32, %c0_i32_0 : i32, i32
  }
  func.func @transform_7(%arg0: i32) -> (i32, i32) {
    %c0_i32 = arith.constant 0 : i32
    %c0_i32_0 = arith.constant 0 : i32
    %c0_i32_1 = arith.constant 0 : i32
    return %c0_i32, %c0_i32_0 : i32, i32
  }
  func.func @transform_8(%arg0: i32) -> (i32, i32, i32) {
    %c0_i32 = arith.constant 0 : i32
    %c0_i32_0 = arith.constant 0 : i32
    %c0_i32_1 = arith.constant 0 : i32
    %c0_i32_2 = arith.constant 0 : i32
    return %c0_i32, %c0_i32_0, %c0_i32_1 : i32, i32, i32
  }
  func.func @transform_9(%arg0: i32) -> (i32, i32, i32) {
    %c0_i32 = arith.constant 0 : i32
    %c0_i32_0 = arith.constant 0 : i32
    %c0_i32_1 = arith.constant 0 : i32
    %c0_i32_2 = arith.constant 0 : i32
    return %c0_i32, %c0_i32_0, %c0_i32_1 : i32, i32, i32
  }
  func.func @transform_10(%arg0: i32) -> (i32, i32) {
    %c0_i32 = arith.constant 0 : i32
    %c0_i32_0 = arith.constant 0 : i32
    %c0_i32_1 = arith.constant 0 : i32
    return %c0_i32, %c0_i32_0 : i32, i32
  }
  func.func @transform_11(%arg0: i32) -> (i32, i32) {
    %c0_i32 = arith.constant 0 : i32
    %c0_i32_0 = arith.constant 0 : i32
    %c0_i32_1 = arith.constant 0 : i32
    return %c0_i32, %c0_i32_0 : i32, i32
  }
  func.func @transform_12(%arg0: i32) -> (i32, i32) {
    %c0_i32 = arith.constant 0 : i32
    %c0_i32_0 = arith.constant 0 : i32
    %c0_i32_1 = arith.constant 0 : i32
    return %c0_i32, %c0_i32_0 : i32, i32
  }
  func.func @transform_13(%arg0: i32) -> (i32, i32) {
    %c0_i32 = arith.constant 0 : i32
    %c0_i32_0 = arith.constant 0 : i32
    %c0_i32_1 = arith.constant 0 : i32
    return %c0_i32, %c0_i32_0 : i32, i32
  }
  func.func @transform_14(%arg0: i32) -> (i32, i32, i32) {
    %c0_i32 = arith.constant 0 : i32
    %c0_i32_0 = arith.constant 0 : i32
    %c0_i32_1 = arith.constant 0 : i32
    return %arg0, %c0_i32, %c0_i32_0 : i32, i32, i32
  }
}

</mosaic_0001>

<bundles_post_ra>
// kernel: network_block_forward.1
= control target key start
LH: loop header
LB: loop body
LE: loop exit
PB: predicated region body
PF: predicated region fallthrough
CT: control target
= control target key end

     0   :  { %s8580_s0 = inlined_call_operand.vmem [shape: f32[2,4,64,16], index: 0, kind: input, shape index: {}]   ;;  %s8581_s1 = inlined_call_operand.vmem [shape: bf16[9,16,32], index: 1, kind: input, shape index: {}]   ;;  %s8582_s2 = inlined_call_operand.vmem [shape: bf16[9,32,32], index: 2, kind: input, shape index: {}]   ;;  %s8583_s3 = inlined_call_operand.vmem [shape: f32[1,16], index: 3, kind: input, shape index: {}]   ;;  %s8584_s4 = inlined_call_operand.vmem [shape: f32[1,16], index: 4, kind: input, shape index: {}]   ;;  %s8585_s5 = inlined_call_operand.vmem [shape: f32[1,32], index: 5, kind: input, shape index: {}]   ;;  %s8586_s6 = inlined_call_operand.vmem [shape: f32[1,32], index: 6, kind: input, shape index: {}]   ;;  %s8587_s7 = inlined_call_operand.vmem [shape: bf16[16,32], index: 7, kind: input, shape index: {}]   ;;  %s8588_s8 = inlined_call_operand.vmem [shape: bf16[9,32,32], index: 8, kind: input, shape index: {}]   ;;  %s8589_s9 = inlined_call_operand.vmem [shape: bf16[9,32,32], index: 9, kind: input, shape index: {}]   ;;  %s8590_s10 = inlined_call_operand.vmem [shape: f32[1,32], index: 10, kind: input, shape index: {}]   ;;  %s8591_s11 = inlined_call_operand.vmem [shape: f32[1,32], index: 11, kind: input, shape index: {}]   ;;  %s8592_s12 = inlined_call_operand.vmem [shape: f32[1,32], index: 12, kind: input, shape index: {}]   ;;  %s8593_s13 = inlined_call_operand.vmem [shape: f32[1,32], index: 13, kind: input, shape index: {}]   ;;  %s8594_s14 = inlined_call_operand.hbm [shape: f32[2,64,32], index: 14, kind: output, shape index: {}]  }
   0x1   :  { %8715 = sst [smem:[#allocation42_spill]] %s8580_s0 }
   0x2   :  { %19 = vsyncpa [#allocation3], 0 }
   0x3   :  { %21 = vsyncpa [#allocation3 + $0x1], 0  ;;  %s6651_s29 = smov 0   ;;  %s6653_s30 = smov 0  }
   0x4   :  { %s6655_s15 = smov 0   ;;  %s6657_s16 = smov 0  }
   0x5 LB: > { %8716 = sst [smem:[#allocation5_spill]] %s6566_s15  ;;  %s6672_s17 = sadd.s32 4294967295, %s6570_s16   ;;  %s6570_s16 = sphi %s6657_s16, %s9063_s16   ;;  %s6566_s15 = sphi %s6655_s15, %s9065_s15   ;;  %s6562_s30 = sphi %s6653_s30, %s9067_s30   ;;  %s6558_s29 = sphi %s6651_s29, %s9066_s29  }
   0x6   : > { %s5383_s18 = sadd.s32 4294967294, %s6570_s16   ;;  %s6676_s19 = sadd.s32 1, %s6570_s16  }
   0x7   : > { %8717 = sst [smem:[#allocation6_spill]] %s6676_s19  ;;  %s333_s20 = sadd.s32 1, %s6566_s15 }
   0x8   : > { %s330_s21 = ssub.s32 %s6570_s16, %s6676_s19  ;;  %p343_p0 = scmp.ne.s32.totalorder %s6566_s15, %s6562_s30 }
   0x9   : > { %p331_p1 = scmp.eq.s32.totalorder %s330_s21, 0  ;;  %p344_p2 = scmp.eq.s32.totalorder %s6672_s17, 1 }
   0xa   : > { %p349_p3 = scmp.ne.s32.totalorder %s6562_s30, %s6558_s29  ;;  %p350_p4 = scmp.eq.s32.totalorder %s5383_s18, 1 }
   0xb   : > { %s6687_s22 = scalar_select %p331_p1, %s6566_s15, %s333_s20  }
   0xc   : > { %p6689_p5 = por %p344_p2, %p343_p0  ;;  %p6693_p6 = por %p350_p4, %p349_p3 }
   0xd   : > { %8718 = sst [smem:[#allocation7_spill]] %s6687_s22  ;;  %p5386_p7 = scmp.ge.s32.totalorder %s6570_s16, 1 }
   0xe   : > { %p415_p8 = scmp.lt.s32.totalorder %s6570_s16, 3 }
  0x10   : > { %p416_p9 = pnand %p5386_p7, %p415_p8 }
  0x12   : > { %419 = sbr.rel (%p416_p9) target bundleno = 1256 (0x4e8), region = 76 }
  0x17   : > { %v6446_v0 = vld [vmem:[%s8581_s1 + $0x8] sm:$0xff]   ;;  %p461_p10 = scmp.lt.s32.totalorder %s6672_s17, 1  ;;  %v694_v1 = vlaneseq  ;;  %v6707_v2 = vld [vmem:[%s8581_s1] sm:$0xff]   ;;  %v6712_v3 = vld [vmem:[%s8581_s1 + $0x10] sm:$0xff]   ;;  %s8721_s0 = sld [smem:[#allocation42_spill]]  ;;  %vm8598_vm0 = vcmask 1043456  }
  0x18   : > { %6402 = vmatprep.subr.bf16.mxu1 %v6446_v0  ;;  %5978 = vmatprep.subr.bf16.mxu0 %v6446_v0  ;;  %v6719_v5 = vld [vmem:[%s8583_s3] ss:$0 sm:$0xff]  ;;  %vm8602_vm1 = vcmask 130048   ;;  %vm8605_vm12 = vsmask.f32 4352  ;;  %vm8599_vm13 = vcmask 1044480  }
  0x19   : > { %s462_s27 = scalar_select %p461_p10, %s6672_s17, 1  ;;  %6403 = vmatpush3.bf16.msra.mxu1 %v6446_v0  ;;  %5979 = vmatpush3.bf16.msra.mxu0 %v6446_v0  ;;  %v6714_v4 = vshrl.u32 %v694_v1, 7  ;;  %v6724_v6 = vld [vmem:[%s8584_s4] ss:$0 sm:$0xff] }
  0x1a   : > { %5988 = vmatprep.subr.bf16.mxu1 %v6707_v2  ;;  %5998 = vmatprep.subr.bf16.mxu0 %v6712_v3  ;;  %v6799_v63 = vld [vmem:[%s8581_s1 + $0x20] sm:$0xff]   ;;  %s458_s21 = sand.u32 1, %s6562_s30   ;;  %s5765_s28 = sshll.u32 %s6672_s17, 10 }
  0x1b   : > { %s5764_s25 = sshll.u32 %s462_s27, 8  ;;  %v6734_v7 = vadd.s32 8, %v6714_v4  ;;  %v703_v8 = vand.u32 7, %v6714_v4  ;;  %v6741_v12 = vadd.s32 16, %v6714_v4  ;;  %v6744_v13 = vadd.s32 24, %v6714_v4  ;;  %s8529_s22 = scalar_lea.hbm %s8594_s14, %s5765_s28 }
  0x1c   : > { %v6747_v14 = vadd.s32 32, %v6714_v4  ;;  %s8540_s17 = scalar_lea.sflag [#allocation3], %s458_s21  ;;  %s6573_s27 = smov [#allocation2]  }
  0x1d   : > { %s6730_s20 = scalar_lea.vmem %s8721_s0, %s5764_s25  ;;  %v704_v21 = vand.u32 7, %v6734_v7  ;;  %vm6763_vm2 = vcmp.ge.s32.totalorder %v703_v8, 1  ;;  %s5387_s25 = sshll.u32 %s458_s21, 6 }
  0x1e   : > { %v5400_v9 = vld [vmem:[%s6730_s20 + $0x80] sm:$0xff]  ;;  %v5401_v10 = vld [vmem:[%s6730_s20 + $0x88] sm:$0xff]  ;;  %v5402_v11 = vld [vmem:[%s6730_s20 + $0x90] sm:$0xff]  ;;  %s8503_s26 = scalar_lea.vmem [#allocation2], %s5387_s25  ;;  %s6514_s25 = sshll.u32 %s6573_s27, 4  ;;  %s6515_s25 = int_to_ptr.vmem [resolvable:$false] %s6514_s25 }
  0x1f   : > { %v589_v15 = vmul.f32 %v5400_v9, %v6719_v5  ;;  %v590_v16 = vmul.f32 %v5401_v10, %v6719_v5  ;;  %v5403_v17 = vld [vmem:[%s6730_s20 + $0x98] sm:$0xff]  ;;  %v5404_v18 = vld [vmem:[%s6730_s20 + $0xa0] sm:$0xff]  ;;  %v5405_v19 = vld [vmem:[%s6730_s20 + $0xa8] sm:$0xff]  ;;  %v591_v20 = vmul.f32 %v5402_v11, %v6719_v5  ;;  %vm6806_vm14 = vcmp.ge.s32.totalorder %v704_v21, 1  ;;  %s5321_s18 = sshll.u32 %s8503_s26, 4  ;;  %s6516_s28 = scalar_lea.vmem %s6515_s25, 2048  ;;  %s8531_s18 = int_to_ptr.vmem [resolvable:$true] %s5321_s18 }
  0x20   : > { %v592_v22 = vmul.f32 %v5403_v17, %v6719_v5  ;;  %v593_v23 = vmul.f32 %v5404_v18, %v6719_v5  ;;  %v594_v24 = vmul.f32 %v5405_v19, %v6719_v5  ;;  %v5406_v25 = vld [vmem:[%s6730_s20 + $0xb0] sm:$0xff]  ;;  %v5407_v26 = vld [vmem:[%s6730_s20 + $0xb8] sm:$0xff]  ;;  %v5408_v38 = vld [vmem:[%s6730_s20 + $0xc0] sm:$0xff]  ;;  %v8606_v17 = vmov 0   ;;  %p6517_p0 = scmp.lt.s32.totalorder %s8531_s18, %s6515_s25 }
  0x21   : > { %v597_v28 = vadd.f32 %v6724_v6, %v589_v15  ;;  %v598_v29 = vadd.f32 %v6724_v6, %v590_v16  ;;  %v599_v30 = vadd.f32 %v6724_v6, %v591_v20  ;;  %v595_v31 = vmul.f32 %v5406_v25, %v6719_v5  ;;  %v5409_v50 = vld [vmem:[%s6730_s20 + $0xc8] sm:$0xff]  ;;  %vm778_vm11 = vmpackc.low %vm6763_vm2, %vm6763_vm2  ;;  %v5410_v62 = vld [vmem:[%s6730_s20 + $0xd0] sm:$0xff] }
  0x22   : > { %v600_v32 = vadd.f32 %v6724_v6, %v592_v22  ;;  %v601_v33 = vadd.f32 %v6724_v6, %v593_v23  ;;  %v602_v34 = vadd.f32 %v6724_v6, %v594_v24  ;;  %v596_v35 = vmul.f32 %v5407_v26, %v6719_v5  ;;  %vm779_vm15 = vmpackc.low %vm6806_vm14, %vm6806_vm14  ;;  %v5411_v19 = vld [vmem:[%s6730_s20 + $0xd8] sm:$0xff] }
  0x23   : > { %vm605_vm3 = vcmp.gt.f32.partialorder %v597_v28, 0.0  ;;  %vm606_vm4 = vcmp.gt.f32.partialorder %v598_v29, 0.0  ;;  %v613_v36 = vmul.f32 0.1, %v597_v28  ;;  %v614_v37 = vmul.f32 0.1, %v598_v29 }
  0x24   : > { %vm607_vm5 = vcmp.gt.f32.partialorder %v599_v30, 0.0  ;;  %vm608_vm6 = vcmp.gt.f32.partialorder %v600_v32, 0.0  ;;  %vm609_vm7 = vcmp.gt.f32.partialorder %v601_v33, 0.0  ;;  %vm610_vm8 = vcmp.gt.f32.partialorder %v602_v34, 0.0  ;;  %v5415_v10 = vld [vmem:[%s6730_s20 + $0xf8] sm:$0xff] }
  0x25   : > { %v621_v39 = vsel %vm605_vm3, %v597_v28, %v613_v36  ;;  %v622_v40 = vsel %vm606_vm4, %v598_v29, %v614_v37  ;;  %v615_v41 = vmul.f32 0.1, %v599_v30  ;;  %v616_v42 = vmul.f32 0.1, %v600_v32 }
  0x26   : > { %v6776_v43 = vpack.c.bf16 %v622_v40, %v621_v39  ;;  %v617_v44 = vmul.f32 0.1, %v601_v33  ;;  %v618_v45 = vmul.f32 0.1, %v602_v34  ;;  %v603_v46 = vadd.f32 %v6724_v6, %v595_v31  ;;  %v6843_v31 = vld [vmem:[%s8581_s1 + $0x18] sm:$0xff]   ;;  %v5412_v39 = vld [vmem:[%s6730_s20 + $0xe0] sm:$0xff] }
  0x27   : > { %v623_v47 = vsel %vm607_vm5, %v599_v30, %v615_v41  ;;  %v624_v48 = vsel %vm608_vm6, %v600_v32, %v616_v42  ;;  %v604_v49 = vadd.f32 %v6724_v6, %v596_v35  ;;  %v638_v51 = vmul.f32 %v5408_v38, %v6719_v5  ;;  %v5413_v42 = vld [vmem:[%s6730_s20 + $0xe8] sm:$0xff] }
  0x28   : > { %v821_v52 = vrot.slane %v6776_v43, 4  ;;  %v625_v53 = vsel %vm609_vm7, %v601_v33, %v617_v44  ;;  %v626_v54 = vsel %vm610_vm8, %v602_v34, %v618_v45  ;;  %v6785_v55 = vpack.c.bf16 %v624_v48, %v623_v47 }
  0x29   : > { %v6787_v56 = vpack.c.bf16 %v626_v54, %v625_v53  ;;  %vm611_vm9 = vcmp.gt.f32.partialorder %v603_v46, 0.0  ;;  %vm612_vm10 = vcmp.gt.f32.partialorder %v604_v49, 0.0  ;;  %v619_v57 = vmul.f32 0.1, %v603_v46 }
  0x2a   : > { %v831_v58 = vsel %vm8598_vm0, 0, %v821_v52  ;;  %v822_v59 = vrot.slane %v6785_v55, 4  ;;  %v620_v60 = vmul.f32 0.1, %v604_v49  ;;  %v639_v61 = vmul.f32 %v5409_v50, %v6719_v5 }
  0x2b   : > { %5980 = vmatprep.mubr.msk.bf16.mxu0 %vm8602_vm1, %v831_v58  ;;  %v824_v0 = vrot.slane %v6787_v56, 4  ;;  %v627_v1 = vsel %vm611_vm9, %v603_v46, %v619_v57  ;;  %v646_v9 = vadd.f32 %v6724_v6, %v638_v51  ;;  %v6822_v18 = vsel %vm778_vm11, 65537, %v8606_v17  ;;  %vm6885_vm11 = vmand %vm8599_vm13, %vm8605_vm12 }
  0x2c   : > { %v823_v11 = vsel %vm8598_vm0, %v821_v52, %v822_v59  ;;  %v628_v15 = vsel %vm612_vm10, %v604_v49, %v620_v60  ;;  %v647_v16 = vadd.f32 %v6724_v6, %v639_v61  ;;  %v6832_v25 = vsel %vm779_vm15, 65537, %v8606_v17 }
  0x2d   : > { %v825_v20 = vsel %vm8598_vm0, %v822_v59, %v824_v0  ;;  %5981 = vmatmul.mubr.msk.bf16.vlgmr.msra.gmra.mxu0 %vm8602_vm1, %v823_v11  ;;  %v6827_v22 = vpack.c.bf16 %v628_v15, %v627_v1  ;;  %vm654_vm3 = vcmp.gt.f32.partialorder %v646_v9, 0.0  ;;  %v662_v23 = vmul.f32 0.1, %v646_v9 }
  0x2e   : > { %5984 = vmatprep.mubr.msk.bf16.mxu1 %vm8602_vm1, %v825_v20  ;;  %5999 = vmatpush3.bf16.msra.mxu0 %v6712_v3  ;;  %vm655_vm4 = vcmp.gt.f32.partialorder %v647_v16, 0.0  ;;  %v663_v24 = vmul.f32 0.1, %v647_v16  ;;  %v640_v26 = vmul.f32 %v5410_v62, %v6719_v5  ;;  %v5416_v29 = vcombine.low %v6822_v18, %v6832_v25 }
  0x2f   : > { %v826_v27 = vrot.slane %v6827_v22, 4  ;;  %v670_v28 = vsel %vm654_vm3, %v646_v9, %v662_v23  ;;  %v641_v30 = vmul.f32 %v5411_v19, %v6719_v5  ;;  %6018 = vmatprep.subr.bf16.mxu0 %v6799_v63  ;;  %v705_v33 = vand.u32 7, %v6741_v12  ;;  %v5414_v9 = vld [vmem:[%s6730_s20 + $0xf0] sm:$0xff] }
  0x30   : > { %v671_v3 = vsel %vm655_vm4, %v647_v16, %v663_v24  ;;  %v648_v32 = vadd.f32 %v6724_v6, %v640_v26  ;;  %v706_v34 = vand.u32 7, %v6744_v13  ;;  %vm6851_vm2 = vcmp.ne.s16.totalorder %v5416_v29, 0  ;;  %v6914_v19 = vld [vmem:[%s8581_s1 + $0x30] sm:$0xff]  }
  0x31   : > { %v827_v35 = vsel %vm8598_vm0, %v824_v0, %v826_v27  ;;  %v6849_v36 = vpack.c.bf16 %v671_v3, %v670_v28  ;;  %v8726_v37 = vmov 0  ;;  %v649_v38 = vadd.f32 %v6724_v6, %v641_v30  ;;  %v471_v13 = vld [vmem:[%s6730_s20 + $0x10] sm:$0xff] }
  0x32   : > { %v8727_v37 = vsel %vm6851_vm2, 4294967295, %v8726_v37  ;;  %5985 = vmatmul.mubr.msk.bf16.vlgmr.msra.gmra.mxu1 %vm8602_vm1, %v827_v35  ;;  %vm656_vm5 = vcmp.gt.f32.partialorder %v648_v32, 0.0  ;;  %v664_v40 = vmul.f32 0.1, %v648_v32  ;;  %vm756_vm6 = vcmp.ge.s32.totalorder %v705_v33, 1 }
  0x33   : > { %8728 = vst [vmem:[#allocation8_spill] sm:$0xff] %v8727_v37  ;;  %vm6862_vm7 = vcmp.ge.s32.totalorder %v706_v34, 1  ;;  %5989 = vmatpush3.bf16.msra.mxu1 %v6707_v2  ;;  %v713_v44 = vshrl.u32 %v6849_v36, 16  ;;  %v8613_v45 = vshll.u32 %v6849_v36, 16  ;;  %v1005_v46 = vrot.slane %v6849_v36, 4  ;;  %vm780_vm9 = vmpackc.low %vm756_vm6, %vm756_vm6 }
  0x34   : > { %vm657_vm8 = vcmp.gt.f32.partialorder %v649_v38, 0.0  ;;  %6008 = vmatprep.subr.bf16.mxu1 %v6843_v31  ;;  %v665_v47 = vmul.f32 0.1, %v649_v38  ;;  %v672_v48 = vsel %vm656_vm5, %v648_v32, %v664_v40  ;;  %vm781_vm10 = vmpackc.low %vm6862_vm7, %vm6862_vm7  ;;  %v6876_v49 = vsel %vm780_vm9, 65537, %v8606_v17 }
  0x35   : > { %v642_v2 = vmul.f32 %v5412_v39, %v6719_v5  ;;  %v715_v50 = vrot.slane %v713_v44, 3  ;;  %v718_v51 = vrot.slane %v8613_v45, 4  ;;  %v8731_v52 = vmov 0 }
  0x36   : > { %v8732_v52 = vsel %vm6885_vm11, 4294967295, %v8731_v52  ;;  %v1013_v53 = vsel %vm8598_vm0, 0, %v1005_v46  ;;  %v6891_v54 = vsel %vm781_vm10, 65537, %v8606_v17  ;;  %v673_v57 = vsel %vm657_vm8, %v649_v38, %v665_v47 }
  0x37   : > { %8733 = vst [vmem:[#allocation9_spill] sm:$0xff] %v8732_v52  ;;  %8734 = vst [vmem:[#allocation10_spill] sm:$0xff] %v6891_v54  ;;  %6000 = vmatprep.mubr.msk.bf16.mxu0 %vm8602_vm1, %v1013_v53  ;;  %v5417_v58 = vcombine.low %v6876_v49, %v6891_v54  ;;  %v643_v59 = vmul.f32 %v5413_v42, %v6719_v5  ;;  %v650_v60 = vadd.f32 %v6724_v6, %v642_v2  ;;  %v8735_v11 = vmov 0 }
  0x38   : > { %v719_v61 = vor.u32 %v718_v51, %v715_v50  ;;  %v6898_v62 = vpack.c.bf16 %v673_v57, %v672_v48  ;;  %v6901_v0 = vadd.s32 40, %v6714_v4  ;;  %v707_v1 = vand.u32 7, %v6747_v14 }
  0x39   : > { %vm6906_vm14 = vcmp.ne.s16.totalorder %v5417_v58, 0  ;;  %v651_v15 = vadd.f32 %v6724_v6, %v643_v59  ;;  %vm658_vm15 = vcmp.gt.f32.partialorder %v650_v60, 0.0  ;;  %v666_v16 = vmul.f32 0.1, %v650_v60  ;;  %v6961_v58 = vld [vmem:[%s8581_s1 + $0x28] sm:$0xff]  }
  0x3a   : > { %v8736_v11 = vsel %vm6906_vm14, 4294967295, %v8735_v11  ;;  %v753_v20 = vsel %vm6885_vm11, 0, %v719_v61  ;;  %v721_v23 = vshrl.u32 %v6898_v62, 16  ;;  %v8612_v24 = vshll.u32 %v6898_v62, 16 }
  0x3b   : > { %8737 = vst [vmem:[#allocation11_spill] sm:$0xff] %v8736_v11  ;;  %v1006_v26 = vrot.slane %v6898_v62, 4  ;;  %v810_v27 = vsel %vm6851_vm2, %v753_v20, 0  ;;  %vm659_vm3 = vcmp.gt.f32.partialorder %v651_v15, 0.0  ;;  %v667_v28 = vmul.f32 0.1, %v651_v15 }
  0x3c   : > { %v674_v29 = vsel %vm658_vm15, %v650_v60, %v666_v16  ;;  %5990 = vmatprep.mubr.msk.bf16.mxu1 %vm8602_vm1, %v810_v27  ;;  %v723_v30 = vrot.slane %v721_v23, 3  ;;  %v726_v3 = vrot.slane %v8612_v24, 4  ;;  %v708_v35 = vand.u32 7, %v6901_v0  ;;  %v5393_v20 = vld [vmem:[%s6730_s20 + $0x48] sm:$0xff]  ;;  %v476_v24 = vld [vmem:[%s6730_s20 + $0x38] sm:$0xff] }
  0x3d   : > { %v1007_v32 = vsel %vm8598_vm0, %v1005_v46, %v1006_v26  ;;  %v675_v38 = vsel %vm659_vm3, %v651_v15, %v667_v28  ;;  %vm758_vm4 = vcmp.ge.s32.totalorder %v707_v1, 1  ;;  %v644_v39 = vmul.f32 %v5414_v9, %v6719_v5  ;;  %v5392_v9 = vld [vmem:[%s6730_s20 + $0x40] sm:$0xff] }
  0x3e   : > { %6001 = vmatmul.mubr.msk.bf16.vlgmr.msra.gmra.mxu0 %vm8602_vm1, %v1007_v32  ;;  %v645_v40 = vmul.f32 %v5415_v10, %v6719_v5  ;;  %v727_v41 = vor.u32 %v726_v3, %v723_v30  ;;  %v6936_v42 = vpack.c.bf16 %v675_v38, %v674_v29  ;;  %vm759_vm5 = vcmp.ge.s32.totalorder %v708_v35, 1  ;;  %vm782_vm6 = vmpackc.low %vm758_vm4, %vm758_vm4 }
  0x3f   : > { %6019 = vmatpush3.bf16.msra.mxu0 %v6799_v63  ;;  %v6941_v46 = vadd.s32 48, %v6714_v4  ;;  %vm783_vm7 = vmpackc.low %vm759_vm5, %vm759_vm5  ;;  %v6944_v47 = vsel %vm782_vm6, 65537, %v8606_v17  ;;  %v652_v48 = vadd.f32 %v6724_v6, %v644_v39  ;;  %v6949_v63 = vadd.s32 56, %v6714_v4 }
  0x40   : > { %8738 = vst [vmem:[#allocation12_spill] sm:$0xff] %v6944_v47  ;;  %v653_v2 = vadd.f32 %v6724_v6, %v645_v40  ;;  %6038 = vmatprep.subr.bf16.mxu0 %v6914_v19  ;;  %v728_v50 = vsel %vm8605_vm12, %v719_v61, %v727_v41  ;;  %v730_v51 = vshrl.u32 %v6936_v42, 16  ;;  %v8611_v53 = vshll.u32 %v6936_v42, 16 }
  0x41   : > { %v6956_v57 = vsel %vm783_vm7, 65537, %v8606_v17  ;;  %v811_v59 = vsel %vm6906_vm14, %v728_v50, 0  ;;  %v1008_v61 = vrot.slane %v6936_v42, 4  ;;  %vm660_vm8 = vcmp.gt.f32.partialorder %v652_v48, 0.0 }
  0x42   : > { %8739 = vst [vmem:[#allocation13_spill] sm:$0xff] %v6956_v57  ;;  %v5418_v60 = vcombine.low %v6944_v47, %v6956_v57  ;;  %5991 = vmatmul.mubr.msk.bf16.vlgmr.msra.gmra.mxu1 %vm8602_vm1, %v811_v59  ;;  %v732_v10 = vrot.slane %v730_v51, 3  ;;  %v735_v15 = vrot.slane %v8611_v53, 4  ;;  %vm661_vm9 = vcmp.gt.f32.partialorder %v653_v2, 0.0 }
  0x43   : > { %v668_v16 = vmul.f32 0.1, %v652_v48  ;;  %6009 = vmatpush3.bf16.msra.mxu1 %v6843_v31  ;;  %v8740_v27 = vmov 0  ;;  %v1009_v28 = vsel %vm8598_vm0, %v1006_v26, %v1008_v61  ;;  %v669_v29 = vmul.f32 0.1, %v653_v2 }
  0x44   : > { %vm6976_vm10 = vcmp.ne.s16.totalorder %v5418_v60, 0  ;;  %v709_v30 = vand.u32 7, %v6941_v46  ;;  %v736_v3 = vor.u32 %v735_v15, %v732_v10  ;;  %6004 = vmatprep.mubr.msk.bf16.mxu0 %vm8602_vm1, %v1009_v28  ;;  %v710_v38 = vand.u32 7, %v6949_v63  ;;  %6028 = vmatprep.subr.bf16.mxu1 %v6961_v58 }
  0x45   : > { %v8741_v27 = vsel %vm6976_vm10, 4294967295, %v8740_v27  ;;  %v676_v32 = vsel %vm660_vm8, %v652_v48, %v668_v16  ;;  %v540_v39 = vmul.f32 %v5392_v9, %v6719_v5  ;;  %v677_v31 = vsel %vm661_vm9, %v653_v2, %v669_v29 }
  0x46   : > { %8742 = vst [vmem:[#allocation14_spill] sm:$0xff] %v8741_v27  ;;  %vm760_vm15 = vcmp.ge.s32.totalorder %v709_v30, 1  ;;  %v541_v40 = vmul.f32 %v5393_v20, %v6719_v5  ;;  %vm8600_vm3 = vsmask.f32 256  ;;  %v737_v26 = vsel %vm8605_vm12, %v727_v41, %v736_v3 }
  0x47   : > { %v6988_v50 = vpack.c.bf16 %v677_v31, %v676_v32  ;;  %vm761_vm4 = vcmp.ge.s32.totalorder %v710_v38, 1  ;;  %vm784_vm5 = vmpackc.low %vm760_vm15, %vm760_vm15  ;;  %v548_v46 = vadd.f32 %v6724_v6, %v540_v39  ;;  %v812_v48 = vsel %vm6976_vm10, %v737_v26, 0  ;;  %v469_v26 = vld [vmem:[%s6730_s20] sm:$0xff] }
  0x48   : > { %vm785_vm6 = vmpackc.low %vm761_vm4, %vm761_vm4  ;;  %v6994_v63 = vsel %vm784_vm5, 65537, %v8606_v17  ;;  %v549_v2 = vadd.f32 %v6724_v6, %v541_v40  ;;  %vm8601_vm7 = vcmask 1040384   ;;  %5994 = vmatprep.mubr.msk.bf16.mxu1 %vm8602_vm1, %v812_v48  ;;  %v8745_v32 = vmov 0 }
  0x49   : > { %8743 = vst [vmem:[#allocation15_spill] sm:$0xff] %v6994_v63  ;;  %v8610_v41 = vshrl.u32 %v6988_v50, 16  ;;  %v8609_v59 = vshll.u32 %v6988_v50, 16  ;;  %v7001_v60 = vsel %vm785_vm6, 65537, %v8606_v17  ;;  %v1010_v9 = vrot.slane %v6988_v50, 4  ;;  %vm7018_vm4 = vmand %vm8601_vm7, %vm8600_vm3 }
  0x4a   : > { %8744 = vst [vmem:[#allocation16_spill] sm:$0xff] %v7001_v60  ;;  %v5419_v10 = vcombine.low %v6994_v63, %v7001_v60  ;;  %vm556_vm8 = vcmp.gt.f32.partialorder %v548_v46, 0.0  ;;  %vm557_vm9 = vcmp.gt.f32.partialorder %v549_v2, 0.0  ;;  %v564_v15 = vmul.f32 0.1, %v548_v46 }
  0x4b   : > { %v741_v16 = vrot.slane %v8610_v41, 3  ;;  %v744_v20 = vrot.slane %v8609_v59, 4  ;;  %v1011_v28 = vsel %vm8598_vm0, %v1008_v61, %v1010_v9  ;;  %v565_v29 = vmul.f32 0.1, %v549_v2  ;;  %v475_v59 = vld [vmem:[%s6730_s20 + $0x30] sm:$0xff] }
  0x4c   : > { %vm7011_vm15 = vcmp.ne.s16.totalorder %v5419_v10, 0  ;;  %6005 = vmatmul.mubr.msk.bf16.gmra.mxu0 %vm8602_vm1, %v1011_v28  ;;  %v572_v39 = vsel %vm556_vm8, %v548_v46, %v564_v15  ;;  %vm7024_vm5 = vcmp.le.s32.totalorder %v703_v8, 6  ;;  %vm7030_vm6 = vcmp.le.s32.totalorder %v704_v21, 6  ;;  %v470_v21 = vld [vmem:[%s6730_s20 + $0x8] sm:$0xff] }
  0x4d   : > { %v8746_v32 = vsel %vm7011_vm15, 4294967295, %v8745_v32  ;;  %v745_v46 = vor.u32 %v744_v20, %v741_v16  ;;  %v573_v48 = vsel %vm557_vm9, %v549_v2, %v565_v29  ;;  %vm7037_vm8 = vcmp.le.s32.totalorder %v705_v33, 6  ;;  %vm2081_vm13 = vmpackc.low %vm7024_vm5, %vm7024_vm5 }
  0x4e   : > { %8747 = vst [vmem:[#allocation17_spill] sm:$0xff] %v8746_v32  ;;  %vm7043_vm0 = vcmp.le.s32.totalorder %v706_v34, 6  ;;  %v7050_v7 = vpack.c.bf16 %v573_v48, %v572_v39  ;;  %vm7054_vm9 = vcmp.le.s32.totalorder %v707_v1, 6  ;;  %vm7060_vm3 = vcmp.le.s32.totalorder %v708_v35, 6  ;;  %vm2082_vm5 = vmpackc.low %vm7030_vm6, %vm7030_vm6  ;;  %v5394_v1 = vld [vmem:[%s6730_s20 + $0x50] sm:$0xff]  ;;  %v5395_v48 = vld [vmem:[%s6730_s20 + $0x58] sm:$0xff] }
  0x4f   : > { %vm7064_vm7 = vcmp.le.s32.totalorder %v709_v30, 6  ;;  %v746_v14 = vsel %vm8605_vm12, %v736_v3, %v745_v46  ;;  %vm7073_vm1 = vcmp.le.s32.totalorder %v710_v38, 6  ;;  %vm2083_vm11 = vmpackc.low %vm7037_vm8, %vm7037_vm8  ;;  %v2089_v34 = vsel %vm2081_vm13, 65537, %v8606_v17 }
  0x50   : > { %v2090_v0 = vsel %vm2082_vm5, 65537, %v8606_v17  ;;  %v813_v35 = vsel %vm7011_vm15, %v746_v14, 0  ;;  %v1109_v30 = vshrl.u32 %v7050_v7, 16  ;;  %v1112_v3 = vshll.u32 %v7050_v7, 16  ;;  %vm2084_vm6 = vmpackc.low %vm7043_vm0, %vm7043_vm0 }
  0x51   : > { %v2091_v38 = vsel %vm2083_vm11, 65537, %v8606_v17  ;;  %vm8766_vm12 = vcmask 130048   ;;  %vm2085_vm13 = vmpackc.low %vm7054_vm9, %vm7054_vm9  ;;  %v2092_v2 = vsel %vm2084_vm6, 65537, %v8606_v17  ;;  %v7096_v10 = vcombine.low %v2089_v34, %v2090_v0  ;;  %v472_v34 = vld [vmem:[%s6730_s20 + $0x18] sm:$0xff] }
  0x52   : > { %5995 = vmatmul.mubr.msk.bf16.gmra.mxu1 %vm8766_vm12, %v813_v35  ;;  %v484_v15 = vmul.f32 %v6719_v5, %v469_v26  ;;  %v485_v16 = vmul.f32 %v6719_v5, %v470_v21  ;;  %v7100_v20 = vrot.slane %v1109_v30, 7  ;;  %vm2086_vm0 = vmpackc.low %vm7060_vm3, %vm7060_vm3  ;;  %v2093_v28 = vsel %vm2085_vm13, 65537, %v8606_v17 }
  0x53   : > { %8767 = vst [vmem:[#allocation18_spill] sm:$0xff] %v7096_v10  ;;  %v7106_v29 = vcombine.low %v2091_v38, %v2092_v2  ;;  %v542_v39 = vmul.f32 %v5394_v1, %v6719_v5  ;;  %vm2087_vm12 = vmpackc.low %vm7064_vm7, %vm7064_vm7  ;;  %v2094_v40 = vsel %vm2086_vm0, 65537, %v8606_v17  ;;  %v8608_v61 = vrot.slane %v7096_v10, 7 }
  0x54   : > { %v499_v26 = vadd.f32 %v6724_v6, %v484_v15  ;;  %v500_v46 = vadd.f32 %v6724_v6, %v485_v16  ;;  %v1114_v9 = vor.u32 %v1112_v3, %v7100_v20  ;;  %vm2088_vm11 = vmpackc.low %vm7073_vm1, %vm7073_vm1  ;;  %v2095_v4 = vsel %vm2087_vm12, 65537, %v8606_v17 }
  0x55   : > { %v7122_v8 = vcombine.low %v2093_v28, %v2094_v40  ;;  %v2110_v12 = vrot.slane %v7106_v29, 7  ;;  %v2096_v21 = vsel %vm2088_vm11, 65537, %v8606_v17  ;;  %vm8769_vm1 = vcmask 1040384   ;;  %v5396_v40 = vld [vmem:[%s6730_s20 + $0x60] sm:$0xff] }
  0x56   : > { %vm507_vm3 = vcmp.gt.f32.partialorder %v499_v26, 0.0  ;;  %vm508_vm7 = vcmp.gt.f32.partialorder %v500_v46, 0.0  ;;  %v515_v14 = vmul.f32 0.1, %v499_v26  ;;  %v1145_v0 = vsel %vm7018_vm4, 0, %v1114_v9  ;;  %vm8772_vm9 = vmmov %vm8769_vm1 }
  0x57   : > { %v7130_v33 = vcombine.low %v2095_v4, %v2096_v21  ;;  %v7135_v1 = vsel %vm8769_vm1, %v8608_v61, %v2110_v12  ;;  %v2112_v35 = vrot.slane %v7122_v8, 7  ;;  %v1146_v30 = vsel %vm6851_vm2, %v1145_v0, 0  ;;  %v5397_v21 = vld [vmem:[%s6730_s20 + $0x68] sm:$0xff]  ;;  %vm8774_vm5 = vmmov %vm8769_vm1  ;;  %v473_v0 = vld [vmem:[%s6730_s20 + $0x20] sm:$0xff] }
  0x58   : > { %8770 = vst [vmem:[#allocation20_spill] sm:$0xff] %v7135_v1  ;;  %v516_v3 = vmul.f32 0.1, %v500_v46  ;;  %v523_v38 = vsel %vm507_vm3, %v499_v26, %v515_v14  ;;  %vm8771_vm8 = vcmask 130048   ;;  %v543_v16 = vmul.f32 %v5395_v48, %v6719_v5  ;;  %v5399_v61 = vld [vmem:[%s6730_s20 + $0x78] sm:$0xff] }
  0x59   : > { %8768 = vst [vmem:[#allocation19_spill] sm:$0xff] %v7130_v33  ;;  %6010 = vmatprep.mubr.msk.bf16.mxu1 %vm8771_vm8, %v1146_v30  ;;  %v7142_v2 = vsel %vm8772_vm9, %v2110_v12, %v2112_v35  ;;  %v8607_v15 = vrot.slane %v7130_v33, 7  ;;  %v550_v28 = vadd.f32 %v6724_v6, %v542_v39  ;;  %v486_v4 = vmul.f32 %v6719_v5, %v471_v13  ;;  %vm8777_vm13 = vmmov %vm8771_vm8 }
  0x5a   : > { %8773 = vst [vmem:[#allocation21_spill] sm:$0xff] %v7142_v2  ;;  %v524_v9 = vsel %vm508_vm7, %v500_v46, %v516_v3  ;;  %v487_v26 = vmul.f32 %v6719_v5, %v472_v34  ;;  %v551_v48 = vadd.f32 %v6724_v6, %v543_v16  ;;  %v545_v30 = vmul.f32 %v5397_v21, %v6719_v5  ;;  %v474_v3 = vld [vmem:[%s6730_s20 + $0x28] sm:$0xff]  ;;  %vm8779_vm1 = vmmov %vm8771_vm8 }
  0x5b   : > { %v7155_v12 = vsel %vm8774_vm5, %v2112_v35, %v8607_v15  ;;  %v7157_v14 = vpack.c.bf16 %v524_v9, %v523_v38  ;;  %vm558_vm6 = vcmp.gt.f32.partialorder %v550_v28, 0.0  ;;  %v566_v39 = vmul.f32 0.1, %v550_v28  ;;  %v5398_v9 = vld [vmem:[%s6730_s20 + $0x70] sm:$0xff]  ;;  %s6510_s20 = scalar_lea.vmem %s8531_s18, 1024 }
  0x5c   : > { %8775 = vst [vmem:[#allocation22_spill] sm:$0xff] %v7155_v12  ;;  %v501_v46 = vadd.f32 %v6724_v6, %v486_v4  ;;  %v502_v13 = vadd.f32 %v6724_v6, %v487_v26  ;;  %vm559_vm0 = vcmp.gt.f32.partialorder %v551_v48, 0.0  ;;  %v567_v34 = vmul.f32 0.1, %v551_v48  ;;  %p6511_p11 = scmp.ne.s32.totalorder %s8531_s18, %s6510_s20  ;;  %p6518_p1 = scmp.lt.s32.totalorder %s6516_s28, %s6510_s20 }
  0x5d   : > { %8776 = vst [vmem:[#allocation23_spill] sm:$0xff] %v7157_v14  ;;  %6020 = vmatprep.mubr.msk.bf16.mxu0 %vm8777_vm13, %v7157_v14  ;;  %v544_v35 = vmul.f32 %v5396_v40, %v6719_v5  ;;  %v574_v38 = vsel %vm558_vm6, %v550_v28, %v566_v39  ;;  %v553_v15 = vadd.f32 %v6724_v6, %v545_v30  ;;  %v7180_v28 = vld [vmem:[%s8581_s1 + $0x40] sm:$0xff]   ;;  %vm8780_vm5 = vsmask.f32 256 }
  0x5e   : > { %vm509_vm12 = vcmp.gt.f32.partialorder %v501_v46, 0.0  ;;  %vm510_vm11 = vcmp.gt.f32.partialorder %v502_v13, 0.0  ;;  %v517_v16 = vmul.f32 0.1, %v501_v46  ;;  %v575_v4 = vsel %vm559_vm0, %v551_v48, %v567_v34  ;;  %vm8782_vm0 = vmmov %vm8779_vm1  ;;  %p6512_p12 = pnand %p6511_p11, %p6689_p5  ;;  %p6519_p2 = por %p6518_p1, %p6517_p0 }
  0x5f   : > { %v518_v26 = vmul.f32 0.1, %v502_v13  ;;  %v552_v17 = vadd.f32 %v6724_v6, %v544_v35  ;;  %v7173_v41 = vpack.c.bf16 %v575_v4, %v574_v38  ;;  %v488_v40 = vmul.f32 %v6719_v5, %v473_v0 }
  0x60   : > { %v525_v53 = vsel %vm509_vm12, %v501_v46, %v517_v16  ;;  %v489_v21 = vmul.f32 %v6719_v5, %v474_v3  ;;  %vm561_vm7 = vcmp.gt.f32.partialorder %v553_v15, 0.0  ;;  %v569_v46 = vmul.f32 0.1, %v553_v15  ;;  %vm8783_vm12 = vmmov %vm8782_vm0  ;;  %p6513_p13 = pneg %p6512_p12 }
  0x61   : > { %v526_v48 = vsel %vm510_vm11, %v502_v13, %v518_v26  ;;  %vm560_vm3 = vcmp.gt.f32.partialorder %v552_v17, 0.0  ;;  %v568_v39 = vmul.f32 0.1, %v552_v17  ;;  %v1116_v34 = vshrl.u32 %v7173_v41, 16 }
  0x62   : > { %v1119_v35 = vshll.u32 %v7173_v41, 16  ;;  %v7184_v30 = vpack.c.bf16 %v526_v48, %v525_v53  ;;  %v503_v3 = vadd.f32 %v6724_v6, %v488_v40  ;;  %v504_v38 = vadd.f32 %v6724_v6, %v489_v21  ;;  %p6520_p3 = pnand %p6519_p2, %p6513_p13 }
  0x63   : > { %v576_v0 = vsel %vm560_vm3, %v552_v17, %v568_v39  ;;  %v546_v16 = vmul.f32 %v5398_v9, %v6719_v5  ;;  %v1118_v4 = vrot.slane %v1116_v34, 7  ;;  %v577_v13 = vsel %vm561_vm7, %v553_v15, %v569_v46  ;;  %vm8784_vm7 = vmmov %vm8780_vm5 }
  0x64   : > { %8778 = vst [vmem:[#allocation24_spill] sm:$0xff] %v7184_v30  ;;  %6021 = vmatmul.mubr.msk.bf16.vlgmr.msra.gmra.mxu0 %vm8779_vm1, %v7184_v30  ;;  %v547_v26 = vmul.f32 %v5399_v61, %v6719_v5  ;;  %v490_v45 = vmul.f32 %v6719_v5, %v475_v59  ;;  %v7195_v53 = vpack.c.bf16 %v577_v13, %v576_v0  ;;  %vm511_vm8 = vcmp.gt.f32.partialorder %v503_v3, 0.0  ;;  %v7202_v61 = vld [vmem:[%s8581_s1 + $0x38] sm:$0xff]   ;;  %vm8788_vm1 = vmmov %vm8782_vm0 }
  0x65   : > { %6039 = vmatpush3.bf16.msra.mxu0 %v6914_v19  ;;  %vm512_vm9 = vcmp.gt.f32.partialorder %v504_v38, 0.0  ;;  %v519_v17 = vmul.f32 0.1, %v503_v3  ;;  %v1121_v40 = vor.u32 %v1119_v35, %v1118_v4  ;;  %v520_v21 = vmul.f32 0.1, %v504_v38 }
  0x66   : > { %v554_v9 = vadd.f32 %v6724_v6, %v546_v16  ;;  %v555_v48 = vadd.f32 %v6724_v6, %v547_v26  ;;  %6058 = vmatprep.subr.bf16.mxu0 %v7180_v28  ;;  %v1124_v19 = vshrl.u32 %v7195_v53, 16  ;;  %v1127_v59 = vshll.u32 %v7195_v53, 16 }
  0x67   : > { %v527_v15 = vsel %vm511_vm8, %v503_v3, %v519_v17  ;;  %v491_v39 = vmul.f32 %v6719_v5, %v476_v24  ;;  %v1122_v34 = vsel %vm8780_vm5, %v7100_v20, %v1121_v40  ;;  %v528_v35 = vsel %vm512_vm9, %v504_v38, %v520_v21  ;;  %vm8790_vm8 = vmmov %vm8780_vm5 }
  0x68   : > { %vm562_vm6 = vcmp.gt.f32.partialorder %v554_v9, 0.0  ;;  %vm563_vm13 = vcmp.gt.f32.partialorder %v555_v48, 0.0  ;;  %v1147_v46 = vsel %vm6906_vm14, %v1122_v34, 0  ;;  %v1126_v0 = vrot.slane %v1124_v19, 7  ;;  %vm8792_vm9 = vmmov %vm8782_vm0 }
  0x69   : > { %v7212_v16 = vpack.c.bf16 %v528_v35, %v527_v15  ;;  %v570_v13 = vmul.f32 0.1, %v554_v9  ;;  %6011 = vmatmul.mubr.msk.bf16.vlgmr.msra.gmra.mxu1 %vm8782_vm0, %v1147_v46  ;;  %v571_v26 = vmul.f32 0.1, %v555_v48  ;;  %v505_v3 = vadd.f32 %v6724_v6, %v490_v45  ;;  %vm8793_vm5 = vmmov %vm8782_vm0 }
  0x6a   : > { %v506_v5 = vadd.f32 %v6724_v6, %v491_v39  ;;  %v1428_v24 = vrot.slane %v713_v44, 7  ;;  %6029 = vmatpush3.bf16.msra.mxu1 %v6961_v58  ;;  %v1129_v20 = vor.u32 %v1127_v59, %v1126_v0  ;;  %v1430_v17 = vrot.slane %v721_v23, 7 }
  0x6b   : > { %8781 = vst [vmem:[#allocation25_spill] sm:$0xff] %v7212_v16  ;;  %6024 = vmatprep.mubr.msk.bf16.mxu0 %vm8783_vm12, %v7212_v16  ;;  %v578_v38 = vsel %vm562_vm6, %v554_v9, %v570_v13  ;;  %v1433_v40 = vrot.slane %v730_v51, 7  ;;  %v579_v45 = vsel %vm563_vm13, %v555_v48, %v571_v26  ;;  %vm513_vm11 = vcmp.gt.f32.partialorder %v505_v3, 0.0  ;;  %6048 = vmatprep.subr.bf16.mxu1 %v7202_v61  ;;  %vm8796_vm13 = vmmov %vm8782_vm0 }
  0x6c   : > { %vm514_vm3 = vcmp.gt.f32.partialorder %v506_v5, 0.0  ;;  %v521_v6 = vmul.f32 0.1, %v505_v3  ;;  %v1130_v44 = vsel %vm8784_vm7, %v1118_v4, %v1129_v20  ;;  %v685_v58 = vpack.c.bf16 %v579_v45, %v578_v38  ;;  %vm8798_vm12 = vmmov %vm8782_vm0 }
  0x6d   : > { %v522_v21 = vmul.f32 0.1, %v506_v5  ;;  %v8785_v19 = vshll.u32 %v6849_v36, 16  ;;  %v1148_v23 = vsel %vm6976_vm10, %v1130_v44, 0  ;;  %v8786_v51 = vshll.u32 %v6898_v62, 16 }
  0x6e   : > { %v529_v59 = vsel %vm513_vm11, %v505_v3, %v521_v6  ;;  %v8787_v48 = vshll.u32 %v6936_v42, 16  ;;  %6014 = vmatprep.mubr.msk.bf16.mxu1 %vm8788_vm1, %v1148_v23  ;;  %v1132_v34 = vshrl.u32 %v685_v58, 16  ;;  %v1135_v35 = vshll.u32 %v685_v58, 16  ;;  %vm8799_vm11 = vmmov %vm8782_vm0 }
  0x6f   : > { %v1429_v9 = vor.u32 %v1428_v24, %v8785_v19  ;;  %v1431_v15 = vor.u32 %v1430_v17, %v8786_v51  ;;  %v530_v4 = vsel %vm514_vm3, %v506_v5, %v522_v21  ;;  %v8791_v45 = vshrl.u32 %v6988_v50, 16  ;;  %vm8802_vm1 = vmmov %vm8782_vm0 }
  0x70   : > { %v1434_v39 = vor.u32 %v1433_v40, %v8787_v48  ;;  %v7240_v13 = vpack.c.bf16 %v530_v4, %v529_v59  ;;  %v1134_v20 = vrot.slane %v1132_v34, 7  ;;  %v8797_v19 = vshll.u32 %v6988_v50, 16 }
  0x71   : > { %v1443_v46 = vsel %vm7018_vm4, 0, %v1429_v9  ;;  %v1432_v3 = vsel %vm8790_vm8, %v1428_v24, %v1431_v15  ;;  %v1436_v6 = vrot.slane %v8791_v45, 7  ;;  %vm8794_vm4 = vmmov %vm8784_vm7 }
  0x72   : > { %8789 = vst [vmem:[#allocation26_spill] sm:$0xff] %v7240_v13  ;;  %v1444_v26 = vsel %vm6851_vm2, %v1443_v46, 0  ;;  %v1445_v38 = vsel %vm6906_vm14, %v1432_v3, 0  ;;  %6025 = vmatmul.mubr.msk.bf16.gmra.mxu0 %vm8792_vm9, %v7240_v13  ;;  %v1137_v5 = vor.u32 %v1135_v35, %v1134_v20  ;;  %v1435_v31 = vsel %vm8794_vm4, %v1430_v17, %v1434_v39  ;;  %vm8795_vm6 = vmmov %vm8794_vm4 }
  0x73   : > { %6040 = vmatprep.mubr.msk.bf16.mxu0 %vm8793_vm5, %v1444_v26  ;;  %v1446_v21 = vsel %vm6976_vm10, %v1435_v31, 0  ;;  %v1437_v9 = vor.u32 %v1436_v6, %v8797_v19  ;;  %vm8800_vm3 = vmmov %vm8794_vm4 }
  0x74   : > { %v1138_v44 = vsel %vm8795_vm6, %v1126_v0, %v1137_v5  ;;  %vm8801_vm7 = vmmov %vm8782_vm0 }
  0x75   : > { %v1149_v24 = vsel %vm7011_vm15, %v1138_v44, 0  ;;  %v1438_v0 = vsel %vm8800_vm3, %v1433_v40, %v1437_v9  ;;  %vm8803_vm8 = vmmov %vm8782_vm0  ;;  %v2501_v40 = vrot.slane %v7122_v8, 3 }
  0x76   : > { %6015 = vmatmul.mubr.msk.bf16.gmra.mxu1 %vm8796_vm13, %v1149_v24  ;;  %v1447_v17 = vsel %vm7011_vm15, %v1438_v0, 0  ;;  %vm8804_vm9 = vmmov %vm8782_vm0 }
  0x77   : > { %6030 = vmatprep.mubr.msk.bf16.mxu1 %vm8782_vm0, %v7050_v7  ;;  %vm8805_vm5 = vmmov %vm8782_vm0  ;;  %v7319_v7 = vld [vmem:[%s8582_s2 + $0x28] sm:$0xff]  }
  0x78   : > { %vm8806_vm4 = vmmov %vm8782_vm0  ;;  %8815 = vst [vmem:[#allocation29_spill] sm:$0xff] %v7319_v7 }
  0x79   : > { %vm8807_vm6 = vmmov %vm8782_vm0 }
  0x7a   : > { %6041 = vmatmul.mubr.msk.bf16.vlgmr.msra.gmra.mxu0 %vm8798_vm12, %v1445_v38  ;;  %vm8808_vm13 = vmmov %vm8782_vm0 }
  0x7b   : > { %6059 = vmatpush3.bf16.msra.mxu0 %v7180_v28  ;;  %6044 = vmatprep.mubr.msk.bf16.mxu0 %vm8799_vm11, %v1446_v21  ;;  %vm8809_vm12 = vmmov %vm8782_vm0 }
  0x7c   : > { %vm8810_vm11 = vmmov %vm8782_vm0 }
  0x7d   : > { %vm8811_vm3 = vmmov %vm8782_vm0 }
  0x7e   : > { %6031 = vmatmul.mubr.msk.bf16.vlgmr.msra.gmra.mxu1 %vm8801_vm7, %v7173_v41  ;;  %vm8812_vm7 = vcmask 1044480   ;;  %v7314_v41 = vld [vmem:[%s8582_s2 + $0x38] sm:$0xff]  }
  0x7f   : > { %6049 = vmatpush3.bf16.msra.mxu1 %v7202_v61  ;;  %6034 = vmatprep.mubr.msk.bf16.mxu1 %vm8802_vm1, %v7195_v53  ;;  %8814 = vst [vmem:[#allocation28_spill] sm:$0xff] %v7314_v41  ;;  %v8614_v61 = vrot.slane %v7130_v33, 3  ;;  %vm8816_vm1 = vmmov %vm8812_vm7 }
  0x82   : > { %6045 = vmatmul.mubr.msk.bf16.gmra.mxu0 %vm8803_vm8, %v1447_v17  ;;  %vm8818_vm8 = vmmov %vm8816_vm1 }
  0x83   : > { %6060 = vmatprep.mubr.msk.bf16.mxu0 %vm8804_vm9, %v6849_v36  ;;  %v6457_v36 = vld [vmem:[%s8582_s2] sm:$0xff]   ;;  %v7333_v59 = vsel %vm8818_vm8, %v2501_v40, %v8614_v61 }
  0x84   : > { %8819 = vst [vmem:[#allocation31_spill] sm:$0xff] %v7333_v59 }
  0x86   : > { %6035 = vmatmul.mubr.msk.bf16.gmra.mxu1 %vm8805_vm5, %v685_v58 }
  0x87   : > { %6050 = vmatprep.mubr.msk.bf16.mxu1 %vm8806_vm4, %v6776_v43  ;;  %v6455_v43 = vld [vmem:[%s8582_s2 + $0x8] sm:$0xff]  }
  0x88   : > { %6080 = vmatprep.subr.bf16.mxu0 %v6455_v43 }
  0x8a   : > { %6061 = vmatmul.mubr.msk.bf16.vlgmr.msra.gmra.mxu0 %vm8807_vm6, %v6898_v62  ;;  %v6458_v62 = vld [vmem:[%s8582_s2 + $0x10] sm:$0xff]  }
  0x8b   : > { %6064 = vmatprep.mubr.msk.bf16.mxu0 %vm8808_vm13, %v6936_v42  ;;  %6081 = vmatpush3.bf16.msra.mxu0 %v6455_v43 }
  0x8c   : > { %6082 = vmatprep.subr.bf16.mxu0 %v6457_v36 }
  0x8e   : > { %6051 = vmatmul.mubr.msk.bf16.vlgmr.msra.gmra.mxu1 %vm8782_vm0, %v6785_v55  ;;  %v6456_v55 = vld [vmem:[%s8582_s2 + $0x18] sm:$0xff]  }
  0x8f   : > { %6054 = vmatprep.mubr.msk.bf16.mxu1 %vm8809_vm12, %v6787_v56  ;;  %6083 = vmatpush3.bf16.msra.mxu0 %v6457_v36  ;;  %v8615_v56 = vrot.slane %v7096_v10, 3 }
  0x90   : > { %6068 = vmatprep.subr.bf16.mxu1 %v6456_v55  ;;  %6104 = vmatprep.subr.bf16.mxu0 %v7314_v41 }
  0x91   : > { %6069 = vmatpush3.bf16.msra.mxu1 %v6456_v55 }
  0x92   : > { %6065 = vmatmul.mubr.msk.bf16.gmra.mxu0 %vm8810_vm11, %v6988_v50  ;;  %6070 = vmatprep.subr.bf16.mxu1 %v6458_v62 }
  0x95   : > { %6071 = vmatpush3.bf16.msra.mxu1 %v6458_v62 }
  0x96   : > { %6055 = vmatmul.mubr.msk.bf16.gmra.mxu1 %vm8811_vm3, %v6827_v22  ;;  %v2499_v22 = vrot.slane %v7106_v29, 3  ;;  %6092 = vmatprep.subr.bf16.mxu1 %v7319_v7  ;;  %vm1890_vm3 = vcmask 261120  }
  0x98   : > { %v7309_v42 = vsel %vm8812_vm7, %v8615_v56, %v2499_v22  ;;  %v7328_v23 = vsel %vm8816_vm1, %v2499_v22, %v2501_v40  ;;  %vm8820_vm7 = vsmask.f32 4352  ;;  %vm8821_vm1 = vnez %v8732_v52 }
  0x99   : > { %8813 = vst [vmem:[#allocation27_spill] sm:$0xff] %v7309_v42  ;;  %8817 = vst [vmem:[#allocation30_spill] sm:$0xff] %v7328_v23 }
  0xed   : > { %v5982_v50 = vpop.f32.mrf.mxu0 }
  0xef   : > { %v887_v29 = vpop.f32.mrf.mxu0 }
  0xf1   : > { %v5983_v53 = vpop.f32.mrf.mxu0 }
  0xf2   : > { %v7323_v28 = vpop.f32.mrf.mxu1 }
  0xf3   : > { %v890_v51 = vpop.f32.mrf.mxu0 }
  0xf4   : > { %v903_v58 = vpop.f32.mrf.mxu1 }
  0xf6   : > { %v5987_v15 = vpop.f32.mrf.mxu1 }
  0xf8   : > { %v7335_v39 = vpop.f32.mrf.mxu1 }
  0xfe   : > { %v6002_v48 = vpop.f32.mrf.mxu0 }
 0x100   : > { %v1068_v34 = vpop.f32.mrf.mxu0 }
 0x102   : > { %v5992_v35 = vpop.f32.mrf.mxu1  ;;  %v6003_v4 = vpop.f32.mrf.mxu0 }
 0x103   : > { %v979_v59 = vadd.f32 %v5992_v35, %v5982_v50 }
 0x104   : > { %v970_v46 = vpop.f32.mrf.mxu1  ;;  %v1071_v26 = vpop.f32.mrf.mxu0 }
 0x105   : > { %v971_v2 = vadd.f32 %v970_v46, %v887_v29  ;;  %v1101_v60 = vadd.f32 %v6002_v48, %v979_v59 }
 0x106   : > { %v5993_v8 = vpop.f32.mrf.mxu1 }
 0x107   : > { %v982_v1 = vadd.f32 %v5993_v8, %v5983_v53  ;;  %v1099_v57 = vadd.f32 %v1068_v34, %v971_v2 }
 0x108   : > { %v973_v20 = vpop.f32.mrf.mxu1 }
 0x109   : > { %v974_v32 = vadd.f32 %v973_v20, %v890_v51  ;;  %v1102_v47 = vadd.f32 %v6003_v4, %v982_v1 }
 0x10b   : > { %v1100_v50 = vadd.f32 %v1071_v26, %v974_v32 }
 0x10c   : > { %v6006_v3 = vpop.f32.mrf.mxu0 }
 0x10e   : > { %v1084_v38 = vpop.f32.mrf.mxu0 }
 0x110   : > { %v6007_v6 = vpop.f32.mrf.mxu0 }
 0x112   : > { %v5996_v45 = vpop.f32.mrf.mxu1  ;;  %v7337_v31 = vpop.f32.mrf.mxu0 }
 0x113   : > { %v995_v29 = vadd.f32 %v5996_v45, %v7323_v28 }
 0x114   : > { %v986_v5 = vpop.f32.mrf.mxu1 }
 0x115   : > { %v987_v46 = vadd.f32 %v986_v5, %v903_v58 }
 0x116   : > { %v5997_v44 = vpop.f32.mrf.mxu1 }
 0x117   : > { %v998_v51 = vadd.f32 %v5997_v44, %v5987_v15  ;;  %v1103_v4 = vadd.f32 %v1084_v38, %v987_v46 }
 0x118   : > { %v989_v21 = vpop.f32.mrf.mxu1 }
 0x119   : > { %v1106_v45 = vadd.f32 %v6007_v6, %v998_v51 }
 0x124   : > { %v6022_v24 = vpop.f32.mrf.mxu0 }
 0x126   : > { %v1299_v19 = vpop.f32.mrf.mxu0 }
 0x128   : > { %v6023_v0 = vpop.f32.mrf.mxu0 }
 0x129   : > { %v6012_v9 = vpop.f32.mrf.mxu1 }
 0x12a   : > { %v1302_v43 = vpop.f32.mrf.mxu0  ;;  %v1238_v63 = vadd.f32 %v6012_v9, %v1101_v60  ;;  %v1105_v9 = vadd.f32 %v6006_v3, %v995_v29 }
 0x12b   : > { %v1205_v17 = vpop.f32.mrf.mxu1 }
 0x12c   : > { %v1236_v37 = vadd.f32 %v1205_v17, %v1099_v57  ;;  %v1332_v59 = vadd.f32 %v6022_v24, %v1238_v63  ;;  %v990_v57 = vadd.f32 %v989_v21, %v7335_v39 }
 0x12d   : > { %v6013_v36 = vpop.f32.mrf.mxu1 }
 0x12e   : > { %v1239_v53 = vadd.f32 %v6013_v36, %v1102_v47  ;;  %v1330_v60 = vadd.f32 %v1299_v19, %v1236_v37  ;;  %v1104_v37 = vadd.f32 %v7337_v31, %v990_v57 }
 0x12f   : > { %v1208_v22 = vpop.f32.mrf.mxu1 }
 0x130   : > { %v1237_v8 = vadd.f32 %v1208_v22, %v1100_v50  ;;  %v1333_v32 = vadd.f32 %v6023_v0, %v1239_v53  ;;  %v7369_v0 = vld [vmem:[%s8586_s6] ss:$0 sm:$0xff] }
 0x132   : > { %v7339_v55 = vpop.f32.mrf.mxu0  ;;  %v1331_v58 = vadd.f32 %v1302_v43, %v1237_v8 }
 0x134   : > { %v7341_v62 = vpop.f32.mrf.mxu0 }
 0x136   : > { %v7343_v40 = vpop.f32.mrf.mxu0  ;;  %v6016_v61 = vpop.f32.mrf.mxu1 }
 0x137   : > { %v1242_v63 = vadd.f32 %v6016_v61, %v1105_v9  ;;  %v7362_v61 = vld [vmem:[%s8585_s5] ss:$0 sm:$0xff] }
 0x138   : > { %v7345_v56 = vpop.f32.mrf.mxu0  ;;  %v1221_v13 = vpop.f32.mrf.mxu1 }
 0x139   : > { %v1240_v5 = vadd.f32 %v1221_v13, %v1103_v4  ;;  %v1336_v38 = vadd.f32 %v7339_v55, %v1242_v63 }
 0x13a   : > { %v6042_v16 = vpop.f32.mrf.mxu0  ;;  %v6017_v30 = vpop.f32.mrf.mxu1 }
 0x13c   : > { %v1503_v14 = vpop.f32.mrf.mxu0  ;;  %v1224_v33 = vpop.f32.mrf.mxu1 }
 0x13e   : > { %v6043_v23 = vpop.f32.mrf.mxu0  ;;  %v6032_v12 = vpop.f32.mrf.mxu1 }
 0x13f   : > { %v1422_v34 = vadd.f32 %v6032_v12, %v1332_v59  ;;  %v1243_v12 = vadd.f32 %v6017_v30, %v1106_v45 }
 0x140   : > { %v1506_v42 = vpop.f32.mrf.mxu0  ;;  %v1389_v7 = vpop.f32.mrf.mxu1 }
 0x141   : > { %v1420_v26 = vadd.f32 %v1389_v7, %v1330_v60  ;;  %v1536_v24 = vadd.f32 %v6042_v16, %v1422_v34  ;;  %v1241_v7 = vadd.f32 %v1224_v33, %v1104_v37 }
 0x142   : > { %v7347_v10 = vpop.f32.mrf.mxu0  ;;  %v6033_v27 = vpop.f32.mrf.mxu1 }
 0x143   : > { %v1423_v15 = vadd.f32 %v6033_v27, %v1333_v32  ;;  %v1534_v17 = vadd.f32 %v1503_v14, %v1420_v26  ;;  %v1334_v27 = vadd.f32 %v7341_v62, %v1240_v5 }
 0x144   : > { %v7349_v41 = vpop.f32.mrf.mxu0  ;;  %v1392_v54 = vpop.f32.mrf.mxu1 }
 0x145   : > { %v1421_v19 = vadd.f32 %v1392_v54, %v1331_v58  ;;  %v1537_v16 = vadd.f32 %v6043_v23, %v1423_v15  ;;  %v1337_v54 = vadd.f32 %v7343_v40, %v1243_v12  ;;  %v1335_v23 = vadd.f32 %v7345_v56, %v1241_v7 }
 0x146   : > { %v7351_v11 = vpop.f32.mrf.mxu0  ;;  %v6036_v35 = vpop.f32.mrf.mxu1 }
 0x147   : > { %v1535_v30 = vadd.f32 %v1506_v42, %v1421_v19  ;;  %v1426_v14 = vadd.f32 %v6036_v35, %v1336_v38 }
 0x148   : > { %v7354_v48 = vpop.f32.mrf.mxu0  ;;  %v1405_v2 = vpop.f32.mrf.mxu1 }
 0x149   : > { %v1424_v36 = vadd.f32 %v1405_v2, %v1334_v27  ;;  %v1540_v59 = vadd.f32 %v7347_v10, %v1426_v14 }
 0x14a   : > { %v6062_v20 = vpop.f32.mrf.mxu0  ;;  %v6037_v1 = vpop.f32.mrf.mxu1 }
 0x14b   : > { %v1427_v62 = vadd.f32 %v6037_v1, %v1337_v54  ;;  %v1538_v2 = vadd.f32 %v7349_v41, %v1424_v36 }
 0x14c   : > { %v1687_v28 = vpop.f32.mrf.mxu0  ;;  %v1408_v47 = vpop.f32.mrf.mxu1 }
 0x14d   : > { %v1425_v53 = vadd.f32 %v1408_v47, %v1335_v23  ;;  %v1541_v1 = vadd.f32 %v7351_v11, %v1427_v62  ;;  %v5513_v62 = vcombine.low %v6822_v18, %v6822_v18 }
 0x14e   : > { %v6063_v44 = vpop.f32.mrf.mxu0  ;;  %v6052_v3 = vpop.f32.mrf.mxu1 }
 0x14f   : > { %v1630_v39 = vadd.f32 %v6052_v3, %v1536_v24  ;;  %v1539_v10 = vadd.f32 %v7354_v48, %v1425_v53  ;;  %vm7406_vm8 = vcmp.ne.s16.totalorder %v5513_v62, 0 }
 0x150   : > { %v1690_v21 = vpop.f32.mrf.mxu0  ;;  %v1597_v13 = vpop.f32.mrf.mxu1 }
 0x151   : > { %v1720_v6 = vadd.f32 %v6062_v20, %v1630_v39  ;;  %v1628_v31 = vadd.f32 %v1597_v13, %v1534_v17 }
 0x152   : > { %v6053_v33 = vpop.f32.mrf.mxu1  ;;  %v6066_v43 = vpop.f32.mrf.mxu0 }
 0x153   : > { %v1737_v55 = vmul.f32 %v7362_v61, %v1720_v6  ;;  %v1718_v22 = vadd.f32 %v1687_v28, %v1628_v31  ;;  %v1631_v50 = vadd.f32 %v6053_v33, %v1537_v16 }
 0x154   : > { %v1600_v29 = vpop.f32.mrf.mxu1  ;;  %v1703_v8 = vpop.f32.mrf.mxu0 }
 0x155   : > { %v1752_v40 = vadd.f32 %v7369_v0, %v1737_v55  ;;  %v1735_v42 = vmul.f32 %v7362_v61, %v1718_v22  ;;  %v1721_v35 = vadd.f32 %v6063_v44, %v1631_v50  ;;  %v1629_v46 = vadd.f32 %v1600_v29, %v1535_v30 }
 0x156   : > { %v6056_v51 = vpop.f32.mrf.mxu1  ;;  %v6067_v45 = vpop.f32.mrf.mxu0 }
 0x157   : > { %v1768_v60 = vmul.f32 0.1, %v1752_v40  ;;  %v1738_v34 = vmul.f32 %v7362_v61, %v1721_v35  ;;  %vm1760_vm9 = vcmp.gt.f32.partialorder %v1752_v40, 0.0  ;;  %v1750_v56 = vadd.f32 %v7369_v0, %v1735_v42 }
 0x158   : > { %v1719_v20 = vadd.f32 %v1690_v21, %v1629_v46  ;;  %v1634_v9 = vadd.f32 %v6056_v51, %v1540_v59  ;;  %v1613_v57 = vpop.f32.mrf.mxu1  ;;  %v1706_v39 = vpop.f32.mrf.mxu0 }
 0x159   : > { %v1753_v4 = vadd.f32 %v7369_v0, %v1738_v34  ;;  %v1632_v28 = vadd.f32 %v1613_v57, %v1538_v2  ;;  %v1776_v58 = vsel %vm1760_vm9, %v1752_v40, %v1768_v60  ;;  %v1766_v5 = vmul.f32 0.1, %v1750_v56 }
 0x15a   : > { %v1736_v32 = vmul.f32 %v7362_v61, %v1719_v20  ;;  %v1724_v26 = vadd.f32 %v6066_v43, %v1634_v9  ;;  %v6057_v41 = vpop.f32.mrf.mxu1  ;;  %vm1758_vm4 = vcmp.gt.f32.partialorder %v1750_v56, 0.0 }
 0x15b   : > { %vm1761_vm5 = vcmp.gt.f32.partialorder %v1753_v4, 0.0  ;;  %v1769_v63 = vmul.f32 0.1, %v1753_v4  ;;  %v1635_v47 = vadd.f32 %v6057_v41, %v1541_v1  ;;  %v1722_v11 = vadd.f32 %v1703_v8, %v1632_v28 }
 0x15c   : > { %v1751_v24 = vadd.f32 %v7369_v0, %v1736_v32  ;;  %v1741_v15 = vmul.f32 %v7362_v61, %v1724_v26  ;;  %v1616_v44 = vpop.f32.mrf.mxu1  ;;  %v1774_v13 = vsel %vm1758_vm4, %v1750_v56, %v1766_v5  ;;  %v8827_v32 = vmov 0  ;;  %v6461_v26 = vld [vmem:[%s8582_s2 + $0x30] sm:$0xff]   ;;  %v8830_v5 = vld [vmem:[#allocation12_spill] sm:$0xff] }
 0x15d   : > { %v1777_v37 = vsel %vm1761_vm5, %v1753_v4, %v1769_v63  ;;  %v1725_v48 = vadd.f32 %v6067_v45, %v1635_v47  ;;  %v1633_v12 = vadd.f32 %v1616_v44, %v1539_v10  ;;  %v1739_v21 = vmul.f32 %v7362_v61, %v1722_v11 }
 0x15e   : > { %v1783_v19 = vpack.c.bf16 %v1777_v37, %v1776_v58  ;;  %vm1759_vm6 = vcmp.gt.f32.partialorder %v1751_v24, 0.0  ;;  %v1767_v3 = vmul.f32 0.1, %v1751_v24  ;;  %v1756_v17 = vadd.f32 %v7369_v0, %v1741_v15 }
 0x15f   : > { %v1742_v38 = vmul.f32 %v7362_v61, %v1725_v48  ;;  %v1723_v7 = vadd.f32 %v1706_v39, %v1633_v12  ;;  %v1754_v54 = vadd.f32 %v7369_v0, %v1739_v21  ;;  %v8832_v48 = vld [vmem:[#allocation28_spill] sm:$0xff]  ;;  %vm8646_vm5 = vsmask.f32 7424  ;;  %v7441_v39 = vld [vmem:[%s8582_s2 + $0x58] sm:$0xff]  }
 0x160   : > { %v1795_v27 = vshrl.u32 %v1783_v19, 16  ;;  %v1798_v16 = vshll.u32 %v1783_v19, 16  ;;  %v1775_v6 = vsel %vm1759_vm6, %v1751_v24, %v1767_v3  ;;  %v1772_v43 = vmul.f32 0.1, %v1756_v17  ;;  %v8831_v24 = vld [vmem:[#allocation10_spill] sm:$0xff]  ;;  %v8833_v19 = vld [vmem:[#allocation15_spill] sm:$0xff]  ;;  %vm8838_vm6 = vmmov %vm8820_vm7 }
 0x161   : > { %v1782_v31 = vpack.c.bf16 %v1775_v6, %v1774_v13  ;;  %v1757_v30 = vadd.f32 %v7369_v0, %v1742_v38  ;;  %v1740_v36 = vmul.f32 %v7362_v61, %v1723_v7  ;;  %vm1764_vm13 = vcmp.gt.f32.partialorder %v1756_v17, 0.0  ;;  %v8834_v3 = vld [vmem:[#allocation13_spill] sm:$0xff] }
 0x162   : > { %v1797_v14 = vrot.slane %v1795_v27, 3  ;;  %v1800_v33 = vrot.slane %v1798_v16, 4  ;;  %v1770_v50 = vmul.f32 0.1, %v1754_v54  ;;  %vm1762_vm12 = vcmp.gt.f32.partialorder %v1754_v54, 0.0 }
 0x163   : > { %v1787_v55 = vshrl.u32 %v1782_v31, 16  ;;  %v1790_v22 = vshll.u32 %v1782_v31, 16  ;;  %vm1765_vm0 = vcmp.gt.f32.partialorder %v1757_v30, 0.0  ;;  %v1773_v23 = vmul.f32 0.1, %v1757_v30 }
 0x164   : > { %v1755_v42 = vadd.f32 %v7369_v0, %v1740_v36  ;;  %v1801_v35 = vor.u32 %v1800_v33, %v1797_v14  ;;  %v1780_v46 = vsel %vm1764_vm13, %v1756_v17, %v1772_v43  ;;  %v5514_v61 = vcombine.low %v6832_v25, %v6876_v49  ;;  %vm8839_vm13 = vmmov %vm8838_vm6 }
 0x165   : > { %v1789_v29 = vrot.slane %v1787_v55, 3  ;;  %v1792_v40 = vrot.slane %v1790_v22, 4  ;;  %v1781_v59 = vsel %vm1765_vm0, %v1757_v30, %v1773_v23  ;;  %v1778_v2 = vsel %vm1762_vm12, %v1754_v54, %v1770_v50 }
 0x166   : > { %v1785_v53 = vpack.c.bf16 %v1781_v59, %v1780_v46  ;;  %vm1763_vm11 = vcmp.gt.f32.partialorder %v1755_v42, 0.0  ;;  %v1771_v51 = vmul.f32 0.1, %v1755_v42  ;;  %v8823_v49 = vmov 0 }
 0x167   : > { %v1793_v8 = vor.u32 %v1792_v40, %v1789_v29  ;;  %v8824_v49 = vsel %vm7406_vm8, 4294967295, %v8823_v49  ;;  %vm7414_vm9 = vcmp.ne.s16.totalorder %v5514_v61, 0  ;;  %v5515_v15 = vcombine.low %v8831_v24, %v8830_v5  ;;  %v8845_v40 = vld [vmem:[#allocation18_spill] sm:$0xff] }
 0x168   : > { %v1813_v60 = vshrl.u32 %v1785_v53, 16  ;;  %v1816_v34 = vshll.u32 %v1785_v53, 16  ;;  %v1779_v18 = vsel %vm1763_vm11, %v1755_v42, %v1771_v51  ;;  %8825 = vst [vmem:[#allocation32_spill] sm:$0xff] %v8824_v49  ;;  %v8828_v32 = vsel %vm7414_vm9, 4294967295, %v8827_v32  ;;  %v8851_v51 = vld [vmem:[#allocation20_spill] sm:$0xff] }
 0x169   : > { %v7397_v56 = vsel %vm8820_vm7, %v1793_v8, %v1801_v35  ;;  %v1784_v20 = vpack.c.bf16 %v1779_v18, %v1778_v2  ;;  %v7401_v0 = vsel %vm8821_vm1, 0, %v1793_v8  ;;  %8829 = vst [vmem:[#allocation33_spill] sm:$0xff] %v8828_v32  ;;  %v5516_v17 = vcombine.low %v8834_v3, %v8833_v19  ;;  %v6462_v2 = vld [vmem:[%s8582_s2 + $0x20] sm:$0xff]  }
 0x16a   : > { %v1829_v25 = vsel %vm6906_vm14, %v7397_v56, 0  ;;  %v1815_v57 = vrot.slane %v1813_v60, 3  ;;  %v1828_v4 = vsel %vm6851_vm2, %v7401_v0, 0  ;;  %v1850_v10 = vshll.u32 %v7397_v56, 16 }
 0x16b   : > { %v1818_v28 = vrot.slane %v1816_v34, 4  ;;  %v1804_v41 = vshrl.u32 %v1784_v20, 16  ;;  %v1807_v45 = vshll.u32 %v1784_v20, 16  ;;  %6084 = vmatprep.mubr.msk.bf16.mxu0 %vm1890_vm3, %v1828_v4  ;;  %v1845_v58 = vshll.u32 %v7401_v0, 16  ;;  %v8852_v4 = vld [vmem:[#allocation16_spill] sm:$0xff] }
 0x16c   : > { %6085 = vmatmul.mubr.msk.bf16.vlgmr.msra.gmra.mxu0 %vm1890_vm3, %v1829_v25  ;;  %v1843_v63 = vshrl.u32 %v7401_v0, 16  ;;  %v2253_v47 = vsel %vm7406_vm8, %v7401_v0, 0  ;;  %v2254_v12 = vsel %vm7414_vm9, %v7397_v56, 0  ;;  %v1852_v13 = vrot.slane %v1850_v10, 1 }
 0x16d   : > { %v1806_v11 = vrot.slane %v1804_v41, 3  ;;  %v1809_v44 = vrot.slane %v1807_v45, 4  ;;  %v1847_v37 = vrot.slane %v1845_v58, 1  ;;  %6105 = vmatpush3.bf16.msra.mxu0 %v8832_v48  ;;  %v1819_v21 = vor.u32 %v1818_v28, %v1815_v57  ;;  %v8853_v28 = vld [vmem:[#allocation29_spill] sm:$0xff]  ;;  %v6465_v48 = vld [vmem:[%s8582_s2 + $0x50] sm:$0xff]  }
 0x16e   : > { %6106 = vmatprep.subr.bf16.mxu0 %v6461_v26  ;;  %v2268_v27 = vrot.slane %v2253_v47, 4  ;;  %v2269_v16 = vrot.slane %v2254_v12, 4  ;;  %vm7447_vm4 = vcmp.ne.s16.totalorder %v5515_v15, 0  ;;  %v8835_v6 = vmov 0 }
 0x16f   : > { %v1810_v38 = vor.u32 %v1809_v44, %v1806_v11  ;;  %v1848_v7 = vor.u32 %v1847_v37, %v1843_v63  ;;  %v8836_v6 = vsel %vm7447_vm4, 4294967295, %v8835_v6  ;;  %v1854_v54 = vshrl.u32 %v7397_v56, 16  ;;  %v8858_v44 = vld [vmem:[#allocation27_spill] sm:$0xff]  ;;  %v6464_v37 = vld [vmem:[%s8582_s2 + $0x48] sm:$0xff]  }
 0x170   : > { %8837 = vst [vmem:[#allocation12_spill] sm:$0xff] %v8836_v6  ;;  %vm7467_vm0 = vcmp.ne.s16.totalorder %v5516_v17, 0  ;;  %v8842_v50 = vmov 0  ;;  %v7474_v23 = vsel %vm8821_vm1, %v1819_v21, 0  ;;  %v8846_v42 = vrot.slane %v8845_v40, 7 }
 0x171   : > { %v1853_v31 = vsel %vm8646_vm5, %v1848_v7, %v1852_v13  ;;  %v7454_v30 = vsel %vm8838_vm6, %v1801_v35, %v1810_v38  ;;  %v7457_v14 = vsel %vm8839_vm13, %v1810_v38, %v1819_v21  ;;  %6107 = vmatpush3.bf16.msra.mxu0 %v6461_v26  ;;  %v8843_v50 = vsel %vm7467_vm0, 4294967295, %v8842_v50  ;;  %v8862_v21 = vld [vmem:[#allocation21_spill] sm:$0xff] }
 0x172   : > { %6072 = vmatprep.mubr.msk.bf16.mxu1 %vm1890_vm3, %v1853_v31  ;;  %v1830_v43 = vsel %vm6976_vm10, %v7454_v30, 0  ;;  %v1831_v55 = vsel %vm7011_vm15, %v7457_v14, 0  ;;  %v1858_v22 = vshll.u32 %v7454_v30, 16  ;;  %8844 = vst [vmem:[#allocation10_spill] sm:$0xff] %v8843_v50  ;;  %6128 = vmatprep.subr.bf16.mxu0 %v7441_v39  ;;  %v1856_v62 = vor.u32 %v1854_v54, %v1852_v13 }
 0x173   : > { %6088 = vmatprep.mubr.msk.bf16.mxu0 %vm1890_vm3, %v1830_v43  ;;  %v1866_v29 = vshll.u32 %v7457_v14, 16  ;;  %vm7482_vm12 = vcmp.ne.s16.totalorder %v8846_v42, 0  ;;  %v8847_v35 = vmov 0  ;;  %vm8850_vm11 = vcmask 1043456  }
 0x174   : > { %v8848_v35 = vsel %vm7482_vm12, 4294967295, %v8847_v35  ;;  %6089 = vmatmul.mubr.msk.bf16.gmra.mxu0 %vm1890_vm3, %v1831_v55  ;;  %v2270_v46 = vsel %vm8850_vm11, %v2268_v27, %v2269_v16  ;;  %v1860_v59 = vrot.slane %v1858_v22, 1  ;;  %v1862_v61 = vshrl.u32 %v7454_v30, 16  ;;  %vm8863_vm13 = vmmov %vm8850_vm11 }
 0x175   : > { %8849 = vst [vmem:[#allocation28_spill] sm:$0xff] %v8848_v35  ;;  %v2255_v53 = vsel %vm7447_vm4, %v7454_v30, 0  ;;  %vm8645_vm7 = vcmp.ne.s16.totalorder %v8851_v51, 0  ;;  %6108 = vmatprep.mubr.msk.bf16.mxu0 %vm1890_vm3, %v2270_v46  ;;  %v2256_v8 = vsel %vm7467_vm0, %v7457_v14, 0  ;;  %v1868_v18 = vrot.slane %v1866_v29, 1 }
 0x176   : > { %v7503_v60 = vsel %vm8646_vm5, %v1856_v62, %v1860_v59  ;;  %v1864_v34 = vor.u32 %v1862_v61, %v1860_v59  ;;  %v2271_v20 = vrot.slane %v2255_v53, 4  ;;  %v1874_v25 = vshll.u32 %v7474_v23, 16  ;;  %v8868_v59 = vld [vmem:[#allocation30_spill] sm:$0xff] }
 0x177   : > { %6073 = vmatmul.mubr.msk.bf16.vlgmr.msra.gmra.mxu1 %vm1890_vm3, %v7503_v60  ;;  %v2121_v57 = vsel %vm7482_vm12, %v7401_v0, 0  ;;  %v5517_v26 = vcombine.low %v8852_v4, %v8852_v4  ;;  %v2273_v45 = vrot.slane %v2256_v8, 4  ;;  %v1870_v47 = vshrl.u32 %v7457_v14, 16 }
 0x178   : > { %6093 = vmatpush3.bf16.msra.mxu1 %v8853_v28  ;;  %v7519_v41 = vsel %vm8646_vm5, %v1864_v34, %v1868_v18  ;;  %v2122_v5 = vsel %vm8645_vm7, %v7397_v56, 0  ;;  %v8854_v15 = vrot.slane %v8845_v40, 3  ;;  %v8855_v11 = vmov 0  ;;  %v8869_v34 = vld [vmem:[#allocation31_spill] sm:$0xff] }
 0x179   : > { %6076 = vmatprep.mubr.msk.bf16.mxu1 %vm1890_vm3, %v7519_v41  ;;  %6094 = vmatprep.subr.bf16.mxu1 %v6462_v2  ;;  %v1872_v24 = vor.u32 %v1870_v47, %v1868_v18  ;;  %v2272_v12 = vsel %vm8850_vm11, %v2269_v16, %v2271_v20  ;;  %v2137_v19 = vrot.slane %v2121_v57, 1  ;;  %v2138_v3 = vrot.slane %v2122_v5, 1  ;;  %v8865_v16 = vld [vmem:[#allocation22_spill] sm:$0xff] }
 0x17a   : > { %vm7531_vm6 = vcmp.ne.s16.totalorder %v8854_v15, 0  ;;  %vm7543_vm7 = vcmp.ne.s16.totalorder %v5517_v26, 0  ;;  %v8859_v17 = vmov 0  ;;  %v2274_v38 = vsel %vm8863_vm13, %v2271_v20, %v2273_v45  ;;  %v6466_v26 = vld [vmem:[%s8582_s2 + $0x40] sm:$0xff]  }
 0x17b   : > { %v8856_v11 = vsel %vm7531_vm6, 4294967295, %v8855_v11  ;;  %v8860_v17 = vsel %vm7543_vm7, 4294967295, %v8859_v17  ;;  %v7552_v7 = vrot.slane %v1874_v25, 1  ;;  %vm8651_vm0 = vcmask 1046528  }
 0x17c   : > { %8857 = vst [vmem:[#allocation15_spill] sm:$0xff] %v8856_v11  ;;  %8861 = vst [vmem:[#allocation13_spill] sm:$0xff] %v8860_v17  ;;  %6109 = vmatmul.mubr.msk.bf16.vlgmr.msra.gmra.mxu0 %vm1890_vm3, %v2272_v12  ;;  %6095 = vmatpush3.bf16.msra.mxu1 %v6462_v2  ;;  %v2510_v13 = vsel %vm7531_vm6, %v7401_v0, 0  ;;  %vm8864_vm11 = vcmp.ne.s16.totalorder %v8858_v44, 0  ;;  %vm8658_vm13 = vcmp.ne.s16.totalorder %v8865_v16, 0  ;;  %v2257_v43 = vsel %vm7543_vm7, %v7474_v23, 0 }
 0x17d   : > { %6112 = vmatprep.mubr.msk.bf16.mxu0 %vm1890_vm3, %v2274_v38  ;;  %6129 = vmatpush3.bf16.msra.mxu0 %v7441_v39  ;;  %v2511_v27 = vsel %vm8864_vm11, %v7397_v56, 0  ;;  %vm8866_vm5 = vsmask.f32 7424  ;;  %v6467_v39 = vld [vmem:[%s8582_s2 + $0x78] sm:$0xff]   ;;  %v2139_v55 = vsel %vm8651_vm0, %v2137_v19, %v2138_v3  ;;  %vm8867_vm11 = vcmp.ne.s16.totalorder %v8862_v21, 0  ;;  %v6468_v0 = vld [vmem:[%s8582_s2 + $0x68] sm:$0xff]  }
 0x17e   : > { %v7565_v31 = vsel %vm8866_vm5, %v1872_v24, %v7552_v7  ;;  %6116 = vmatprep.subr.bf16.mxu1 %v6464_v37  ;;  %6130 = vmatprep.subr.bf16.mxu0 %v6465_v48  ;;  %v2123_v62 = vsel %vm8867_vm11, %v7454_v30, 0  ;;  %v2124_v40 = vsel %vm8658_vm13, %v7457_v14, 0  ;;  %v2526_v42 = vrot.slane %v2510_v13, 5  ;;  %v8873_v24 = vld [vmem:[#allocation19_spill] sm:$0xff] }
 0x17f   : > { %6077 = vmatmul.mubr.msk.bf16.gmra.mxu1 %vm1890_vm3, %v7565_v31  ;;  %v2527_v46 = vrot.slane %v2511_v27, 5  ;;  %vm8654_vm5 = vcmp.ne.s16.totalorder %v8868_v59, 0  ;;  %v2275_v53 = vrot.slane %v2257_v43, 4  ;;  %vm8657_vm7 = vcmask 1042432  }
 0x180   : > { %6096 = vmatprep.mubr.msk.bf16.mxu1 %vm1890_vm3, %v2139_v55  ;;  %v2140_v8 = vrot.slane %v2123_v62, 1  ;;  %v2142_v2 = vrot.slane %v2124_v40, 1  ;;  %vm8655_vm0 = vcmp.ne.s16.totalorder %v8869_v34, 0  ;;  %vm8870_vm6 = vcmask 1043456  }
 0x181   : > { %6131 = vmatpush3.bf16.msra.mxu0 %v6465_v48  ;;  %v2276_v18 = vsel %vm8870_vm6, %v2273_v45, %v2275_v53  ;;  %v2512_v20 = vsel %vm8654_vm5, %v7454_v30, 0  ;;  %v2528_v57 = vsel %vm8657_vm7, %v2526_v42, %v2527_v46  ;;  %v2513_v4 = vsel %vm8655_vm0, %v7457_v14, 0 }
 0x182   : > { %6152 = vmatprep.subr.bf16.mxu0 %v6467_v39  ;;  %vm8871_vm11 = vcmask 1046528   ;;  %v2529_v5 = vrot.slane %v2512_v20, 5  ;;  %v8874_v15 = vrot.slane %v8873_v24, 7  ;;  %v8875_v48 = vmov 0 }
 0x183   : > { %v2141_v28 = vsel %vm8871_vm11, %v2138_v3, %v2140_v8  ;;  %vm8872_vm6 = vmmov %vm8871_vm11  ;;  %v2380_v12 = vrot.slane %v1843_v63, 4  ;;  %v2381_v19 = vrot.slane %v1845_v58, 5  ;;  %v2383_v3 = vrot.slane %v1854_v54, 4  ;;  %v6469_v58 = vld [vmem:[%s8582_s2 + $0x70] sm:$0xff]  }
 0x184   : > { %6113 = vmatmul.mubr.msk.bf16.gmra.mxu0 %vm1890_vm3, %v2276_v18  ;;  %v2143_v45 = vsel %vm8872_vm6, %v2140_v8, %v2142_v2  ;;  %vm7602_vm5 = vcmp.ne.s16.totalorder %v8874_v15, 0  ;;  %v2384_v38 = vrot.slane %v1850_v10, 5  ;;  %v2531_v13 = vrot.slane %v2513_v4, 5  ;;  %v6472_v8 = vld [vmem:[%s8587_s7] sm:$0xff]  }
 0x185   : > { %6132 = vmatprep.mubr.msk.bf16.mxu0 %vm1890_vm3, %v2528_v57  ;;  %v8876_v48 = vsel %vm7602_vm5, 4294967295, %v8875_v48  ;;  %v2125_v27 = vsel %vm7602_vm5, %v7474_v23, 0  ;;  %v2530_v63 = vsel %vm8657_vm7, %v2527_v46, %v2529_v5  ;;  %v2382_v10 = vor.u32 %v2381_v19, %v2380_v12  ;;  %v6473_v19 = vld [vmem:[%s8582_s2 + $0x80] sm:$0xff]  }
 0x186   : > { %8877 = vst [vmem:[#allocation18_spill] sm:$0xff] %v8876_v48  ;;  %v2385_v54 = vor.u32 %v2384_v38, %v2383_v3  ;;  %v8879_v43 = vmov 0  ;;  %v2532_v55 = vsel %vm8657_vm7, %v2529_v5, %v2531_v13  ;;  %v2144_v62 = vrot.slane %v2125_v27, 1  ;;  %v8886_v3 = vld [vmem:[#allocation23_spill] sm:$0xff] }
 0x187   : > { %6097 = vmatmul.mubr.msk.bf16.vlgmr.msra.gmra.mxu1 %vm1890_vm3, %v2141_v28  ;;  %vm8656_vm6 = vsmask.f32 3328  ;;  %v2387_v40 = vrot.slane %v1862_v61, 4  ;;  %vm8882_vm0 = vcmask 1046528   ;;  %v2388_v53 = vrot.slane %v1858_v22, 5 }
 0x188   : > { %6117 = vmatpush3.bf16.msra.mxu1 %v6464_v37  ;;  %6100 = vmatprep.mubr.msk.bf16.mxu1 %vm1890_vm3, %v2143_v45  ;;  %v8878_v37 = vrot.slane %v8873_v24, 3  ;;  %v2145_v42 = vsel %vm8882_vm0, %v2142_v2, %v2144_v62  ;;  %v2391_v61 = vrot.slane %v1870_v47, 4  ;;  %v2392_v2 = vrot.slane %v1866_v29, 5  ;;  %v6470_v29 = vld [vmem:[%s8582_s2 + $0x60] sm:$0xff]   ;;  %v8895_v62 = vld [vmem:[#allocation26_spill] sm:$0xff] }
 0x189   : > { %6118 = vmatprep.subr.bf16.mxu1 %v6466_v26  ;;  %v2389_v22 = vor.u32 %v2388_v53, %v2387_v40  ;;  %v2395_v4 = vshrl.u32 %v7474_v23, 16  ;;  %v2398_v45 = vrot.slane %v1874_v25, 5  ;;  %v2632_v25 = vsel %vm6851_vm2, %v7397_v56, 0  ;;  %v6475_v53 = vld [vmem:[%s8588_s8 + $0x18] sm:$0xff]  }
 0x18a   : > { %vm7628_vm11 = vcmp.ne.s16.totalorder %v8878_v37, 0  ;;  %v2393_v57 = vor.u32 %v2392_v2, %v2391_v61  ;;  %vm8885_vm0 = vsmask.f32 7424  ;;  %v2634_v38 = vsel %vm6976_vm10, %v7457_v14, 0  ;;  %v7746_v61 = vld [vmem:[%s8588_s8 + $0x38] sm:$0xff]   ;;  %v7751_v2 = vld [vmem:[%s8588_s8 + $0x28] sm:$0xff]  }
 0x18b   : > { %v8880_v43 = vsel %vm7628_vm11, 4294967295, %v8879_v43  ;;  %v2514_v46 = vsel %vm7628_vm11, %v7474_v23, 0  ;;  %v2390_v47 = vsel %vm8656_vm6, %v2385_v54, %v2389_v22  ;;  %v2397_v28 = vrot.slane %v2395_v4, 4  ;;  %8898 = vst [vmem:[#allocation19_spill] sm:$0xff] %v7746_v61  ;;  %8899 = vst [vmem:[#allocation23_spill] sm:$0xff] %v7751_v2 }
 0x18c   : > { %8881 = vst [vmem:[#allocation16_spill] sm:$0xff] %v8880_v43  ;;  %6133 = vmatmul.mubr.msk.bf16.vlgmr.msra.gmra.mxu0 %vm1890_vm3, %v2530_v63  ;;  %6119 = vmatpush3.bf16.msra.mxu1 %v6466_v26  ;;  %v2533_v18 = vrot.slane %v2514_v46, 5  ;;  %v2394_v26 = vsel %vm8656_vm6, %v2389_v22, %v2393_v57  ;;  %v2743_v15 = vor.u32 %v2395_v4, %v7552_v7  ;;  %v2633_v7 = vsel %vm6906_vm14, %v7454_v30, 0 }
 0x18d   : > { %6136 = vmatprep.mubr.msk.bf16.mxu0 %vm1890_vm3, %v2532_v55  ;;  %6153 = vmatpush3.bf16.msra.mxu0 %v6467_v39  ;;  %v2386_v39 = vsel %vm8656_vm6, %v2382_v10, %v2385_v54  ;;  %v2399_v5 = vor.u32 %v2398_v45, %v2397_v28  ;;  %v2836_v27 = vsel %vm7482_vm12, %v7397_v56, 0  ;;  %v8890_v10 = vld [vmem:[#allocation25_spill] sm:$0xff]  ;;  %v2635_v54 = vsel %vm7011_vm15, %v7474_v23, 0 }
 0x18e   : > { %6140 = vmatprep.subr.bf16.mxu1 %v6468_v0  ;;  %6154 = vmatprep.subr.bf16.mxu0 %v6469_v58  ;;  %v2534_v20 = vsel %vm8657_vm7, %v2531_v13, %v2533_v18  ;;  %v2850_v63 = vrot.slane %v2836_v27, 1  ;;  %vm8893_vm13 = vcmp.ne.s16.totalorder %v8862_v21, 0 }
 0x18f   : > { %6101 = vmatmul.mubr.msk.bf16.gmra.mxu1 %vm1890_vm3, %v2145_v42  ;;  %v2400_v24 = vsel %vm8656_vm6, %v2393_v57, %v2399_v5  ;;  %vm8887_vm6 = vcmask 130048   ;;  %v2838_v56 = vsel %vm8893_vm13, %v7457_v14, 0 }
 0x190   : > { %6120 = vmatprep.mubr.msk.bf16.mxu1 %vm1890_vm3, %v2386_v39  ;;  %vm8891_vm7 = vmmov %vm8887_vm6  ;;  %v2853_v37 = vrot.slane %v2838_v56, 1  ;;  %v6477_v39 = vld [vmem:[%s8588_s8 + $0x10] sm:$0xff]  }
 0x191   : > { %6155 = vmatpush3.bf16.msra.mxu0 %v6469_v58  ;;  %v8889_v58 = vld [vmem:[#allocation24_spill] sm:$0xff] }
 0x192   : > { %6176 = vmatprep.subr.bf16.mxu0 %v6472_v8 }
 0x194   : > { %6137 = vmatmul.mubr.msk.bf16.gmra.mxu0 %vm1890_vm3, %v2534_v20 }
 0x195   : > { %6156 = vmatprep.mubr.msk.bf16.mxu0 %vm1890_vm3, %v7503_v60  ;;  %v6471_v60 = vld [vmem:[%s8582_s2 + $0x88] sm:$0xff]  }
 0x197   : > { %6121 = vmatmul.mubr.msk.bf16.vlgmr.msra.gmra.mxu1 %vm1890_vm3, %v2390_v47 }
 0x198   : > { %6141 = vmatpush3.bf16.msra.mxu1 %v6468_v0  ;;  %6124 = vmatprep.mubr.msk.bf16.mxu1 %vm1890_vm3, %v2394_v26 }
 0x199   : > { %6142 = vmatprep.subr.bf16.mxu1 %v6470_v29 }
 0x19c   : > { %6157 = vmatmul.mubr.msk.bf16.vlgmr.msra.gmra.mxu0 %vm1890_vm3, %v7519_v41  ;;  %6143 = vmatpush3.bf16.msra.mxu1 %v6470_v29  ;;  %v8883_v41 = vmov 0  }
 0x19d   : > { %6160 = vmatprep.mubr.msk.bf16.mxu0 %vm1890_vm3, %v7565_v31  ;;  %6164 = vmatprep.subr.bf16.mxu1 %v6471_v60  ;;  %v7682_v12 = vrot.slane %v8883_v41, 1 }
 0x19e   : > { %6177 = vmatpush3.bf16.msra.mxu0 %v6472_v8  ;;  %v6476_v8 = vld [vmem:[%s8588_s8] sm:$0xff]  }
 0x19f   : > { %6125 = vmatmul.mubr.msk.bf16.gmra.mxu1 %vm1890_vm3, %v2400_v24  ;;  %8884 = vst [vmem:[#allocation29_spill] sm:$0xff] %v7682_v12  ;;  %v2747_v31 = vsel %vm8885_vm0, %v2743_v15, %v7682_v12  ;;  %vm8888_vm0 = vcmp.ne.s16.totalorder %v8851_v51, 0 }
 0x1a0   : > { %6144 = vmatprep.mubr.msk.bf16.mxu1 %vm1890_vm3, %v2632_v25  ;;  %v2837_v13 = vsel %vm8888_vm0, %v7454_v30, 0  ;;  %vm8892_vm0 = vcmask 1046528  }
 0x1a1   : > { %v2851_v0 = vrot.slane %v2837_v13, 1  ;;  %vm8896_vm11 = vmmov %vm8892_vm0 }
 0x1a2   : > { %vm8897_vm13 = vmmov %vm8892_vm0 }
 0x1a3   : > { %v2852_v30 = vsel %vm8892_vm0, %v2850_v63, %v2851_v0  ;;  %v2854_v42 = vsel %vm8896_vm11, %v2851_v0, %v2853_v37 }
 0x1a4   : > { %6161 = vmatmul.mubr.msk.bf16.gmra.mxu0 %vm1890_vm3, %v2747_v31 }
 0x1a5   : > { %6178 = vmatprep.mubr.msk.bf16.mxu0 %vm8887_vm6, %v8886_v3 }
 0x1a7   : > { %6145 = vmatmul.mubr.msk.bf16.vlgmr.msra.gmra.mxu1 %vm1890_vm3, %v2633_v7 }
 0x1a8   : > { %6165 = vmatpush3.bf16.msra.mxu1 %v6471_v60  ;;  %6148 = vmatprep.mubr.msk.bf16.mxu1 %vm1890_vm3, %v2634_v38 }
 0x1a9   : > { %6166 = vmatprep.subr.bf16.mxu1 %v6473_v19 }
 0x1ac   : > { %6167 = vmatpush3.bf16.msra.mxu1 %v6473_v19  ;;  %6179 = vmatmul.mubr.msk.bf16.vlgmr.msra.gmra.mxu0 %vm8887_vm6, %v8889_v58  ;;  %vm8894_vm6 = vcmp.ne.s16.totalorder %v8865_v16, 0 }
 0x1ad   : > { %6182 = vmatprep.mubr.msk.bf16.mxu0 %vm8891_vm7, %v8890_v10  ;;  %v2839_v55 = vsel %vm8894_vm6, %v7474_v23, 0  ;;  %v6474_v23 = vld [vmem:[%s8588_s8 + $0x8] sm:$0xff]   ;;  %6186 = vmatprep.subr.bf16.mxu1 %v6475_v53 }
 0x1ae   : > { %v2855_v40 = vrot.slane %v2839_v55, 1  ;;  %6198 = vmatprep.subr.bf16.mxu0 %v6474_v23 }
 0x1af   : > { %6149 = vmatmul.mubr.msk.bf16.gmra.mxu1 %vm1890_vm3, %v2635_v54  ;;  %6199 = vmatpush3.bf16.msra.mxu0 %v6474_v23 }
 0x1b0   : > { %6168 = vmatprep.mubr.msk.bf16.mxu1 %vm1890_vm3, %v2852_v30  ;;  %v2856_v46 = vsel %vm8892_vm0, %v2853_v37, %v2855_v40  ;;  %v2858_v14 = vsel %vm8897_vm13, %v2855_v40, %v7682_v12  ;;  %6200 = vmatprep.subr.bf16.mxu0 %v6476_v8 }
 0x1b3   : > { %6201 = vmatpush3.bf16.msra.mxu0 %v6476_v8 }
 0x1b4   : > { %6183 = vmatmul.mubr.msk.bf16.gmra.mxu0 %vm8891_vm7, %v8895_v62  ;;  %6222 = vmatprep.subr.bf16.mxu0 %v7746_v61 }
 0x1b7   : > { %6169 = vmatmul.mubr.msk.bf16.vlgmr.msra.gmra.mxu1 %vm1890_vm3, %v2854_v42 }
 0x1b8   : > { %6172 = vmatprep.mubr.msk.bf16.mxu1 %vm1890_vm3, %v2856_v46  ;;  %6187 = vmatpush3.bf16.msra.mxu1 %v6475_v53 }
 0x1b9   : > { %6188 = vmatprep.subr.bf16.mxu1 %v6477_v39 }
 0x1bc   : > { %6189 = vmatpush3.bf16.msra.mxu1 %v6477_v39 }
 0x1bd   : > { %6210 = vmatprep.subr.bf16.mxu1 %v7751_v2 }
 0x1bf   : > { %6173 = vmatmul.mubr.msk.bf16.gmra.mxu1 %vm1890_vm3, %v2858_v14 }
 0x22c   : > { %v6086_v18 = vpop.f32.mrf.mxu0 }
 0x22e   : > { %v2026_v22 = vpop.f32.mrf.mxu0 }
 0x230   : > { %v6087_v20 = vpop.f32.mrf.mxu0 }
 0x232   : > { %v2029_v57 = vpop.f32.mrf.mxu0 }
 0x234   : > { %v7755_v4 = vpop.f32.mrf.mxu0 }
 0x236   : > { %v7757_v29 = vpop.f32.mrf.mxu0 }
 0x237   : > { %v6074_v47 = vpop.f32.mrf.mxu1 }
 0x238   : > { %v7759_v26 = vpop.f32.mrf.mxu0  ;;  %v2035_v51 = vadd.f32 %v6086_v18, %v6074_v47 }
 0x239   : > { %v1937_v28 = vpop.f32.mrf.mxu1 }
 0x23a   : > { %v7761_v45 = vpop.f32.mrf.mxu0  ;;  %v2027_v50 = vadd.f32 %v2026_v22, %v1937_v28 }
 0x23b   : > { %v6075_v60 = vpop.f32.mrf.mxu1 }
 0x23c   : > { %v6110_v5 = vpop.f32.mrf.mxu0  ;;  %v2038_v32 = vadd.f32 %v6087_v20, %v6075_v60 }
 0x23d   : > { %v1940_v24 = vpop.f32.mrf.mxu1 }
 0x23e   : > { %v2335_v25 = vpop.f32.mrf.mxu0  ;;  %v2030_v1 = vadd.f32 %v2029_v57, %v1940_v24 }
 0x23f   : > { %v6078_v15 = vpop.f32.mrf.mxu1 }
 0x240   : > { %v6111_v41 = vpop.f32.mrf.mxu0 }
 0x241   : > { %v1953_v31 = vpop.f32.mrf.mxu1 }
 0x242   : > { %v2338_v19 = vpop.f32.mrf.mxu0  ;;  %v2043_v28 = vadd.f32 %v7757_v29, %v1953_v31 }
 0x243   : > { %v6079_v3 = vpop.f32.mrf.mxu1 }
 0x244   : > { %v7763_v7 = vpop.f32.mrf.mxu0  ;;  %v2054_v60 = vadd.f32 %v7759_v26, %v6079_v3 }
 0x245   : > { %v7765_v38 = vpop.f32.mrf.mxu1 }
 0x246   : > { %v7767_v13 = vpop.f32.mrf.mxu0 }
 0x247   : > { %v6098_v27 = vpop.f32.mrf.mxu1 }
 0x248   : > { %v7769_v0 = vpop.f32.mrf.mxu0  ;;  %v2237_v6 = vadd.f32 %v6098_v27, %v2035_v51  ;;  %v2051_v51 = vadd.f32 %v7755_v4, %v6078_v15 }
 0x249   : > { %v2204_v58 = vpop.f32.mrf.mxu1 }
 0x24a   : > { %v7771_v63 = vpop.f32.mrf.mxu0  ;;  %v2235_v61 = vadd.f32 %v2204_v58, %v2027_v50 }
 0x24b   : > { %v6099_v10 = vpop.f32.mrf.mxu1 }
 0x24c   : > { %v6134_v54 = vpop.f32.mrf.mxu0  ;;  %v2238_v52 = vadd.f32 %v6099_v10, %v2038_v32 }
 0x24d   : > { %v2207_v30 = vpop.f32.mrf.mxu1 }
 0x24e   : > { %v2593_v56 = vpop.f32.mrf.mxu0  ;;  %v2369_v50 = vadd.f32 %v6111_v41, %v2238_v52 }
 0x24f   : > { %v6102_v37 = vpop.f32.mrf.mxu1 }
 0x250   : > { %v7773_v55 = vpop.f32.mrf.mxu0  ;;  %v2241_v57 = vadd.f32 %v6102_v37, %v2051_v51 }
 0x251   : > { %v2220_v62 = vpop.f32.mrf.mxu1 }
 0x252   : > { %v7775_v40 = vpop.f32.mrf.mxu0  ;;  %v2372_v52 = vadd.f32 %v7763_v7, %v2241_v57 }
 0x253   : > { %v6103_v42 = vpop.f32.mrf.mxu1 }
 0x254   : > { %v7777_v46 = vpop.f32.mrf.mxu0 }
 0x255   : > { %v2223_v14 = vpop.f32.mrf.mxu1 }
 0x256   : > { %v7779_v23 = vpop.f32.mrf.mxu0 }
 0x257   : > { %v6122_v53 = vpop.f32.mrf.mxu1 }
 0x258   : > { %v7781_v8 = vpop.f32.mrf.mxu0 }
 0x259   : > { %8900 = vst [vmem:[#allocation24_spill] sm:$0xff] %v7781_v8  ;;  %v2459_v39 = vpop.f32.mrf.mxu1 }
 0x25a   : > { %v7783_v12 = vpop.f32.mrf.mxu0 }
 0x25b   : > { %8901 = vst [vmem:[#allocation25_spill] sm:$0xff] %v7783_v12  ;;  %v6123_v43 = vpop.f32.mrf.mxu1  ;;  %v2368_v12 = vadd.f32 %v6110_v5, %v2237_v6  ;;  %v2239_v5 = vadd.f32 %v2220_v62, %v2043_v28 }
 0x25c   : > { %v6158_v48 = vpop.f32.mrf.mxu0  ;;  %v2493_v27 = vadd.f32 %v6123_v43, %v2369_v50 }
 0x25d   : > { %v2462_v34 = vpop.f32.mrf.mxu1  ;;  %v2492_v47 = vadd.f32 %v6122_v53, %v2368_v12  ;;  %v2046_v12 = vadd.f32 %v7761_v45, %v7765_v38 }
 0x25e   : > { %v7785_v59 = vpop.f32.mrf.mxu0  ;;  %v2627_v31 = vadd.f32 %v7773_v55, %v2493_v27 }
 0x25f   : > { %v6126_v16 = vpop.f32.mrf.mxu1  ;;  %v2240_v29 = vadd.f32 %v2223_v14, %v2046_v12 }
 0x260   : > { %v7787_v21 = vpop.f32.mrf.mxu0  ;;  %v2496_v43 = vadd.f32 %v6126_v16, %v2372_v52 }
 0x261   : > { %8902 = vst [vmem:[#allocation26_spill] sm:$0xff] %v7787_v21  ;;  %v2475_v17 = vpop.f32.mrf.mxu1 }
 0x262   : > { %v7789_v44 = vpop.f32.mrf.mxu0  ;;  %v2630_v16 = vadd.f32 %v7777_v46, %v2496_v43 }
 0x263   : > { %8903 = vst [vmem:[#allocation34_spill] sm:$0xff] %v7789_v44  ;;  %v6127_v11 = vpop.f32.mrf.mxu1  ;;  %v2236_v44 = vadd.f32 %v2207_v30, %v2030_v1  ;;  %v2626_v1 = vadd.f32 %v6134_v54, %v2492_v47  ;;  %v2371_v54 = vadd.f32 %v7771_v63, %v2240_v29 }
 0x264   : > { %v7791_v2 = vpop.f32.mrf.mxu0 }
 0x265   : > { %8904 = vst [vmem:[#allocation35_spill] sm:$0xff] %v7791_v2  ;;  %v2478_v35 = vpop.f32.mrf.mxu1  ;;  %v2366_v2 = vadd.f32 %v2335_v25, %v2235_v61  ;;  %v2367_v24 = vadd.f32 %v2338_v19, %v2236_v44  ;;  %v2242_v61 = vadd.f32 %v6103_v42, %v2054_v60  ;;  %v2370_v44 = vadd.f32 %v7767_v13, %v2239_v5  ;;  %v8907_v42 = vld [vmem:[#allocation24_spill] sm:$0xff] }
 0x266   : > { %v7793_v36 = vpop.f32.mrf.mxu0  ;;  %v2495_v13 = vadd.f32 %v2478_v35, %v2371_v54  ;;  %v7825_v35 = vld [vmem:[%s8591_s11] ss:$0 sm:$0xff] }
 0x267   : > { %v6146_v33 = vpop.f32.mrf.mxu1  ;;  %v2490_v20 = vadd.f32 %v2459_v39, %v2366_v2  ;;  %v2491_v25 = vadd.f32 %v2462_v34, %v2367_v24  ;;  %v2373_v19 = vadd.f32 %v7769_v0, %v2242_v61  ;;  %v2494_v34 = vadd.f32 %v2475_v17, %v2370_v44  ;;  %v7815_v0 = vld [vmem:[%s8590_s10] ss:$0 sm:$0xff] }
 0x268   : > { %v7795_v49 = vpop.f32.mrf.mxu0  ;;  %v2732_v15 = vadd.f32 %v6146_v33, %v2626_v1  ;;  %v8906_v55 = vld [vmem:[#allocation26_spill] sm:$0xff] }
 0x269   : > { %v2699_v9 = vpop.f32.mrf.mxu1  ;;  %v2624_v58 = vadd.f32 %v2593_v56, %v2490_v20  ;;  %v2625_v45 = vadd.f32 %v7775_v40, %v2491_v25  ;;  %v2497_v10 = vadd.f32 %v6127_v11, %v2373_v19 }
 0x26a   : > { %v7797_v8 = vpop.f32.mrf.mxu0  ;;  %v2830_v33 = vadd.f32 %v6158_v48, %v2732_v15  ;;  %v2628_v48 = vadd.f32 %v7779_v23, %v2494_v34  ;;  %v8908_v53 = vld [vmem:[#allocation34_spill] sm:$0xff] }
 0x26b   : > { %v6147_v18 = vpop.f32.mrf.mxu1  ;;  %v2730_v41 = vadd.f32 %v2699_v9, %v2624_v58  ;;  %v2631_v14 = vadd.f32 %v8907_v42, %v2497_v10 }
 0x26c   : > { %v6180_v21 = vpop.f32.mrf.mxu0  ;;  %v2733_v38 = vadd.f32 %v6147_v18, %v2627_v31  ;;  %v8912_v27 = vld [vmem:[#allocation35_spill] sm:$0xff] }
 0x26d   : > { %v2702_v22 = vpop.f32.mrf.mxu1  ;;  %v2828_v9 = vadd.f32 %v7785_v59, %v2730_v41 }
 0x26e   : > { %v2996_v6 = vpop.f32.mrf.mxu0  ;;  %v2731_v7 = vadd.f32 %v2702_v22, %v2625_v45  ;;  %v2831_v62 = vadd.f32 %v8906_v55, %v2733_v38  ;;  %v8910_v22 = vld [vmem:[#allocation25_spill] sm:$0xff] }
 0x26f   : > { %v6150_v32 = vpop.f32.mrf.mxu1  ;;  %v2629_v28 = vadd.f32 %v8910_v22, %v2495_v13 }
 0x270   : > { %v6181_v26 = vpop.f32.mrf.mxu0  ;;  %v2736_v40 = vadd.f32 %v6150_v32, %v2630_v16  ;;  %v2829_v39 = vadd.f32 %v8908_v53, %v2731_v7 }
 0x271   : > { %v2715_v4 = vpop.f32.mrf.mxu1 }
 0x272   : > { %v2999_v56 = vpop.f32.mrf.mxu0  ;;  %v2734_v18 = vadd.f32 %v2715_v4, %v2628_v48  ;;  %v2834_v1 = vadd.f32 %v8912_v27, %v2736_v40 }
 0x273   : > { %v6151_v2 = vpop.f32.mrf.mxu1 }
 0x274   : > { %v6184_v46 = vpop.f32.mrf.mxu0  ;;  %v2737_v51 = vadd.f32 %v6151_v2, %v2631_v14  ;;  %v2832_v25 = vadd.f32 %v7793_v36, %v2734_v18 }
 0x275   : > { %v2718_v3 = vpop.f32.mrf.mxu1 }
 0x276   : > { %v2735_v32 = vadd.f32 %v2718_v3, %v2629_v28  ;;  %v3012_v5 = vpop.f32.mrf.mxu0  ;;  %v2835_v2 = vadd.f32 %v7795_v49, %v2737_v51 }
 0x277   : > { %v6170_v30 = vpop.f32.mrf.mxu1 }
 0x278   : > { %v2950_v37 = vadd.f32 %v6170_v30, %v2830_v33  ;;  %v6185_v41 = vpop.f32.mrf.mxu0  ;;  %v2833_v36 = vadd.f32 %v7797_v8, %v2735_v32 }
 0x279   : > { %v2917_v17 = vpop.f32.mrf.mxu1 }
 0x27a   : > { %v7818_v11 = vadd.f32 %v6180_v21, %v2950_v37  ;;  %v2948_v63 = vadd.f32 %v2917_v17, %v2828_v9  ;;  %v3015_v9 = vpop.f32.mrf.mxu0 }
 0x27b   : > { %v6171_v59 = vpop.f32.mrf.mxu1 }
 0x27c   : > { %8905 = vst [vmem:[#allocation36_spill] sm:$0xff] %v7818_v11  ;;  %v3036_v21 = vmul.f32 %v7815_v0, %v7818_v11  ;;  %v7830_v23 = vadd.f32 %v2996_v6, %v2948_v63  ;;  %v2951_v47 = vadd.f32 %v6171_v59, %v2831_v62 }
 0x27d   : > { %v2920_v20 = vpop.f32.mrf.mxu1 }
 0x27e   : > { %8909 = vst [vmem:[#allocation26_spill] sm:$0xff] %v7830_v23  ;;  %v3051_v50 = vadd.f32 %v7825_v35, %v3036_v21  ;;  %v3034_v60 = vmul.f32 %v7815_v0, %v7830_v23  ;;  %v7836_v57 = vadd.f32 %v6181_v26, %v2951_v47  ;;  %v2949_v24 = vadd.f32 %v2920_v20, %v2829_v39 }
 0x27f   : > { %v6174_v12 = vpop.f32.mrf.mxu1 }
 0x280   : > { %8911 = vst [vmem:[#allocation24_spill] sm:$0xff] %v7836_v57  ;;  %v3067_v6 = vmul.f32 0.1, %v3051_v50  ;;  %v3037_v61 = vmul.f32 %v7815_v0, %v7836_v57  ;;  %vm3059_vm11 = vcmp.gt.f32.partialorder %v3051_v50, 0.0  ;;  %v3049_v4 = vadd.f32 %v7825_v35, %v3034_v60 }
 0x281   : > { %v7843_v15 = vadd.f32 %v2999_v56, %v2949_v24  ;;  %v2954_v58 = vadd.f32 %v6174_v12, %v2834_v1  ;;  %v2933_v29 = vpop.f32.mrf.mxu1 }
 0x282   : > { %v3052_v52 = vadd.f32 %v7825_v35, %v3037_v61  ;;  %v2952_v31 = vadd.f32 %v2933_v29, %v2832_v25  ;;  %v3075_v19 = vsel %vm3059_vm11, %v3051_v50, %v3067_v6  ;;  %v3065_v34 = vmul.f32 0.1, %v3049_v4 }
 0x283   : > { %8913 = vst [vmem:[#allocation34_spill] sm:$0xff] %v7843_v15  ;;  %v3035_v26 = vmul.f32 %v7815_v0, %v7843_v15  ;;  %v7849_v44 = vadd.f32 %v6184_v46, %v2954_v58  ;;  %v6175_v43 = vpop.f32.mrf.mxu1  ;;  %vm3057_vm7 = vcmp.gt.f32.partialorder %v3049_v4, 0.0 }
 0x284   : > { %vm3060_vm6 = vcmp.gt.f32.partialorder %v3052_v52, 0.0  ;;  %v3068_v45 = vmul.f32 0.1, %v3052_v52  ;;  %v2955_v3 = vadd.f32 %v6175_v43, %v2835_v2  ;;  %v7855_v33 = vadd.f32 %v3012_v5, %v2952_v31  ;;  %v6480_v31 = vld [vmem:[%s8588_s8 + $0x30] sm:$0xff]  }
 0x285   : > { %8914 = vst [vmem:[#allocation25_spill] sm:$0xff] %v7849_v44  ;;  %v3050_v38 = vadd.f32 %v7825_v35, %v3035_v26  ;;  %v3040_v49 = vmul.f32 %v7815_v0, %v7849_v44  ;;  %v2936_v10 = vpop.f32.mrf.mxu1  ;;  %v3073_v48 = vsel %vm3057_vm7, %v3049_v4, %v3065_v34 }
 0x286   : > { %8915 = vst [vmem:[#allocation35_spill] sm:$0xff] %v7855_v33  ;;  %v3076_v54 = vsel %vm3060_vm6, %v3052_v52, %v3068_v45  ;;  %v7857_v7 = vadd.f32 %v6185_v41, %v2955_v3  ;;  %v2953_v30 = vadd.f32 %v2936_v10, %v2833_v36  ;;  %v3038_v13 = vmul.f32 %v7815_v0, %v7855_v33 }
 0x287   : > { %v3082_v56 = vpack.c.bf16 %v3076_v54, %v3075_v19  ;;  %vm3058_vm0 = vcmp.gt.f32.partialorder %v3050_v38, 0.0  ;;  %v3066_v8 = vmul.f32 0.1, %v3050_v38  ;;  %v3055_v37 = vadd.f32 %v7825_v35, %v3040_v49 }
 0x288   : > { %8916 = vst [vmem:[#allocation37_spill] sm:$0xff] %v7857_v7  ;;  %v3041_v16 = vmul.f32 %v7815_v0, %v7857_v7  ;;  %v7864_v17 = vadd.f32 %v3015_v9, %v2953_v30  ;;  %v3053_v42 = vadd.f32 %v7825_v35, %v3038_v13  ;;  %v8923_v30 = vld [vmem:[#allocation19_spill] sm:$0xff] }
 0x289   : > { %v3094_v63 = vshrl.u32 %v3082_v56, 16  ;;  %v3097_v55 = vshll.u32 %v3082_v56, 16  ;;  %v3074_v62 = vsel %vm3058_vm0, %v3050_v38, %v3066_v8  ;;  %v3071_v53 = vmul.f32 0.1, %v3055_v37 }
 0x28a   : > { %8917 = vst [vmem:[#allocation38_spill] sm:$0xff] %v7864_v17  ;;  %v3081_v40 = vpack.c.bf16 %v3074_v62, %v3073_v48  ;;  %v3056_v14 = vadd.f32 %v7825_v35, %v3041_v16  ;;  %v3039_v39 = vmul.f32 %v7815_v0, %v7864_v17  ;;  %vm3063_vm13 = vcmp.gt.f32.partialorder %v3055_v37, 0.0 }
 0x28b   : > { %v3096_v59 = vrot.slane %v3094_v63, 3  ;;  %v3099_v46 = vrot.slane %v3097_v55, 4  ;;  %v3069_v47 = vmul.f32 0.1, %v3053_v42  ;;  %vm3061_vm6 = vcmp.gt.f32.partialorder %v3053_v42, 0.0 }
 0x28c   : > { %v3086_v18 = vshrl.u32 %v3081_v40, 16  ;;  %v3089_v21 = vshll.u32 %v3081_v40, 16  ;;  %vm3064_vm11 = vcmp.gt.f32.partialorder %v3056_v14, 0.0  ;;  %v3072_v51 = vmul.f32 0.1, %v3056_v14 }
 0x28d   : > { %v3054_v20 = vadd.f32 %v7825_v35, %v3039_v39  ;;  %v3100_v50 = vor.u32 %v3099_v46, %v3096_v59  ;;  %v3079_v60 = vsel %vm3063_vm13, %v3055_v37, %v3071_v53  ;;  %v3077_v1 = vsel %vm3061_vm6, %v3053_v42, %v3069_v47  ;;  %v6482_v37 = vld [vmem:[%s8588_s8 + $0x58] sm:$0xff]  }
 0x28e   : > { %v3088_v22 = vrot.slane %v3086_v18, 3  ;;  %v3091_v28 = vrot.slane %v3089_v21, 4  ;;  %v3080_v24 = vsel %vm3064_vm11, %v3056_v14, %v3072_v51  ;;  %vm8918_vm0 = vsmask.f32 4352 }
 0x28f   : > { %v3084_v32 = vpack.c.bf16 %v3080_v24, %v3079_v60  ;;  %vm3062_vm7 = vcmp.gt.f32.partialorder %v3054_v20, 0.0  ;;  %v3070_v5 = vmul.f32 0.1, %v3054_v20  ;;  %vm8925_vm13 = vsmask.f32 7424  ;;  %vm8926_vm11 = vmmov %vm8918_vm0  ;;  %v8932_v24 = vld [vmem:[#allocation10_spill] sm:$0xff] }
 0x290   : > { %v3092_v27 = vor.u32 %v3091_v28, %v3088_v22  ;;  %vm8927_vm6 = vmmov %vm8918_vm0 }
 0x291   : > { %v3112_v0 = vshrl.u32 %v3084_v32, 16  ;;  %v3115_v12 = vshll.u32 %v3084_v32, 16  ;;  %v3078_v6 = vsel %vm3062_vm7, %v3054_v20, %v3070_v5  ;;  %vm8930_vm7 = vcmask 1043456   ;;  %v6481_v5 = vld [vmem:[%s8588_s8 + $0x20] sm:$0xff]  }
 0x292   : > { %v7872_v61 = vsel %vm8918_vm0, %v3092_v27, %v3100_v50  ;;  %v3083_v25 = vpack.c.bf16 %v3078_v6, %v3077_v1  ;;  %v7876_v58 = vsel %vm8821_vm1, 0, %v3092_v27  ;;  %vm8933_vm0 = vnez %v8932_v24 }
 0x293   : > { %v3128_v29 = vsel %vm6906_vm14, %v7872_v61, 0  ;;  %v3114_v52 = vrot.slane %v3112_v0, 3  ;;  %v3127_v26 = vsel %vm6851_vm2, %v7876_v58, 0  ;;  %v3148_v41 = vshll.u32 %v7872_v61, 16 }
 0x294   : > { %v3117_v43 = vrot.slane %v3115_v12, 4  ;;  %v3103_v36 = vshrl.u32 %v3083_v25, 16  ;;  %v3106_v19 = vshll.u32 %v3083_v25, 16  ;;  %6202 = vmatprep.mubr.msk.bf16.mxu0 %vm1890_vm3, %v3127_v26  ;;  %v3143_v45 = vshll.u32 %v7876_v58, 16 }
 0x295   : > { %6203 = vmatmul.mubr.msk.bf16.vlgmr.msra.gmra.mxu0 %vm1890_vm3, %v3128_v29  ;;  %v3141_v3 = vshrl.u32 %v7876_v58, 16  ;;  %v3475_v38 = vsel %vm7406_vm8, %v7876_v58, 0  ;;  %v3476_v8 = vsel %vm7414_vm9, %v7872_v61, 0  ;;  %v3150_v48 = vrot.slane %v3148_v41, 1 }
 0x296   : > { %v3105_v49 = vrot.slane %v3103_v36, 3  ;;  %v3108_v10 = vrot.slane %v3106_v19, 4  ;;  %v3145_v54 = vrot.slane %v3143_v45, 1  ;;  %6223 = vmatpush3.bf16.msra.mxu0 %v8923_v30  ;;  %v3118_v9 = vor.u32 %v3117_v43, %v3114_v52  ;;  %v8935_v52 = vld [vmem:[#allocation23_spill] sm:$0xff]  ;;  %v8937_v36 = vld [vmem:[#allocation20_spill] sm:$0xff] }
 0x297   : > { %6224 = vmatprep.subr.bf16.mxu0 %v6480_v31  ;;  %v3490_v63 = vrot.slane %v3475_v38, 4  ;;  %v3491_v55 = vrot.slane %v3476_v8, 4  ;;  %v3152_v40 = vshrl.u32 %v7872_v61, 16  ;;  %v3354_v29 = vsel %vm7482_vm12, %v7876_v58, 0 }
 0x298   : > { %v3109_v13 = vor.u32 %v3108_v10, %v3105_v49  ;;  %v3146_v16 = vor.u32 %v3145_v54, %v3141_v3  ;;  %v7926_v21 = vsel %vm8821_vm1, %v3118_v9, 0  ;;  %v6483_v49 = vld [vmem:[%s8588_s8 + $0x48] sm:$0xff]   ;;  %v6484_v10 = vld [vmem:[%s8588_s8 + $0x50] sm:$0xff]   ;;  %v3369_v30 = vrot.slane %v3354_v29, 1 }
 0x299   : > { %v3154_v47 = vor.u32 %v3152_v40, %v3150_v48  ;;  %v3492_v22 = vsel %vm8930_vm7, %v3490_v63, %v3491_v55  ;;  %v3172_v6 = vshll.u32 %v7926_v21, 16  ;;  %v8942_v63 = vld [vmem:[#allocation27_spill] sm:$0xff] }
 0x29a   : > { %v3151_v62 = vsel %vm8925_vm13, %v3146_v16, %v3150_v48  ;;  %v7911_v42 = vsel %vm8926_vm11, %v3100_v50, %v3109_v13  ;;  %v7914_v14 = vsel %vm8927_vm6, %v3109_v13, %v3118_v9  ;;  %6225 = vmatpush3.bf16.msra.mxu0 %v6480_v31  ;;  %vm8936_vm11 = vmmov %vm8925_vm13  ;;  %vm8938_vm6 = vcmp.ne.s16.totalorder %v8937_v36, 0  ;;  %v8940_v16 = vld [vmem:[#allocation15_spill] sm:$0xff] }
 0x29b   : > { %6190 = vmatprep.mubr.msk.bf16.mxu1 %vm1890_vm3, %v3151_v62  ;;  %v3129_v46 = vsel %vm6976_vm10, %v7911_v42, 0  ;;  %v3130_v39 = vsel %vm7011_vm15, %v7914_v14, 0  ;;  %v3156_v18 = vshll.u32 %v7911_v42, 16  ;;  %6246 = vmatprep.subr.bf16.mxu0 %v6482_v37  ;;  %v3164_v51 = vshll.u32 %v7914_v14, 16 }
 0x29c   : > { %6206 = vmatprep.mubr.msk.bf16.mxu0 %vm1890_vm3, %v3129_v46  ;;  %v3160_v20 = vshrl.u32 %v7911_v42, 16  ;;  %v3477_v60 = vsel %vm7447_vm4, %v7911_v42, 0  ;;  %v3478_v32 = vsel %vm8933_vm0, %v7914_v14, 0  ;;  %v3168_v43 = vshrl.u32 %v7914_v14, 16  ;;  %v8945_v46 = vld [vmem:[#allocation13_spill] sm:$0xff] }
 0x29d   : > { %6207 = vmatmul.mubr.msk.bf16.gmra.mxu0 %vm1890_vm3, %v3130_v39  ;;  %v3158_v28 = vrot.slane %v3156_v18, 1  ;;  %v3166_v0 = vrot.slane %v3164_v51, 1  ;;  %v3493_v12 = vrot.slane %v3477_v60, 4  ;;  %v3495_v31 = vrot.slane %v3478_v32, 4  ;;  %v8950_v60 = vld [vmem:[#allocation22_spill] sm:$0xff] }
 0x29e   : > { %6226 = vmatprep.mubr.msk.bf16.mxu0 %vm1890_vm3, %v3492_v22  ;;  %v3355_v19 = vsel %vm8938_vm6, %v7872_v61, 0  ;;  %v7983_v13 = vrot.slane %v3172_v6, 1  ;;  %vm8943_vm6 = vcmp.ne.s16.totalorder %v8942_v63, 0  ;;  %v8948_v22 = vld [vmem:[#allocation21_spill] sm:$0xff]  ;;  %vm8958_vm0 = vcmask 1046528  }
 0x29f   : > { %v7948_v27 = vsel %vm8925_vm13, %v3154_v47, %v3158_v28  ;;  %v3162_v1 = vor.u32 %v3160_v20, %v3158_v28  ;;  %v3170_v38 = vor.u32 %v3168_v43, %v3166_v0  ;;  %v3494_v54 = vsel %vm8930_vm7, %v3491_v55, %v3493_v12  ;;  %vm8939_vm13 = vmmov %vm8930_vm7 }
 0x2a0   : > { %6191 = vmatmul.mubr.msk.bf16.vlgmr.msra.gmra.mxu1 %vm1890_vm3, %v7948_v27  ;;  %v3370_v8 = vrot.slane %v3355_v19, 1  ;;  %v3496_v9 = vsel %vm8939_vm13, %v3493_v12, %v3495_v31  ;;  %v3720_v55 = vsel %vm8943_vm6, %v7872_v61, 0  ;;  %vm8944_vm7 = vsmask.f32 7424  ;;  %v8953_v19 = vld [vmem:[#allocation30_spill] sm:$0xff] }
 0x2a1   : > { %6211 = vmatpush3.bf16.msra.mxu1 %v8935_v52  ;;  %v7962_v26 = vsel %vm8936_vm11, %v3162_v1, %v3166_v0  ;;  %vm8941_vm11 = vnez %v8940_v16  ;;  %v7994_v62 = vsel %vm8944_vm7, %v3170_v38, %v7983_v13  ;;  %vm8946_vm13 = vnez %v8945_v46 }
 0x2a2   : > { %6194 = vmatprep.mubr.msk.bf16.mxu1 %vm1890_vm3, %v7962_v26  ;;  %6212 = vmatprep.subr.bf16.mxu1 %v6481_v5  ;;  %v3719_v48 = vsel %vm8941_vm11, %v7876_v58, 0  ;;  %v3479_v39 = vsel %vm8946_vm13, %v7926_v21, 0  ;;  %vm8947_vm11 = vcmask 1046528   ;;  %vm8949_vm6 = vcmp.ne.s16.totalorder %v8948_v22, 0  ;;  %v6487_v58 = vld [vmem:[%s8588_s8 + $0x68] sm:$0xff]  }
 0x2a3   : > { %v3371_v47 = vsel %vm8947_vm11, %v3369_v30, %v3370_v8  ;;  %v3356_v28 = vsel %vm8949_vm6, %v7911_v42, 0  ;;  %vm8951_vm7 = vcmp.ne.s16.totalorder %v8950_v60, 0  ;;  %v3735_v1 = vrot.slane %v3720_v55, 5  ;;  %v8956_v30 = vld [vmem:[#allocation31_spill] sm:$0xff] }
 0x2a4   : > { %v3357_v32 = vsel %vm8951_vm7, %v7914_v14, 0  ;;  %v3497_v0 = vrot.slane %v3479_v39, 4  ;;  %v3372_v12 = vrot.slane %v3356_v28, 1  ;;  %vm8952_vm13 = vcmask 1043456  }
 0x2a5   : > { %6227 = vmatmul.mubr.msk.bf16.vlgmr.msra.gmra.mxu0 %vm1890_vm3, %v3494_v54  ;;  %6213 = vmatpush3.bf16.msra.mxu1 %v6481_v5  ;;  %v3734_v5 = vrot.slane %v3719_v48, 5  ;;  %v3374_v29 = vrot.slane %v3357_v32, 1  ;;  %vm8954_vm11 = vcmp.ne.s16.totalorder %v8953_v19, 0  ;;  %vm8955_vm6 = vcmask 1042432  }
 0x2a6   : > { %6230 = vmatprep.mubr.msk.bf16.mxu0 %vm1890_vm3, %v3496_v9  ;;  %6247 = vmatpush3.bf16.msra.mxu0 %v6482_v37  ;;  %v6486_v37 = vld [vmem:[%s8588_s8 + $0x78] sm:$0xff]   ;;  %v3498_v52 = vsel %vm8952_vm13, %v3495_v31, %v3497_v0  ;;  %v3721_v38 = vsel %vm8954_vm11, %v7911_v42, 0  ;;  %vm8957_vm7 = vcmp.ne.s16.totalorder %v8956_v30, 0  ;;  %v3373_v31 = vsel %vm8958_vm0, %v3370_v8, %v3372_v12  ;;  %vm8959_vm13 = vmmov %vm8958_vm0 }
 0x2a7   : > { %6234 = vmatprep.subr.bf16.mxu1 %v6483_v49  ;;  %6248 = vmatprep.subr.bf16.mxu0 %v6484_v10  ;;  %v3736_v54 = vsel %vm8955_vm6, %v3734_v5, %v3735_v1  ;;  %v3722_v9 = vsel %vm8957_vm7, %v7914_v14, 0  ;;  %v3375_v48 = vsel %vm8959_vm13, %v3372_v12, %v3374_v29  ;;  %v3737_v55 = vrot.slane %v3721_v38, 5  ;;  %vm8961_vm0 = vmmov %vm8955_vm6 }
 0x2a8   : > { %6195 = vmatmul.mubr.msk.bf16.gmra.mxu1 %vm1890_vm3, %v7994_v62  ;;  %v3601_v39 = vrot.slane %v3141_v3, 4  ;;  %v3604_v28 = vrot.slane %v3152_v40, 4  ;;  %v3605_v32 = vrot.slane %v3148_v41, 5  ;;  %v3739_v8 = vrot.slane %v3722_v9, 5  ;;  %vm8962_vm11 = vmmov %vm8961_vm0 }
 0x2a9   : > { %6214 = vmatprep.mubr.msk.bf16.mxu1 %vm1890_vm3, %v3371_v47  ;;  %v3602_v47 = vrot.slane %v3143_v45, 5  ;;  %v3358_v0 = vsel %vm7602_vm5, %v7926_v21, 0  ;;  %v6488_v45 = vld [vmem:[%s8588_s8 + $0x70] sm:$0xff]   ;;  %v3738_v3 = vsel %vm8961_vm0, %v3735_v1, %v3737_v55  ;;  %vm8963_vm6 = vmmov %vm8959_vm13  ;;  %v3609_v9 = vrot.slane %v3156_v18, 5 }
 0x2aa   : > { %6249 = vmatpush3.bf16.msra.mxu0 %v6484_v10  ;;  %v6485_v10 = vld [vmem:[%s8588_s8 + $0x40] sm:$0xff]   ;;  %v3606_v40 = vor.u32 %v3605_v32, %v3604_v28  ;;  %v3376_v12 = vrot.slane %v3358_v0, 1  ;;  %vm8966_vm13 = vsmask.f32 3328  ;;  %v3616_v18 = vshrl.u32 %v7926_v21, 16 }
 0x2ab   : > { %6270 = vmatprep.subr.bf16.mxu0 %v6486_v37  ;;  %v3603_v41 = vor.u32 %v3602_v47, %v3601_v39  ;;  %v3619_v28 = vrot.slane %v3172_v6, 5  ;;  %v3840_v6 = vsel %vm6851_vm2, %v7872_v61, 0 }
 0x2ac   : > { %v3377_v38 = vsel %vm8963_vm6, %v3374_v29, %v3376_v12  ;;  %v3618_v47 = vrot.slane %v3616_v18, 4  ;;  %v3951_v0 = vor.u32 %v3616_v18, %v7983_v13  ;;  %v3842_v13 = vsel %vm6976_vm10, %v7914_v14, 0 }
 0x2ad   : > { %6231 = vmatmul.mubr.msk.bf16.gmra.mxu0 %vm1890_vm3, %v3498_v52  ;;  %v3608_v52 = vrot.slane %v3160_v20, 4  ;;  %v3613_v20 = vrot.slane %v3164_v51, 5  ;;  %v3843_v12 = vsel %vm7011_vm15, %v7926_v21, 0 }
 0x2ae   : > { %6250 = vmatprep.mubr.msk.bf16.mxu0 %vm1890_vm3, %v3736_v54  ;;  %v8964_v54 = vld [vmem:[#allocation16_spill] sm:$0xff]  ;;  %v3620_v32 = vor.u32 %v3619_v28, %v3618_v47 }
 0x2af   : > { %vm8965_vm7 = vnez %v8964_v54 }
 0x2b0   : > { %6215 = vmatmul.mubr.msk.bf16.vlgmr.msra.gmra.mxu1 %vm1890_vm3, %v3373_v31  ;;  %v3723_v1 = vsel %vm8965_vm7, %v7926_v21, 0  ;;  %v3610_v31 = vor.u32 %v3609_v9, %v3608_v52 }
 0x2b1   : > { %6235 = vmatpush3.bf16.msra.mxu1 %v6483_v49  ;;  %6218 = vmatprep.mubr.msk.bf16.mxu1 %vm1890_vm3, %v3375_v48  ;;  %v3740_v49 = vsel %vm8962_vm11, %v3737_v55, %v3739_v8  ;;  %v3741_v29 = vrot.slane %v3723_v1, 5  ;;  %vm8967_vm11 = vmmov %vm8966_vm13 }
 0x2b2   : > { %6236 = vmatprep.subr.bf16.mxu1 %v6485_v10  ;;  %v3611_v51 = vsel %vm8967_vm11, %v3606_v40, %v3610_v31  ;;  %vm8968_vm6 = vmmov %vm8967_vm11  ;;  %vm8972_vm11 = vcmp.ne.s16.totalorder %v8937_v36, 0 }
 0x2b3   : > { %v3742_v48 = vsel %vm8961_vm0, %v3739_v8, %v3741_v29  ;;  %vm8971_vm0 = vsmask.f32 7424  ;;  %v6495_v29 = vld [vmem:[%s8589_s9 + $0x10] sm:$0xff]  }
 0x2b5   : > { %6251 = vmatmul.mubr.msk.bf16.vlgmr.msra.gmra.mxu0 %vm1890_vm3, %v3738_v3  ;;  %6237 = vmatpush3.bf16.msra.mxu1 %v6485_v10  ;;  %v3607_v10 = vsel %vm8966_vm13, %v3603_v41, %v3606_v40  ;;  %vm8969_vm13 = vmmov %vm8968_vm6  ;;  %v4042_v3 = vsel %vm8972_vm11, %v7911_v42, 0  ;;  %v4041_v41 = vsel %vm7482_vm12, %v7872_v61, 0 }
 0x2b6   : > { %6254 = vmatprep.mubr.msk.bf16.mxu0 %vm1890_vm3, %v3740_v49  ;;  %6271 = vmatpush3.bf16.msra.mxu0 %v6486_v37  ;;  %v3612_v37 = vrot.slane %v3168_v43, 4  ;;  %v6489_v43 = vld [vmem:[%s8588_s8 + $0x60] sm:$0xff]   ;;  %v4055_v40 = vrot.slane %v4042_v3, 1  ;;  %v4054_v49 = vrot.slane %v4041_v41, 1 }
 0x2b7   : > { %6258 = vmatprep.subr.bf16.mxu1 %v6487_v58  ;;  %6272 = vmatprep.subr.bf16.mxu0 %v6488_v45 }
 0x2b8   : > { %6219 = vmatmul.mubr.msk.bf16.gmra.mxu1 %vm1890_vm3, %v3377_v38  ;;  %v3614_v55 = vor.u32 %v3613_v20, %v3612_v37  ;;  %v6494_v20 = vld [vmem:[%s8589_s9] sm:$0xff]  }
 0x2b9   : > { %6238 = vmatprep.mubr.msk.bf16.mxu1 %vm1890_vm3, %v3607_v10 }
 0x2ba   : > { %6273 = vmatpush3.bf16.msra.mxu0 %v6488_v45  ;;  %v3615_v39 = vsel %vm8968_vm6, %v3610_v31, %v3614_v55  ;;  %v3621_v8 = vsel %vm8969_vm13, %v3614_v55, %v3620_v32  ;;  %v3841_v45 = vsel %vm6906_vm14, %v7911_v42, 0  ;;  %vm8973_vm6 = vcmask 1046528   ;;  %v8147_v31 = vld [vmem:[%s8589_s9 + $0x38] sm:$0xff]  }
 0x2bb   : > { %v4056_v52 = vsel %vm8973_vm6, %v4054_v49, %v4055_v40  ;;  %vm8974_vm13 = vcmp.ne.s16.totalorder %v8948_v22, 0  ;;  %vm8976_vm11 = vmmov %vm8973_vm6  ;;  %8978 = vst [vmem:[#allocation19_spill] sm:$0xff] %v8147_v31 }
 0x2bc   : > { %v4043_v42 = vsel %vm8974_vm13, %v7914_v14, 0  ;;  %vm8977_vm7 = vmmov %vm8973_vm6  ;;  %v6492_v14 = vld [vmem:[%s8589_s9 + $0x8] sm:$0xff]  }
 0x2bd   : > { %6255 = vmatmul.mubr.msk.bf16.gmra.mxu0 %vm1890_vm3, %v3742_v48  ;;  %v4057_v38 = vrot.slane %v4043_v42, 1  ;;  %v8152_v48 = vld [vmem:[%s8589_s9 + $0x28] sm:$0xff]  }
 0x2be   : > { %6274 = vmatprep.mubr.msk.bf16.mxu0 %vm1890_vm3, %v7948_v27  ;;  %v6490_v27 = vld [vmem:[%s8588_s8 + $0x88] sm:$0xff]   ;;  %8979 = vst [vmem:[#allocation23_spill] sm:$0xff] %v8152_v48 }
 0x2bf   : > { %v4058_v9 = vsel %vm8976_vm11, %v4055_v40, %v4057_v38 }
 0x2c0   : > { %6239 = vmatmul.mubr.msk.bf16.vlgmr.msra.gmra.mxu1 %vm1890_vm3, %v3611_v51 }
 0x2c1   : > { %6259 = vmatpush3.bf16.msra.mxu1 %v6487_v58  ;;  %6242 = vmatprep.mubr.msk.bf16.mxu1 %vm1890_vm3, %v3615_v39  ;;  %v8970_v58 = vld [vmem:[#allocation29_spill] sm:$0xff] }
 0x2c2   : > { %6260 = vmatprep.subr.bf16.mxu1 %v6489_v43 }
 0x2c5   : > { %6275 = vmatmul.mubr.msk.bf16.vlgmr.msra.gmra.mxu0 %vm1890_vm3, %v7962_v26  ;;  %6261 = vmatpush3.bf16.msra.mxu1 %v6489_v43  ;;  %v3952_v26 = vsel %vm8971_vm0, %v3951_v0, %v8970_v58  ;;  %vm8975_vm0 = vcmp.ne.s16.totalorder %v8950_v60, 0 }
 0x2c6   : > { %6278 = vmatprep.mubr.msk.bf16.mxu0 %vm1890_vm3, %v7994_v62  ;;  %6282 = vmatprep.subr.bf16.mxu1 %v6490_v27  ;;  %v6491_v62 = vld [vmem:[%s8588_s8 + $0x80] sm:$0xff]   ;;  %v4044_v61 = vsel %vm8975_vm0, %v7926_v21, 0  ;;  %v6493_v21 = vld [vmem:[%s8589_s9 + $0x18] sm:$0xff]  }
 0x2c7   : > { %v4059_v1 = vrot.slane %v4044_v61, 1  ;;  %6294 = vmatprep.subr.bf16.mxu0 %v6493_v21 }
 0x2c8   : > { %6243 = vmatmul.mubr.msk.bf16.gmra.mxu1 %vm1890_vm3, %v3621_v8  ;;  %6295 = vmatpush3.bf16.msra.mxu0 %v6493_v21 }
 0x2c9   : > { %6262 = vmatprep.mubr.msk.bf16.mxu1 %vm1890_vm3, %v3840_v6  ;;  %v4060_v10 = vsel %vm8977_vm7, %v4057_v38, %v4059_v1  ;;  %v4061_v37 = vsel %vm8973_vm6, %v4059_v1, %v8970_v58  ;;  %6296 = vmatprep.subr.bf16.mxu0 %v6495_v29 }
 0x2cc   : > { %6297 = vmatpush3.bf16.msra.mxu0 %v6495_v29 }
 0x2cd   : > { %6279 = vmatmul.mubr.msk.bf16.gmra.mxu0 %vm1890_vm3, %v3952_v26  ;;  %6318 = vmatprep.subr.bf16.mxu0 %v8152_v48 }
 0x2d0   : > { %6263 = vmatmul.mubr.msk.bf16.vlgmr.msra.gmra.mxu1 %vm1890_vm3, %v3841_v45 }
 0x2d1   : > { %6283 = vmatpush3.bf16.msra.mxu1 %v6490_v27  ;;  %6266 = vmatprep.mubr.msk.bf16.mxu1 %vm1890_vm3, %v3842_v13 }
 0x2d2   : > { %6284 = vmatprep.subr.bf16.mxu1 %v6491_v62 }
 0x2d5   : > { %6285 = vmatpush3.bf16.msra.mxu1 %v6491_v62 }
 0x2d6   : > { %6306 = vmatprep.subr.bf16.mxu1 %v6492_v14 }
 0x2d8   : > { %6267 = vmatmul.mubr.msk.bf16.gmra.mxu1 %vm1890_vm3, %v3843_v12 }
 0x2d9   : > { %6286 = vmatprep.mubr.msk.bf16.mxu1 %vm1890_vm3, %v4056_v52 }
 0x2e0   : > { %6287 = vmatmul.mubr.msk.bf16.vlgmr.msra.gmra.mxu1 %vm1890_vm3, %v4058_v9 }
 0x2e1   : > { %6290 = vmatprep.mubr.msk.bf16.mxu1 %vm1890_vm3, %v4060_v10  ;;  %6307 = vmatpush3.bf16.msra.mxu1 %v6492_v14 }
 0x2e2   : > { %6308 = vmatprep.subr.bf16.mxu1 %v6494_v20 }
 0x2e5   : > { %6309 = vmatpush3.bf16.msra.mxu1 %v6494_v20 }
 0x2e6   : > { %6330 = vmatprep.subr.bf16.mxu1 %v8147_v31 }
 0x2e8   : > { %6291 = vmatmul.mubr.msk.bf16.gmra.mxu1 %vm1890_vm3, %v4061_v37 }
 0x355   : > { %v6204_v55 = vpop.f32.mrf.mxu0 }
 0x357   : > { %v3323_v18 = vpop.f32.mrf.mxu0 }
 0x359   : > { %v6205_v43 = vpop.f32.mrf.mxu0 }
 0x35b   : > { %v3326_v51 = vpop.f32.mrf.mxu0 }
 0x35d   : > { %v6208_v39 = vpop.f32.mrf.mxu0 }
 0x35f   : > { %v3339_v47 = vpop.f32.mrf.mxu0 }
 0x360   : > { %v6192_v28 = vpop.f32.mrf.mxu1 }
 0x361   : > { %v8156_v27 = vpop.f32.mrf.mxu0  ;;  %v3332_v46 = vadd.f32 %v6204_v55, %v6192_v28 }
 0x362   : > { %v3234_v32 = vpop.f32.mrf.mxu1 }
 0x363   : > { %v8158_v8 = vpop.f32.mrf.mxu0  ;;  %v3324_v63 = vadd.f32 %v3323_v18, %v3234_v32 }
 0x364   : > { %v6193_v6 = vpop.f32.mrf.mxu1 }
 0x365   : > { %v6228_v0 = vpop.f32.mrf.mxu0  ;;  %v3335_v25 = vadd.f32 %v6205_v43, %v6193_v6 }
 0x366   : > { %v3237_v26 = vpop.f32.mrf.mxu1 }
 0x367   : > { %v3557_v62 = vpop.f32.mrf.mxu0  ;;  %v3327_v56 = vadd.f32 %v3326_v51, %v3237_v26 }
 0x368   : > { %v6196_v45 = vpop.f32.mrf.mxu1 }
 0x369   : > { %v6229_v13 = vpop.f32.mrf.mxu0  ;;  %v3348_v4 = vadd.f32 %v6208_v39, %v6196_v45  ;;  %v8188_v45 = vld [vmem:[%s8592_s12] ss:$0 sm:$0xff] }
 0x36a   : > { %v3250_v3 = vpop.f32.mrf.mxu1 }
 0x36b   : > { %v3560_v41 = vpop.f32.mrf.mxu0 }
 0x36c   : > { %v6197_v40 = vpop.f32.mrf.mxu1 }
 0x36d   : > { %v8160_v49 = vpop.f32.mrf.mxu0 }
 0x36e   : > { %v3253_v12 = vpop.f32.mrf.mxu1 }
 0x36f   : > { %v8162_v52 = vpop.f32.mrf.mxu0 }
 0x370   : > { %v6216_v42 = vpop.f32.mrf.mxu1 }
 0x371   : > { %v8164_v38 = vpop.f32.mrf.mxu0  ;;  %v3469_v16 = vadd.f32 %v6216_v42, %v3332_v46  ;;  %v3351_v46 = vadd.f32 %v8156_v27, %v6197_v40 }
 0x372   : > { %v3436_v61 = vpop.f32.mrf.mxu1 }
 0x373   : > { %v8166_v1 = vpop.f32.mrf.mxu0  ;;  %v3467_v24 = vadd.f32 %v3436_v61, %v3324_v63  ;;  %v3590_v59 = vadd.f32 %v6228_v0, %v3469_v16  ;;  %v3343_v16 = vadd.f32 %v8158_v8, %v3253_v12 }
 0x374   : > { %v6217_v9 = vpop.f32.mrf.mxu1 }
 0x375   : > { %v6252_v10 = vpop.f32.mrf.mxu0  ;;  %v3470_v53 = vadd.f32 %v6217_v9, %v3335_v25  ;;  %v3588_v35 = vadd.f32 %v3557_v62, %v3467_v24 }
 0x376   : > { %v3439_v37 = vpop.f32.mrf.mxu1 }
 0x377   : > { %v3801_v14 = vpop.f32.mrf.mxu0  ;;  %v3591_v28 = vadd.f32 %v6229_v13, %v3470_v53 }
 0x378   : > { %v6220_v21 = vpop.f32.mrf.mxu1 }
 0x379   : > { %v6253_v20 = vpop.f32.mrf.mxu0  ;;  %v3473_v32 = vadd.f32 %v6220_v21, %v3348_v4 }
 0x37a   : > { %v3452_v29 = vpop.f32.mrf.mxu1 }
 0x37b   : > { %v8168_v17 = vpop.f32.mrf.mxu0 }
 0x37c   : > { %v6221_v7 = vpop.f32.mrf.mxu1 }
 0x37d   : > { %v8170_v44 = vpop.f32.mrf.mxu0  ;;  %v3474_v51 = vadd.f32 %v6221_v7, %v3351_v46 }
 0x37e   : > { %v3455_v33 = vpop.f32.mrf.mxu1 }
 0x37f   : > { %v8172_v23 = vpop.f32.mrf.mxu0  ;;  %v3472_v39 = vadd.f32 %v3455_v33, %v3343_v16 }
 0x380   : > { %v6240_v15 = vpop.f32.mrf.mxu1  ;;  %8980 = vst [vmem:[#allocation39_spill] sm:$0xff] %v8172_v23  ;;  %v3340_v23 = vadd.f32 %v3339_v47, %v3250_v3 }
 0x381   : > { %v8174_v54 = vpop.f32.mrf.mxu0  ;;  %v3713_v2 = vadd.f32 %v6240_v15, %v3590_v59 }
 0x382   : > { %v3680_v57 = vpop.f32.mrf.mxu1  ;;  %8981 = vst [vmem:[#allocation40_spill] sm:$0xff] %v8174_v54  ;;  %v3468_v54 = vadd.f32 %v3439_v37, %v3327_v56  ;;  %v3471_v63 = vadd.f32 %v3452_v29, %v3340_v23 }
 0x383   : > { %v8176_v19 = vpop.f32.mrf.mxu0  ;;  %v3711_v55 = vadd.f32 %v3680_v57, %v3588_v35  ;;  %v3834_v25 = vadd.f32 %v6252_v10, %v3713_v2  ;;  %v3594_v57 = vadd.f32 %v8160_v49, %v3473_v32 }
 0x384   : > { %v6241_v11 = vpop.f32.mrf.mxu1  ;;  %8982 = vst [vmem:[#allocation41_spill] sm:$0xff] %v8176_v19  ;;  %v3589_v0 = vadd.f32 %v3560_v41, %v3468_v54  ;;  %v3592_v53 = vadd.f32 %v8162_v52, %v3471_v63 }
 0x385   : > { %v6276_v36 = vpop.f32.mrf.mxu0  ;;  %v3714_v6 = vadd.f32 %v6241_v11, %v3591_v28  ;;  %v3832_v56 = vadd.f32 %v3801_v14, %v3711_v55  ;;  %v3595_v11 = vadd.f32 %v8164_v38, %v3474_v51 }
 0x386   : > { %v3683_v58 = vpop.f32.mrf.mxu1 }
 0x387   : > { %v4002_v31 = vpop.f32.mrf.mxu0  ;;  %v3712_v47 = vadd.f32 %v3683_v58, %v3589_v0  ;;  %v3835_v27 = vadd.f32 %v6253_v20, %v3714_v6 }
 0x388   : > { %v6244_v5 = vpop.f32.mrf.mxu1 }
 0x389   : > { %v6277_v18 = vpop.f32.mrf.mxu0  ;;  %v3717_v23 = vadd.f32 %v6244_v5, %v3594_v57  ;;  %v3833_v33 = vadd.f32 %v8168_v17, %v3712_v47  ;;  %v8983_v17 = vld [vmem:[#allocation39_spill] sm:$0xff]  ;;  %v8984_v42 = vld [vmem:[#allocation40_spill] sm:$0xff] }
 0x38a   : > { %v3696_v30 = vpop.f32.mrf.mxu1 }
 0x38b   : > { %v4005_v59 = vpop.f32.mrf.mxu0  ;;  %v3715_v8 = vadd.f32 %v3696_v30, %v3592_v53  ;;  %v3838_v30 = vadd.f32 %v8170_v44, %v3717_v23  ;;  %v8985_v9 = vld [vmem:[#allocation41_spill] sm:$0xff] }
 0x38c   : > { %v6245_v60 = vpop.f32.mrf.mxu1 }
 0x38d   : > { %v6280_v7 = vpop.f32.mrf.mxu0  ;;  %v3718_v62 = vadd.f32 %v6245_v60, %v3595_v11  ;;  %v3836_v41 = vadd.f32 %v8983_v17, %v3715_v8 }
 0x38e   : > { %v3699_v22 = vpop.f32.mrf.mxu1 }
 0x38f   : > { %v4018_v60 = vpop.f32.mrf.mxu0 }
 0x390   : > { %v6264_v48 = vpop.f32.mrf.mxu1 }
 0x391   : > { %v3940_v24 = vadd.f32 %v6264_v48, %v3834_v25  ;;  %v3593_v48 = vadd.f32 %v8166_v1, %v3472_v39  ;;  %v6281_v21 = vpop.f32.mrf.mxu0 }
 0x392   : > { %v3907_v50 = vpop.f32.mrf.mxu1 }
 0x393   : > { %v3938_v4 = vadd.f32 %v3907_v50, %v3832_v56  ;;  %v4035_v26 = vadd.f32 %v6276_v36, %v3940_v24  ;;  %v3716_v13 = vadd.f32 %v3699_v22, %v3593_v48  ;;  %v4021_v0 = vpop.f32.mrf.mxu0 }
 0x394   : > { %v6265_v34 = vpop.f32.mrf.mxu1 }
 0x395   : > { %v3941_v54 = vadd.f32 %v6265_v34, %v3835_v27  ;;  %v4033_v5 = vadd.f32 %v4002_v31, %v3938_v4  ;;  %v8194_v34 = vld [vmem:[%s8593_s13] ss:$0 sm:$0xff]  ;;  %v3839_v31 = vadd.f32 %v8984_v42, %v3718_v62  ;;  %v3837_v10 = vadd.f32 %v8985_v9, %v3716_v13 }
 0x396   : > { %v3910_v19 = vpop.f32.mrf.mxu1 }
 0x397   : > { %v3939_v3 = vadd.f32 %v3910_v19, %v3833_v33  ;;  %v4036_v12 = vadd.f32 %v6277_v18, %v3941_v54 }
 0x398   : > { %v6268_v43 = vpop.f32.mrf.mxu1 }
 0x399   : > { %v3944_v52 = vadd.f32 %v6268_v43, %v3838_v30  ;;  %v4034_v37 = vadd.f32 %v4005_v59, %v3939_v3 }
 0x39a   : > { %v3923_v15 = vpop.f32.mrf.mxu1 }
 0x39b   : > { %v3942_v19 = vadd.f32 %v3923_v15, %v3836_v41  ;;  %v4039_v18 = vadd.f32 %v6280_v7, %v3944_v52 }
 0x39c   : > { %v6269_v35 = vpop.f32.mrf.mxu1 }
 0x39d   : > { %v3945_v1 = vadd.f32 %v6269_v35, %v3839_v31  ;;  %v4037_v63 = vadd.f32 %v4018_v60, %v3942_v19 }
 0x39e   : > { %v3926_v2 = vpop.f32.mrf.mxu1 }
 0x39f   : > { %v3943_v55 = vadd.f32 %v3926_v2, %v3837_v10  ;;  %v4040_v51 = vadd.f32 %v6281_v21, %v3945_v1 }
 0x3a0   : > { %v6288_v58 = vpop.f32.mrf.mxu1 }
 0x3a1   : > { %v4153_v50 = vadd.f32 %v6288_v58, %v4035_v26  ;;  %v4038_v57 = vadd.f32 %v4021_v0, %v3943_v55 }
 0x3a2   : > { %v4120_v36 = vpop.f32.mrf.mxu1 }
 0x3a3   : > { %v4168_v40 = vmul.f32 %v8188_v45, %v4153_v50  ;;  %v4151_v49 = vadd.f32 %v4120_v36, %v4033_v5 }
 0x3a4   : > { %v6289_v22 = vpop.f32.mrf.mxu1 }
 0x3a5   : > { %v4183_v44 = vadd.f32 %v8194_v34, %v4168_v40  ;;  %v4166_v38 = vmul.f32 %v8188_v45, %v4151_v49  ;;  %v4154_v61 = vadd.f32 %v6289_v22, %v4036_v12 }
 0x3a6   : > { %v4123_v14 = vpop.f32.mrf.mxu1 }
 0x3a7   : > { %v4181_v20 = vadd.f32 %v8194_v34, %v4166_v38  ;;  %v4169_v29 = vmul.f32 %v8188_v45, %v4154_v61  ;;  %v4152_v28 = vadd.f32 %v4123_v14, %v4034_v37  ;;  %v4199_v32 = vmul.f32 0.1, %v4183_v44 }
 0x3a8   : > { %v6292_v46 = vpop.f32.mrf.mxu1  ;;  %vm4191_vm7 = vcmp.gt.f32.partialorder %v4183_v44, 0.0 }
 0x3a9   : > { %v4184_v43 = vadd.f32 %v8194_v34, %v4169_v29  ;;  %v4167_v6 = vmul.f32 %v8188_v45, %v4152_v28  ;;  %v4157_v25 = vadd.f32 %v6292_v46, %v4039_v18  ;;  %v4197_v15 = vmul.f32 0.1, %v4181_v20 }
 0x3aa   : > { %v4136_v16 = vpop.f32.mrf.mxu1  ;;  %vm4189_vm0 = vcmp.gt.f32.partialorder %v4181_v20, 0.0  ;;  %v4207_v35 = vsel %vm4191_vm7, %v4183_v44, %v4199_v32 }
 0x3ab   : > { %vm4192_vm13 = vcmp.gt.f32.partialorder %v4184_v43, 0.0  ;;  %v4200_v59 = vmul.f32 0.1, %v4184_v43  ;;  %v4155_v24 = vadd.f32 %v4136_v16, %v4037_v63  ;;  %v4182_v56 = vadd.f32 %v8194_v34, %v4167_v6  ;;  %v6498_v6 = vld [vmem:[%s8589_s9 + $0x30] sm:$0xff]  }
 0x3ac   : > { %v4172_v39 = vmul.f32 %v8188_v45, %v4157_v25  ;;  %v6293_v47 = vpop.f32.mrf.mxu1  ;;  %v4205_v7 = vsel %vm4189_vm0, %v4181_v20, %v4197_v15  ;;  %v9014_v15 = vld [vmem:[#allocation27_spill] sm:$0xff] }
 0x3ad   : > { %v4208_v53 = vsel %vm4192_vm13, %v4184_v43, %v4200_v59  ;;  %v4170_v4 = vmul.f32 %v8188_v45, %v4155_v24  ;;  %v4158_v27 = vadd.f32 %v6293_v47, %v4040_v51  ;;  %vm4190_vm11 = vcmp.gt.f32.partialorder %v4182_v56, 0.0  ;;  %v9016_v24 = vld [vmem:[#allocation21_spill] sm:$0xff] }
 0x3ae   : > { %v4214_v23 = vpack.c.bf16 %v4208_v53, %v4207_v35  ;;  %v4198_v11 = vmul.f32 0.1, %v4182_v56  ;;  %v4187_v2 = vadd.f32 %v8194_v34, %v4172_v39  ;;  %v4139_v8 = vpop.f32.mrf.mxu1 }
 0x3af   : > { %v4173_v54 = vmul.f32 %v8188_v45, %v4158_v27  ;;  %v4156_v26 = vadd.f32 %v4139_v8, %v4038_v57  ;;  %v4185_v58 = vadd.f32 %v8194_v34, %v4170_v4  ;;  %v8992_v57 = vld [vmem:[#allocation19_spill] sm:$0xff] }
 0x3b0   : > { %v4226_v62 = vshrl.u32 %v4214_v23, 16  ;;  %v4229_v48 = vshll.u32 %v4214_v23, 16  ;;  %v4206_v33 = vsel %vm4190_vm11, %v4182_v56, %v4198_v11  ;;  %vm4195_vm6 = vcmp.gt.f32.partialorder %v4187_v2, 0.0 }
 0x3b1   : > { %v4213_v50 = vpack.c.bf16 %v4206_v33, %v4205_v7  ;;  %v4203_v5 = vmul.f32 0.1, %v4187_v2  ;;  %v4188_v13 = vadd.f32 %v8194_v34, %v4173_v54  ;;  %v4171_v3 = vmul.f32 %v8188_v45, %v4156_v26 }
 0x3b2   : > { %v4228_v30 = vrot.slane %v4226_v62, 3  ;;  %v4231_v36 = vrot.slane %v4229_v48, 4  ;;  %v4201_v41 = vmul.f32 0.1, %v4185_v58  ;;  %vm4193_vm13 = vcmp.gt.f32.partialorder %v4185_v58, 0.0 }
 0x3b3   : > { %v4218_v60 = vshrl.u32 %v4213_v50, 16  ;;  %v4221_v17 = vshll.u32 %v4213_v50, 16  ;;  %vm4196_vm7 = vcmp.gt.f32.partialorder %v4188_v13, 0.0  ;;  %v4204_v40 = vmul.f32 0.1, %v4188_v13 }
 0x3b4   : > { %v4186_v49 = vadd.f32 %v8194_v34, %v4171_v3  ;;  %v4211_v42 = vsel %vm4195_vm6, %v4187_v2, %v4203_v5  ;;  %v4232_v19 = vor.u32 %v4231_v36, %v4228_v30  ;;  %v4209_v45 = vsel %vm4193_vm13, %v4185_v58, %v4201_v41  ;;  %v6500_v2 = vld [vmem:[%s8589_s9 + $0x58] sm:$0xff]   ;;  %v6499_v36 = vld [vmem:[%s8589_s9 + $0x20] sm:$0xff]  }
 0x3b5   : > { %v4220_v12 = vrot.slane %v4218_v60, 3  ;;  %v4223_v52 = vrot.slane %v4221_v17, 4  ;;  %v4212_v31 = vsel %vm4196_vm7, %v4188_v13, %v4204_v40  ;;  %vm8986_vm11 = vsmask.f32 4352 }
 0x3b6   : > { %vm4194_vm0 = vcmp.gt.f32.partialorder %v4186_v49, 0.0  ;;  %v4202_v22 = vmul.f32 0.1, %v4186_v49  ;;  %v4216_v44 = vpack.c.bf16 %v4212_v31, %v4211_v42  ;;  %vm8993_vm6 = vmmov %vm8986_vm11 }
 0x3b7   : > { %v4224_v38 = vor.u32 %v4223_v52, %v4220_v12  ;;  %vm8994_vm7 = vmmov %vm8993_vm6  ;;  %v9001_v12 = vld [vmem:[#allocation10_spill] sm:$0xff] }
 0x3b8   : > { %v4210_v61 = vsel %vm4194_vm0, %v4186_v49, %v4202_v22  ;;  %v4244_v1 = vshrl.u32 %v4216_v44, 16  ;;  %v4247_v9 = vshll.u32 %v4216_v44, 16  ;;  %v9004_v22 = vld [vmem:[#allocation23_spill] sm:$0xff] }
 0x3b9   : > { %v4215_v10 = vpack.c.bf16 %v4210_v61, %v4209_v45  ;;  %v8216_v37 = vsel %vm8986_vm11, %v4224_v38, %v4232_v19  ;;  %v8220_v34 = vsel %vm8821_vm1, 0, %v4224_v38  ;;  %v9006_v45 = vld [vmem:[#allocation20_spill] sm:$0xff] }
 0x3ba   : > { %v4260_v20 = vsel %vm6906_vm14, %v8216_v37, 0  ;;  %v4246_v29 = vrot.slane %v4244_v1, 3  ;;  %v4249_v55 = vrot.slane %v4247_v9, 4  ;;  %v4259_v32 = vsel %vm6851_vm2, %v8220_v34, 0  ;;  %v6501_v9 = vld [vmem:[%s8589_s9 + $0x48] sm:$0xff]  }
 0x3bb   : > { %v4235_v28 = vshrl.u32 %v4215_v10, 16  ;;  %v4238_v18 = vshll.u32 %v4215_v10, 16  ;;  %v4275_v43 = vshll.u32 %v8220_v34, 16  ;;  %v4280_v63 = vshll.u32 %v8216_v37, 16  ;;  %6310 = vmatprep.mubr.msk.bf16.mxu1 %vm1890_vm3, %v4259_v32 }
 0x3bc   : > { %6311 = vmatmul.mubr.msk.bf16.vlgmr.msra.gmra.mxu1 %vm1890_vm3, %v4260_v20  ;;  %v4273_v51 = vshrl.u32 %v8220_v34, 16  ;;  %v4607_v59 = vsel %vm7406_vm8, %v8220_v34, 0  ;;  %v4608_v56 = vsel %vm7414_vm9, %v8216_v37, 0  ;;  %v4250_v39 = vor.u32 %v4249_v55, %v4246_v29 }
 0x3bd   : > { %v4237_v25 = vrot.slane %v4235_v28, 3  ;;  %v4240_v16 = vrot.slane %v4238_v18, 4  ;;  %v4277_v0 = vrot.slane %v4275_v43, 1  ;;  %6331 = vmatpush3.bf16.msra.mxu1 %v8992_v57  ;;  %v4282_v53 = vrot.slane %v4280_v63, 1  ;;  %v6502_v18 = vld [vmem:[%s8589_s9 + $0x50] sm:$0xff]  }
 0x3be   : > { %6332 = vmatprep.subr.bf16.mxu1 %v6498_v6  ;;  %v4622_v23 = vrot.slane %v4607_v59, 4  ;;  %v4623_v11 = vrot.slane %v4608_v56, 4  ;;  %vm8995_vm8 = vsmask.f32 7424  ;;  %v4284_v7 = vshrl.u32 %v8216_v37, 16  ;;  %v9020_v57 = vld [vmem:[#allocation22_spill] sm:$0xff] }
 0x3bf   : > { %v4241_v47 = vor.u32 %v4240_v16, %v4237_v25  ;;  %v4278_v35 = vor.u32 %v4277_v0, %v4273_v51  ;;  %v8277_v3 = vsel %vm8821_vm1, %v4250_v39, 0  ;;  %vm8998_vm9 = vcmask 1043456   ;;  %vm8999_vm13 = vmmov %vm8995_vm8  ;;  %v9012_v16 = vld [vmem:[#allocation15_spill] sm:$0xff] }
 0x3c0   : > { %v4286_v50 = vor.u32 %v4284_v7, %v4282_v53  ;;  %v4624_v30 = vsel %vm8998_vm9, %v4622_v23, %v4623_v11  ;;  %vm9002_vm1 = vnez %v9001_v12  ;;  %v4486_v31 = vsel %vm7482_vm12, %v8220_v34, 0  ;;  %vm9005_vm0 = vmmov %vm8995_vm8 }
 0x3c1   : > { %v8250_v4 = vsel %vm8993_vm6, %v4232_v19, %v4241_v47  ;;  %v8253_v27 = vsel %vm8994_vm7, %v4241_v47, %v4250_v39  ;;  %v4283_v8 = vsel %vm8995_vm8, %v4278_v35, %v4282_v53  ;;  %6333 = vmatpush3.bf16.msra.mxu1 %v6498_v6  ;;  %v4304_v38 = vshll.u32 %v8277_v3, 16  ;;  %vm9008_vm11 = vmmov %vm8998_vm9  ;;  %v9018_v39 = vld [vmem:[#allocation13_spill] sm:$0xff]  ;;  %v6504_v53 = vld [vmem:[%s8589_s9 + $0x78] sm:$0xff]  }
 0x3c2   : > { %v4261_v26 = vsel %vm6976_vm10, %v8250_v4, 0  ;;  %v4288_v62 = vshll.u32 %v8250_v4, 16  ;;  %6298 = vmatprep.mubr.msk.bf16.mxu0 %vm1890_vm3, %v4283_v8  ;;  %v4262_v33 = vsel %vm7011_vm15, %v8253_v27, 0  ;;  %v4296_v58 = vshll.u32 %v8253_v27, 16  ;;  %6354 = vmatprep.subr.bf16.mxu1 %v6500_v2  ;;  %vm9009_vm6 = vmmov %vm8998_vm9 }
 0x3c3   : > { %6314 = vmatprep.mubr.msk.bf16.mxu1 %vm1890_vm3, %v4261_v26  ;;  %v4292_v13 = vshrl.u32 %v8250_v4, 16  ;;  %v4609_v49 = vsel %vm7447_vm4, %v8250_v4, 0  ;;  %v4610_v52 = vsel %vm9002_vm1, %v8253_v27, 0  ;;  %v4300_v44 = vshrl.u32 %v8253_v27, 16  ;;  %vm9010_vm7 = vmmov %vm9005_vm0 }
 0x3c4   : > { %v4290_v5 = vrot.slane %v4288_v62, 1  ;;  %6315 = vmatmul.mubr.msk.bf16.gmra.mxu1 %vm1890_vm3, %v4262_v33  ;;  %v4298_v41 = vrot.slane %v4296_v58, 1  ;;  %vm9007_vm4 = vcmp.ne.s16.totalorder %v9006_v45, 0  ;;  %v4625_v1 = vrot.slane %v4609_v49, 4 }
 0x3c5   : > { %6334 = vmatprep.mubr.msk.bf16.mxu1 %vm1890_vm3, %v4624_v30  ;;  %v4487_v61 = vsel %vm9007_vm4, %v8216_v37, 0  ;;  %v4627_v14 = vrot.slane %v4610_v52, 4  ;;  %v4501_v20 = vrot.slane %v4486_v31, 1  ;;  %v8321_v55 = vrot.slane %v4304_v38, 1  ;;  %v6503_v30 = vld [vmem:[%s8589_s9 + $0x40] sm:$0xff]  }
 0x3c6   : > { %v8285_v60 = vsel %vm8999_vm13, %v4286_v50, %v4290_v5  ;;  %v4294_v17 = vor.u32 %v4292_v13, %v4290_v5  ;;  %v4302_v10 = vor.u32 %v4300_v44, %v4298_v41  ;;  %v4502_v29 = vrot.slane %v4487_v61, 1  ;;  %v9023_v5 = vld [vmem:[#allocation30_spill] sm:$0xff] }
 0x3c7   : > { %6299 = vmatmul.mubr.msk.bf16.vlgmr.msra.gmra.mxu0 %vm1890_vm3, %v8285_v60  ;;  %v4626_v28 = vsel %vm9008_vm11, %v4623_v11, %v4625_v1  ;;  %v4628_v32 = vsel %vm9009_vm6, %v4625_v1, %v4627_v14  ;;  %vm9011_vm8 = vcmask 1046528   ;;  %vm9013_vm9 = vnez %v9012_v16  ;;  %vm9022_vm11 = vmmov %vm9009_vm6 }
 0x3c8   : > { %6319 = vmatpush3.bf16.msra.mxu0 %v9004_v22  ;;  %v8305_v19 = vsel %vm9005_vm0, %v4294_v17, %v4298_v41  ;;  %v8331_v6 = vsel %vm9010_vm7, %v4302_v10, %v8321_v55  ;;  %v4503_v25 = vsel %vm9011_vm8, %v4501_v20, %v4502_v29  ;;  %v4851_v0 = vsel %vm9013_vm9, %v8220_v34, 0  ;;  %v9026_v41 = vld [vmem:[#allocation31_spill] sm:$0xff]  ;;  %v6505_v34 = vld [vmem:[%s8589_s9 + $0x68] sm:$0xff]  }
 0x3c9   : > { %6302 = vmatprep.mubr.msk.bf16.mxu0 %vm1890_vm3, %v8305_v19  ;;  %6320 = vmatprep.subr.bf16.mxu0 %v6499_v36  ;;  %vm9015_vm13 = vcmp.ne.s16.totalorder %v9014_v15, 0  ;;  %vm9017_vm1 = vcmp.ne.s16.totalorder %v9016_v24, 0  ;;  %vm9019_vm0 = vnez %v9018_v39  ;;  %vm9021_vm4 = vcmp.ne.s16.totalorder %v9020_v57, 0 }
 0x3ca   : > { %v4852_v59 = vsel %vm9015_vm13, %v8216_v37, 0  ;;  %v4488_v56 = vsel %vm9017_vm1, %v8250_v4, 0  ;;  %v4611_v47 = vsel %vm9019_vm0, %v8277_v3, 0  ;;  %v4489_v35 = vsel %vm9021_vm4, %v8253_v27, 0  ;;  %vm9028_vm13 = vmmov %vm9011_vm8 }
 0x3cb   : > { %v4866_v23 = vrot.slane %v4851_v0, 5  ;;  %v4867_v11 = vrot.slane %v4852_v59, 5  ;;  %v4504_v8 = vrot.slane %v4488_v56, 1  ;;  %v4629_v26 = vrot.slane %v4611_v47, 4  ;;  %vm9032_vm0 = vmmov %vm9011_vm8 }
 0x3cc   : > { %6321 = vmatpush3.bf16.msra.mxu0 %v6499_v36  ;;  %6335 = vmatmul.mubr.msk.bf16.vlgmr.msra.gmra.mxu1 %vm1890_vm3, %v4626_v28  ;;  %v4506_v33 = vrot.slane %v4489_v35, 1  ;;  %vm9024_vm6 = vcmp.ne.s16.totalorder %v9023_v5, 0  ;;  %vm9025_vm7 = vcmask 1042432   ;;  %vm9027_vm9 = vcmp.ne.s16.totalorder %v9026_v41, 0 }
 0x3cd   : > { %6342 = vmatprep.subr.bf16.mxu0 %v6501_v9  ;;  %6338 = vmatprep.mubr.msk.bf16.mxu1 %vm1890_vm3, %v4628_v32  ;;  %v4630_v50 = vsel %vm9022_vm11, %v4627_v14, %v4629_v26  ;;  %v4868_v36 = vsel %vm9025_vm7, %v4866_v23, %v4867_v11  ;;  %v4505_v17 = vsel %vm9011_vm8, %v4502_v29, %v4504_v8  ;;  %v4854_v40 = vsel %vm9027_vm9, %v8253_v27, 0  ;;  %vm9030_vm1 = vmmov %vm9025_vm7  ;;  %v6508_v23 = vld [vmem:[%s8589_s9 + $0x88] sm:$0xff]  }
 0x3ce   : > { %6355 = vmatpush3.bf16.msra.mxu1 %v6500_v2  ;;  %v4853_v2 = vsel %vm9024_vm6, %v8250_v4, 0  ;;  %v4733_v49 = vrot.slane %v4273_v51, 4  ;;  %v4507_v12 = vsel %vm9028_vm13, %v4504_v8, %v4506_v33  ;;  %v4734_v52 = vrot.slane %v4275_v43, 5  ;;  %vm9036_vm6 = vmmov %vm9030_vm1  ;;  %v9040_v26 = vld [vmem:[#allocation29_spill] sm:$0xff] }
 0x3cf   : > { %6303 = vmatmul.mubr.msk.bf16.gmra.mxu0 %vm1890_vm3, %v8331_v6  ;;  %6356 = vmatprep.subr.bf16.mxu1 %v6502_v18  ;;  %v4736_v31 = vrot.slane %v4284_v7, 4  ;;  %v4737_v22 = vrot.slane %v4280_v63, 5  ;;  %v4869_v61 = vrot.slane %v4853_v2, 5  ;;  %v4490_v1 = vsel %vm7602_vm5, %v8277_v3, 0  ;;  %vm9031_vm5 = vmmov %vm9030_vm1 }
 0x3d0   : > { %6322 = vmatprep.mubr.msk.bf16.mxu0 %vm1890_vm3, %v4503_v25  ;;  %v4871_v43 = vrot.slane %v4854_v40, 5  ;;  %v4735_v10 = vor.u32 %v4734_v52, %v4733_v49  ;;  %v4508_v7 = vrot.slane %v4490_v1, 1  ;;  %v4740_v20 = vrot.slane %v4292_v13, 4 }
 0x3d1   : > { %v4738_v14 = vor.u32 %v4737_v22, %v4736_v31  ;;  %v4870_v63 = vsel %vm9030_vm1, %v4867_v11, %v4869_v61  ;;  %v4741_v29 = vrot.slane %v4288_v62, 5  ;;  %vm9033_vm4 = vsmask.f32 3328  ;;  %v9034_v62 = vld [vmem:[#allocation16_spill] sm:$0xff]  ;;  %vm9046_vm1 = vmmov %vm9032_vm0 }
 0x3d2   : > { %6357 = vmatpush3.bf16.msra.mxu1 %v6502_v18  ;;  %v4872_v28 = vsel %vm9031_vm5, %v4869_v61, %v4871_v43  ;;  %v4509_v18 = vsel %vm9032_vm0, %v4506_v33, %v4508_v7  ;;  %v4744_v25 = vrot.slane %v4300_v44, 4  ;;  %v4745_v13 = vrot.slane %v4296_v58, 5  ;;  %v6507_v58 = vld [vmem:[%s8589_s9 + $0x60] sm:$0xff]   ;;  %vm9037_vm7 = vmmov %vm9033_vm4 }
 0x3d3   : > { %6378 = vmatprep.subr.bf16.mxu1 %v6504_v53  ;;  %v4739_v32 = vsel %vm9033_vm4, %v4735_v10, %v4738_v14  ;;  %vm9035_vm11 = vnez %v9034_v62  ;;  %v4742_v0 = vor.u32 %v4741_v29, %v4740_v20  ;;  %v4748_v56 = vshrl.u32 %v8277_v3, 16  ;;  %vm9038_vm8 = vmmov %vm9033_vm4 }
 0x3d4   : > { %6339 = vmatmul.mubr.msk.bf16.gmra.mxu1 %vm1890_vm3, %v4630_v50  ;;  %v4855_v16 = vsel %vm9035_vm11, %v8277_v3, 0  ;;  %v4746_v59 = vor.u32 %v4745_v13, %v4744_v25  ;;  %vm9039_vm9 = vmmov %vm9033_vm4  ;;  %vm9041_vm13 = vsmask.f32 7424  ;;  %v4974_v46 = vsel %vm6976_vm10, %v8253_v27, 0 }
 0x3d5   : > { %6358 = vmatprep.mubr.msk.bf16.mxu1 %vm1890_vm3, %v4868_v36  ;;  %v4873_v15 = vrot.slane %v4855_v16, 5  ;;  %v4743_v44 = vsel %vm9037_vm7, %v4738_v14, %v4742_v0  ;;  %v4750_v35 = vrot.slane %v4748_v56, 4  ;;  %v5083_v8 = vor.u32 %v4748_v56, %v8321_v55  ;;  %vm9048_vm5 = vmmov %vm9032_vm0 }
 0x3d6   : > { %v4747_v47 = vsel %vm9038_vm8, %v4742_v0, %v4746_v59  ;;  %v5173_v50 = vsel %vm7482_vm12, %v8216_v37, 0  ;;  %v4975_v54 = vsel %vm7011_vm15, %v8277_v3, 0  ;;  %vm9044_vm10 = vcmp.ne.s16.totalorder %v9016_v24, 0  ;;  %vm9047_vm15 = vmmov %vm9032_vm0 }
 0x3d7   : > { %6323 = vmatmul.mubr.msk.bf16.vlgmr.msra.gmra.mxu0 %vm1890_vm3, %v4505_v17  ;;  %v4874_v39 = vsel %vm9036_vm6, %v4871_v43, %v4873_v15  ;;  %v5084_v33 = vsel %vm9041_vm13, %v5083_v8, %v9040_v26  ;;  %v5186_v5 = vrot.slane %v5173_v50, 1  ;;  %vm9045_vm12 = vcmp.ne.s16.totalorder %v9020_v57, 0 }
 0x3d8   : > { %6343 = vmatpush3.bf16.msra.mxu0 %v6501_v9  ;;  %6326 = vmatprep.mubr.msk.bf16.mxu0 %vm1890_vm3, %v4507_v12  ;;  %v6506_v9 = vld [vmem:[%s8589_s9 + $0x70] sm:$0xff]  }
 0x3d9   : > { %6344 = vmatprep.subr.bf16.mxu0 %v6503_v30 }
 0x3dc   : > { %6345 = vmatpush3.bf16.msra.mxu0 %v6503_v30  ;;  %6359 = vmatmul.mubr.msk.bf16.vlgmr.msra.gmra.mxu1 %vm1890_vm3, %v4870_v63 }
 0x3dd   : > { %6366 = vmatprep.subr.bf16.mxu0 %v6505_v34  ;;  %6362 = vmatprep.mubr.msk.bf16.mxu1 %vm1890_vm3, %v4872_v28 }
 0x3de   : > { %6379 = vmatpush3.bf16.msra.mxu1 %v6504_v53  ;;  %v4751_v53 = vrot.slane %v4304_v38, 5  ;;  %v4972_v38 = vsel %vm6851_vm2, %v8216_v37, 0  ;;  %vm9042_vm2 = vcmp.ne.s16.totalorder %v9006_v45, 0  ;;  %v5176_v37 = vsel %vm9045_vm12, %v8277_v3, 0 }
 0x3df   : > { %6327 = vmatmul.mubr.msk.bf16.gmra.mxu0 %vm1890_vm3, %v4509_v18  ;;  %6380 = vmatprep.subr.bf16.mxu1 %v6506_v9  ;;  %v5174_v55 = vsel %vm9042_vm2, %v8250_v4, 0  ;;  %v5191_v42 = vrot.slane %v5176_v37, 1 }
 0x3e0   : > { %6346 = vmatprep.mubr.msk.bf16.mxu0 %vm1890_vm3, %v4739_v32  ;;  %v4752_v11 = vor.u32 %v4751_v53, %v4750_v35  ;;  %v5187_v21 = vrot.slane %v5174_v55, 1 }
 0x3e1   : > { %v5193_v24 = vsel %vm9048_vm5, %v5191_v42, %v9040_v26 }
 0x3e2   : > { %6381 = vmatpush3.bf16.msra.mxu1 %v6506_v9 }
 0x3e4   : > { %6363 = vmatmul.mubr.msk.bf16.gmra.mxu1 %vm1890_vm3, %v4874_v39 }
 0x3e5   : > { %6382 = vmatprep.mubr.msk.bf16.mxu1 %vm1890_vm3, %v8285_v60  ;;  %v4753_v60 = vsel %vm9039_vm9, %v4746_v59, %v4752_v11 }
 0x3e7   : > { %6347 = vmatmul.mubr.msk.bf16.vlgmr.msra.gmra.mxu0 %vm1890_vm3, %v4743_v44 }
 0x3e8   : > { %6367 = vmatpush3.bf16.msra.mxu0 %v6505_v34  ;;  %6350 = vmatprep.mubr.msk.bf16.mxu0 %vm1890_vm3, %v4747_v47 }
 0x3e9   : > { %6368 = vmatprep.subr.bf16.mxu0 %v6507_v58 }
 0x3ec   : > { %6369 = vmatpush3.bf16.msra.mxu0 %v6507_v58  ;;  %6383 = vmatmul.mubr.msk.bf16.vlgmr.msra.gmra.mxu1 %vm1890_vm3, %v8305_v19  ;;  %v6509_v19 = vld [vmem:[%s8589_s9 + $0x80] sm:$0xff]  }
 0x3ed   : > { %6390 = vmatprep.subr.bf16.mxu0 %v6508_v23  ;;  %6386 = vmatprep.mubr.msk.bf16.mxu1 %vm1890_vm3, %v8331_v6  ;;  %v4973_v6 = vsel %vm6906_vm14, %v8250_v4, 0  ;;  %vm9043_vm14 = vmmov %vm9032_vm0  ;;  %v5175_v4 = vsel %vm9044_vm10, %v8253_v27, 0 }
 0x3ee   : > { %v5188_v2 = vsel %vm9043_vm14, %v5186_v5, %v5187_v21  ;;  %v5189_v45 = vrot.slane %v5175_v4, 1 }
 0x3ef   : > { %6351 = vmatmul.mubr.msk.bf16.gmra.mxu0 %vm1890_vm3, %v4753_v60 }
 0x3f0   : > { %6370 = vmatprep.mubr.msk.bf16.mxu0 %vm1890_vm3, %v4972_v38  ;;  %v5190_v30 = vsel %vm9046_vm1, %v5187_v21, %v5189_v45  ;;  %v5192_v48 = vsel %vm9047_vm15, %v5189_v45, %v5191_v42 }
 0x3f4   : > { %6387 = vmatmul.mubr.msk.bf16.gmra.mxu1 %vm1890_vm3, %v5084_v33 }
 0x3f7   : > { %6371 = vmatmul.mubr.msk.bf16.vlgmr.msra.gmra.mxu0 %vm1890_vm3, %v4973_v6 }
 0x3f8   : > { %6391 = vmatpush3.bf16.msra.mxu0 %v6508_v23  ;;  %6374 = vmatprep.mubr.msk.bf16.mxu0 %vm1890_vm3, %v4974_v46 }
 0x3f9   : > { %6392 = vmatprep.subr.bf16.mxu0 %v6509_v19 }
 0x3fc   : > { %6393 = vmatpush3.bf16.msra.mxu0 %v6509_v19 }
 0x3ff   : > { %6375 = vmatmul.mubr.msk.bf16.gmra.mxu0 %vm1890_vm3, %v4975_v54 }
 0x400   : > { %6394 = vmatprep.mubr.msk.bf16.mxu0 %vm1890_vm3, %v5188_v2 }
 0x407   : > { %6395 = vmatmul.mubr.msk.bf16.vlgmr.msra.gmra.mxu0 %vm1890_vm3, %v5190_v30 }
 0x408   : > { %6398 = vmatprep.mubr.msk.bf16.mxu0 %vm1890_vm3, %v5192_v48 }
 0x40f   : > { %6399 = vmatmul.mubr.msk.bf16.gmra.mxu0 %vm1890_vm3, %v5193_v24 }
 0x47c   : > { %v6312_v27 = vpop.f32.mrf.mxu1 }
 0x47e   : > { %v4455_v36 = vpop.f32.mrf.mxu1 }
 0x480   : > { %v6313_v17 = vpop.f32.mrf.mxu1 }
 0x482   : > { %v4458_v41 = vpop.f32.mrf.mxu1 }
 0x484   : > { %v6316_v57 = vpop.f32.mrf.mxu1 }
 0x486   : > { %v4471_v40 = vpop.f32.mrf.mxu1 }
 0x487   : > { %v6300_v3 = vpop.f32.mrf.mxu0 }
 0x488   : > { %v6317_v12 = vpop.f32.mrf.mxu1  ;;  %v4464_v33 = vadd.f32 %v6312_v27, %v6300_v3 }
 0x489   : > { %v4366_v49 = vpop.f32.mrf.mxu0 }
 0x48a   : > { %v8476_v31 = vpop.f32.mrf.mxu1  ;;  %v4456_v6 = vadd.f32 %v4455_v36, %v4366_v49 }
 0x48b   : > { %v6301_v52 = vpop.f32.mrf.mxu0 }
 0x48c   : > { %v6336_v61 = vpop.f32.mrf.mxu1  ;;  %v4467_v21 = vadd.f32 %v6313_v17, %v6301_v52 }
 0x48d   : > { %v4369_v22 = vpop.f32.mrf.mxu0 }
 0x48e   : > { %v4689_v1 = vpop.f32.mrf.mxu1  ;;  %v4459_v2 = vadd.f32 %v4458_v41, %v4369_v22 }
 0x48f   : > { %v6304_v51 = vpop.f32.mrf.mxu0 }
 0x490   : > { %v6337_v43 = vpop.f32.mrf.mxu1  ;;  %v4480_v30 = vadd.f32 %v6316_v57, %v6304_v51 }
 0x491   : > { %v4382_v34 = vpop.f32.mrf.mxu0 }
 0x492   : > { %v4692_v14 = vpop.f32.mrf.mxu1 }
 0x493   : > { %v6305_v10 = vpop.f32.mrf.mxu0 }
 0x494   : > { %v6340_v63 = vpop.f32.mrf.mxu1  ;;  %v4483_v49 = vadd.f32 %v6317_v12, %v6305_v10 }
 0x495   : > { %v4385_v7 = vpop.f32.mrf.mxu0 }
 0x496   : > { %v8478_v20 = vpop.f32.mrf.mxu1 }
 0x497   : > { %v6324_v9 = vpop.f32.mrf.mxu0 }
 0x498   : > { %v8480_v28 = vpop.f32.mrf.mxu1  ;;  %v4601_v46 = vadd.f32 %v6324_v9, %v4464_v33 }
 0x499   : > { %v4568_v29 = vpop.f32.mrf.mxu0 }
 0x49a   : > { %v8482_v32 = vpop.f32.mrf.mxu1  ;;  %v4599_v5 = vadd.f32 %v4568_v29, %v4456_v6  ;;  %v4722_v45 = vadd.f32 %v6336_v61, %v4601_v46  ;;  %v4475_v61 = vadd.f32 %v8476_v31, %v4385_v7  ;;  %v9053_v6 = vld [vmem:[#allocation36_spill] sm:$0xff] }
 0x49b   : > { %v6325_v18 = vpop.f32.mrf.mxu0 }
 0x49c   : > { %v6360_v13 = vpop.f32.mrf.mxu1  ;;  %v4602_v4 = vadd.f32 %v6325_v18, %v4467_v21 }
 0x49d   : > { %v4571_v25 = vpop.f32.mrf.mxu0 }
 0x49e   : > { %v4933_v16 = vpop.f32.mrf.mxu1  ;;  %v4600_v48 = vadd.f32 %v4571_v25, %v4459_v2  ;;  %v4723_v36 = vadd.f32 %v6337_v43, %v4602_v4 }
 0x49f   : > { %v6328_v62 = vpop.f32.mrf.mxu0 }
 0x4a0   : > { %v6361_v15 = vpop.f32.mrf.mxu1  ;;  %v4605_v27 = vadd.f32 %v6328_v62, %v4480_v30  ;;  %v4721_v41 = vadd.f32 %v4692_v14, %v4600_v48 }
 0x4a1   : > { %v4584_v0 = vpop.f32.mrf.mxu0 }
 0x4a2   : > { %v4936_v56 = vpop.f32.mrf.mxu1  ;;  %v4726_v18 = vadd.f32 %v6340_v63, %v4605_v27 }
 0x4a3   : > { %v6329_v59 = vpop.f32.mrf.mxu0 }
 0x4a4   : > { %v8484_v58 = vpop.f32.mrf.mxu1  ;;  %v4606_v29 = vadd.f32 %v6329_v59, %v4483_v49  ;;  %v9058_v49 = vld [vmem:[#allocation34_spill] sm:$0xff] }
 0x4a5   : > { %v4587_v39 = vpop.f32.mrf.mxu0 }
 0x4a6   : > { %v8486_v35 = vpop.f32.mrf.mxu1 }
 0x4a7   : > { %v6348_v44 = vpop.f32.mrf.mxu0  ;;  %9049 = vst [vmem:[#allocation39_spill] sm:$0xff] %v8486_v35 }
 0x4a8   : > { %v8488_v11 = vpop.f32.mrf.mxu1  ;;  %v4845_v24 = vadd.f32 %v6348_v44, %v4722_v45 }
 0x4a9   : > { %v4812_v47 = vpop.f32.mrf.mxu0  ;;  %9050 = vst [vmem:[#allocation40_spill] sm:$0xff] %v8488_v11  ;;  %v4720_v11 = vadd.f32 %v4689_v1, %v4599_v5 }
 0x4aa   : > { %v8490_v8 = vpop.f32.mrf.mxu1  ;;  %v4966_v22 = vadd.f32 %v6360_v13, %v4845_v24  ;;  %v4727_v13 = vadd.f32 %v8480_v28, %v4606_v29 }
 0x4ab   : > { %v6349_v53 = vpop.f32.mrf.mxu0  ;;  %9051 = vst [vmem:[#allocation41_spill] sm:$0xff] %v8490_v8  ;;  %v4472_v8 = vadd.f32 %v4471_v40, %v4382_v34  ;;  %v4843_v3 = vadd.f32 %v4812_v47, %v4720_v11  ;;  %v4604_v34 = vadd.f32 %v4587_v39, %v4475_v61 }
 0x4ac   : > { %v6384_v55 = vpop.f32.mrf.mxu1  ;;  %v4846_v52 = vadd.f32 %v6349_v53, %v4723_v36 }
 0x4ad   : > { %v4815_v23 = vpop.f32.mrf.mxu0  ;;  %v4603_v9 = vadd.f32 %v4584_v0, %v4472_v8  ;;  %v4964_v1 = vadd.f32 %v4933_v16, %v4843_v3  ;;  %v4725_v39 = vadd.f32 %v8482_v32, %v4604_v34 }
 0x4ae   : > { %v5134_v37 = vpop.f32.mrf.mxu1  ;;  %v4844_v51 = vadd.f32 %v4815_v23, %v4721_v41  ;;  %v4967_v0 = vadd.f32 %v6361_v15, %v4846_v52  ;;  %v9059_v41 = vld [vmem:[#allocation25_spill] sm:$0xff] }
 0x4af   : > { %v6352_v60 = vpop.f32.mrf.mxu0  ;;  %v4724_v43 = vadd.f32 %v8478_v20, %v4603_v9 }
 0x4b0   : > { %v6385_v33 = vpop.f32.mrf.mxu1  ;;  %v4849_v25 = vadd.f32 %v6352_v60, %v4726_v18  ;;  %v4965_v59 = vadd.f32 %v4936_v56, %v4844_v51  ;;  %v9052_v60 = vld [vmem:[#allocation39_spill] sm:$0xff] }
 0x4b1   : > { %v4828_v38 = vpop.f32.mrf.mxu0  ;;  %v9060_v18 = vld [vmem:[#allocation35_spill] sm:$0xff] }
 0x4b2   : > { %v5137_v12 = vpop.f32.mrf.mxu1  ;;  %v4847_v14 = vadd.f32 %v4828_v38, %v4724_v43  ;;  %v4970_v53 = vadd.f32 %v8484_v58, %v4849_v25  ;;  %v9055_v58 = vld [vmem:[#allocation26_spill] sm:$0xff]  ;;  %v9056_v2 = vld [vmem:[#allocation41_spill] sm:$0xff] }
 0x4b3   : > { %v6353_v26 = vpop.f32.mrf.mxu0 }
 0x4b4   : > { %v4850_v44 = vadd.f32 %v6353_v26, %v4727_v13  ;;  %v6388_v16 = vpop.f32.mrf.mxu1  ;;  %v4968_v38 = vadd.f32 %v9052_v60, %v4847_v14  ;;  %v9054_v26 = vld [vmem:[#allocation40_spill] sm:$0xff] }
 0x4b5   : > { %v4831_v19 = vpop.f32.mrf.mxu0 }
 0x4b6   : > { %v4848_v15 = vadd.f32 %v4831_v19, %v4725_v39  ;;  %v4971_v21 = vadd.f32 %v9054_v26, %v4850_v44 }
 0x4b7   : > { %v6372_v50 = vpop.f32.mrf.mxu0 }
 0x4b8   : > { %v5072_v40 = vadd.f32 %v6372_v50, %v4966_v22  ;;  %v4969_v4 = vadd.f32 %v9056_v2, %v4848_v15 }
 0x4b9   : > { %v5039_v54 = vpop.f32.mrf.mxu0 }
 0x4ba   : > { %v5070_v62 = vadd.f32 %v5039_v54, %v4964_v1  ;;  %v5167_v63 = vadd.f32 %v6384_v55, %v5072_v40  ;;  %v5150_v55 = vpop.f32.mrf.mxu1 }
 0x4bb   : > { %v6373_v42 = vpop.f32.mrf.mxu0 }
 0x4bc   : > { %v5073_v7 = vadd.f32 %v6373_v42, %v4967_v0  ;;  %v5165_v11 = vadd.f32 %v5134_v37, %v5070_v62  ;;  %v9057_v42 = vld [vmem:[#allocation24_spill] sm:$0xff]  ;;  %v6389_v27 = vpop.f32.mrf.mxu1  ;;  %v9062_v62 = vld [vmem:[#allocation38_spill] sm:$0xff] }
 0x4bd   : > { %v5042_v35 = vpop.f32.mrf.mxu0 }
 0x4be   : > { %v5071_v47 = vadd.f32 %v5042_v35, %v4965_v59  ;;  %v5168_v50 = vadd.f32 %v6385_v33, %v5073_v7 }
 0x4bf   : > { %v6376_v17 = vpop.f32.mrf.mxu0 }
 0x4c0   : > { %v5076_v8 = vadd.f32 %v6376_v17, %v4970_v53  ;;  %v5166_v54 = vadd.f32 %v5137_v12, %v5071_v47  ;;  %v9061_v12 = vld [vmem:[#allocation37_spill] sm:$0xff] }
 0x4c1   : > { %v5055_v57 = vpop.f32.mrf.mxu0 }
 0x4c2   : > { %v5074_v32 = vadd.f32 %v5055_v57, %v4968_v38  ;;  %v5171_v24 = vadd.f32 %v6388_v16, %v5076_v8  ;;  %v5153_v57 = vpop.f32.mrf.mxu1 }
 0x4c3   : > { %v6377_v10 = vpop.f32.mrf.mxu0 }
 0x4c4   : > { %v5077_v37 = vadd.f32 %v6377_v10, %v4971_v21  ;;  %v5169_v17 = vadd.f32 %v5150_v55, %v5074_v32 }
 0x4c5   : > { %v5058_v31 = vpop.f32.mrf.mxu0 }
 0x4c6   : > { %v5075_v36 = vadd.f32 %v5058_v31, %v4969_v4  ;;  %v5172_v29 = vadd.f32 %v6389_v27, %v5077_v37 }
 0x4c7   : > { %v6396_v20 = vpop.f32.mrf.mxu0 }
 0x4c8   : > { %v5285_v23 = vadd.f32 %v6396_v20, %v5167_v63  ;;  %v5170_v34 = vadd.f32 %v5153_v57, %v5075_v36 }
 0x4c9   : > { %v5252_v28 = vpop.f32.mrf.mxu0 }
 0x4ca   : > { %v5293_v56 = vadd.f32 %v5285_v23, %v9053_v6  ;;  %v5283_v46 = vadd.f32 %v5252_v28, %v5165_v11 }
 0x4cb   : > { %v6397_v5 = vpop.f32.mrf.mxu0 }
 0x4cc   : > { %5301 = vst.msk [vmem:[%s8503_s26 + $0x10] sm:$0xff] %vm1890_vm3, %v5293_v56  ;;  %v5291_v35 = vadd.f32 %v5283_v46, %v9055_v58  ;;  %v5286_v19 = vadd.f32 %v6397_v5, %v5168_v50 }
 0x4cd   : > { %v5255_v45 = vpop.f32.mrf.mxu0 }
 0x4ce   : > { %5299 = vst.msk [vmem:[%s8503_s26] sm:$0xff] %vm1890_vm3, %v5291_v35  ;;  %v5294_v30 = vadd.f32 %v5286_v19, %v9057_v42  ;;  %v5284_v48 = vadd.f32 %v5255_v45, %v5166_v54 }
 0x4cf   : > { %v6400_v3 = vpop.f32.mrf.mxu0 }
 0x4d0   : > { %5302 = vst.msk [vmem:[%s8503_s26 + $0x18] sm:$0xff] %vm1890_vm3, %v5294_v30  ;;  %v5292_v9 = vadd.f32 %v5284_v48, %v9058_v49  ;;  %v5289_v33 = vadd.f32 %v6400_v3, %v5171_v24 }
 0x4d1   : > { %v5268_v52 = vpop.f32.mrf.mxu0 }
 0x4d2   : > { %5300 = vst.msk [vmem:[%s8503_s26 + $0x8] sm:$0xff] %vm1890_vm3, %v5292_v9  ;;  %v5297_v22 = vadd.f32 %v5289_v33, %v9059_v41  ;;  %v5287_v61 = vadd.f32 %v5268_v52, %v5169_v17 }
 0x4d3   : > { %v6401_v51 = vpop.f32.mrf.mxu0 }
 0x4d4   : > { %5305 = vst.msk [vmem:[%s8503_s26 + $0x30] sm:$0xff] %vm1890_vm3, %v5297_v22  ;;  %v5295_v40 = vadd.f32 %v5287_v61, %v9060_v18  ;;  %v5290_v1 = vadd.f32 %v6401_v51, %v5172_v29 }
 0x4d5   : > { %v5271_v43 = vpop.f32.mrf.mxu0 }
 0x4d6   : > { %5303 = vst.msk [vmem:[%s8503_s26 + $0x20] sm:$0xff] %vm1890_vm3, %v5295_v40  ;;  %v5298_v10 = vadd.f32 %v5290_v1, %v9061_v12  ;;  %v5288_v25 = vadd.f32 %v5271_v43, %v5170_v34 }
 0x4d8   : > { %5306 = vst.msk [vmem:[%s8503_s26 + $0x38] sm:$0xff] %vm1890_vm3, %v5298_v10  ;;  %v5296_v0 = vadd.f32 %v5288_v25, %v9062_v62 }
 0x4da   : > { %5304 = vst.msk [vmem:[%s8503_s26 + $0x28] sm:$0xff] %vm1890_vm3, %v5296_v0 }
 0x4db   : > { %6523 = shalt.err (!%p6520_p3)
}
 0x4dc   : > { %s6524_s21 = scalar_lea.hbm %s8529_s22, 1024  ;;  %s6528_s19 = scalar_lea.hbm %s8594_s14, 2048 }
 0x4dd   : > { %p6525_p4 = scmp.ne.s32.totalorder %s8529_s22, %s6524_s21  ;;  %p6529_p9 = scmp.lt.s32.totalorder %s8529_s22, %s8594_s14 }
 0x4de   : > { %p6530_p10 = scmp.lt.s32.totalorder %s6528_s19, %s6524_s21 }
 0x4df   : > { %p6526_p7 = pnand %p6525_p4, %p6689_p5 }
 0x4e0   : > { %p6531_p11 = por %p6530_p10, %p6529_p9 }
 0x4e1   : > { %p6527_p8 = pneg %p6526_p7 }
 0x4e3   : > { %p6532_p12 = pnand %p6531_p11, %p6527_p8 }
 0x4e5   : > { %6535 = shalt.err (!%p6532_p12)
}
 0x4e6   : > { %s6574_s20 = smov 128   ;;  %s6575_s25 = smov 8  }
 0x4e7   : > { %6404 = dma.vmem_to_hbm [thread:$0]  (%p6689_p5), %s8531_s18, 1024, %s8529_s22, %s8540_s17, %s6574_s20, %s6574_s20, %s6575_s25  }
 0x4e8 PF: > { %p6410_p13 = scmp.ge.s32.totalorder %s6570_s16, 2  ;;  %s5336_s28 = sand.u32 1, %s6558_s29  }
 0x4e9   : > { %s5337_s0 = scalar_lea.sflag [#allocation3], %s5336_s28 }
 0x4ea   : > { %p6407_p0 = pnand %p6410_p13, %p6693_p6 }
 0x4ec   : > { %p6408_p1 = pneg %p6407_p0 }
 0x4ee   : > { %6553 = dma.done.wait (%p6408_p1), %s5337_s0, 1024  }
 0x4ef   : > { %6555 = vsyncadd (%p6408_p1), %s5337_s0, 4294966272  ;;  %s9063_s16 = sld [smem:[#allocation6_spill]]  ;;  %s9066_s29 = smov %s6562_s30 }
 0x4f0   : > { %s9064_s21 = sld [smem:[#allocation5_spill]] }
 0x4f1   : > { %s9065_s15 = sld [smem:[#allocation7_spill]] }
 0x4f5   : > { %p24_p2 = scmp.ge.s32.totalorder %s9063_s16, 4  }
 0x4f6   : > { %s9067_s30 = smov %s9064_s21 }
 0x4f7   :  { %26 = sbr.rel (!%p24_p2) target bundleno = 5 (0x5), region = 146 }
 0x4fc   :  { %5342 = vsyncpa [#allocation3], 1 }
 0x4fd   :  { %5344 = vsyncpa [#allocation3 + $0x1], 1 }

</bundles_post_ra>
